<compile_context>
chip_gen: v6e
topology: v6e:2x2x1
jax: 0.10.0
libtpu: 0.0.40
codegen_flags: <defaults>
</compile_context>

<pallas_src>
import functools

import jax
import jax.numpy as jnp
from jax.experimental import pallas as pl
from jax.experimental.pallas import tpu as pltpu
from jax.scipy.linalg import block_diag

# ----- synthetic "para" hyper-parameters -----
STACKSIZE = 4            # para.stacksize (ss) == channels of each branch
SIZE1 = 2                # para.size1  -> size1*ss = 8  channels
SIZE2 = 3                # para.size2  -> size2*ss = 12 channels
LENGTH = 128             # 1-D spatial length L (lane dimension)
BATCH = 2

_KERNEL_SIZES = (3, 5, 7, 5, 3)
_PADS = (1, 2, 3, 2, 1)
_N_LAYERS = len(_KERNEL_SIZES)


# ---------------------------------------------------------------------------
# Fused Pallas kernel: whole forward pass in one invocation
# ---------------------------------------------------------------------------
def _fused_kernel(x_ref, pow_ref, *refs, B, ss):
    o_ref = refs[-1]
    wb = refs[:-1]                                     # 2*5 phase-1 + 2*5 phase-2 refs
    phase1 = [(wb[2 * i], wb[2 * i + 1]) for i in range(_N_LAYERS)]
    phase2 = [(wb[2 * _N_LAYERS + 2 * i], wb[2 * _N_LAYERS + 2 * i + 1])
              for i in range(_N_LAYERS)]
    L = x_ref.shape[-1]

    def cnn5(h, layers):
        # h: (n_seg*C_in, L).  Each layer: K lane-rolls (circular padding),
        # one sublane-aligned concat, ONE block-diagonal MXU matmul, bias, ReLU.
        for li, (w_ref, b_ref) in enumerate(layers):
            K, pad = _KERNEL_SIZES[li], _PADS[li]
            rolled = [h if (pad - k) % L == 0
                      else pltpu.roll(h, shift=(pad - k) % L, axis=1)
                      for k in range(K)]
            stacked = jnp.concatenate(rolled, axis=0)        # (K*n_seg*C_in, L)
            h = jnp.dot(w_ref[...], stacked,
                        preferred_element_type=jnp.float32) + b_ref[...]
            if li < _N_LAYERS - 1:
                h = jnp.maximum(h, 0.0)
        return h

    # ---- phase 1: cnn_u(u), cnn_v(v), cnn_p(p) for all batch elements ----
    y1 = cnn5(x_ref[...], phase1)                            # (3*B*ss, L)

    # ---- closed-form z recurrence + slices -> phase-2 inputs ----
    pw = pow_ref[...]                 # (3*ss, L) rows: c_u**i, c[L+1:2L+1]**i, c_p**i
    pw_u = pw[0:ss, :]
    pw_v = pw[ss:2 * ss, :]
    pw_p = pw[2 * ss:3 * ss, :]
    lane = jax.lax.broadcasted_iota(jnp.int32, (1, L), 1)

    blocks = []
    for b in range(B):                                       # z[:, :, :L]
        blocks.append(pw_u * y1[b * ss:b * ss + 1, :])
    for b in range(B):                                       # z[:, :, L+1:2L+1]
        v0 = y1[(B + b) * ss:(B + b) * ss + 1, :]
        p0 = y1[(2 * B + b) * ss:(2 * B + b) * ss + 1, :]
        # base[l] = v1[b,0,l+1] for l < L-1, and p1[b,0,0] at l = L-1
        base = jnp.where(lane == L - 1,
                         pltpu.roll(p0, shift=L - 1, axis=1),
                         pltpu.roll(v0, shift=L - 1, axis=1))
        blocks.append(pw_v * base)
    for b in range(B):                                       # z[:, :, 2L:]
        blocks.append(pw_p * y1[(2 * B + b) * ss:(2 * B + b) * ss + 1, :])
    x2 = jnp.concatenate(blocks, axis=0)                     # (3*B*ss, L)

    # ---- phase 2 (cnn_u_/v_/p_) + residual ----
    o_ref[...] = (y1 + cnn5(x2, phase2)).astype(o_ref.dtype)


# ---------------------------------------------------------------------------
# Host-side packing + pallas_call wrapper
# ---------------------------------------------------------------------------
def _full_spec(shape):
    nd = len(shape)
    return pl.BlockSpec(shape, lambda i, _nd=nd: (0,) * _nd)


def _pack_layer(branch_params, layer_idx, B):
    """Pack one conv layer of the three branches (u, v, p), each replicated
    over the B batch segments, into one block-diagonal lane-dense matmul."""
    K = _KERNEL_SIZES[layer_idx]
    ws, bs = [], []
    for br in range(3):                       # segment order: u*B, v*B, p*B
        w, b = branch_params[br][layer_idx]   # w: (C_out, C_in, K) PyTorch layout
        ws += [w] * B
        bs += [b] * B
    wbig = jnp.concatenate(
        [block_diag(*[w[:, :, k] for w in ws]) for k in range(K)], axis=1)
    bbig = jnp.concatenate(bs).reshape(-1, 1)
    return wbig, bbig


def forward(u, v, p, params6, Ainv, Bmat):
    """Forward pass of `network`.  u, v, p: (B, ss, L).
    params6 = (cnn_u, cnn_v, cnn_p, cnn_u_, cnn_v_, cnn_p_); each entry is a
    list of 5 (weight (C_out, C_in, K), bias (C_out,)) tuples."""
    B, ss, L = u.shape
    n_seg = 3 * B

    # Stack the 6 independent circular-conv problems along the sublane axis.
    x0 = jnp.concatenate([u.reshape(B * ss, L),
                          v.reshape(B * ss, L),
                          p.reshape(B * ss, L)], axis=0).astype(jnp.float32)

    # einsum('ij,bj->bj', Ainv@B, row) == colsum(Ainv@B) * row; the sequential
    # z update therefore collapses to z[:, i, :] = c**i * z[:, 0, :].
    c = jnp.sum(Ainv.sum(axis=0)[:, None] * Bmat, axis=0)      # (3L,)
    c_u, c_v, c_p = c[:L], c[L:2 * L], c[2 * L:]
    c_vs = jnp.concatenate([c_v[1:], c_p[:1]])                 # off-by-one v slice

    def _pows(cv):
        rows = [jnp.ones_like(cv)]
        for _ in range(ss - 1):
            rows.append(rows[-1] * cv)
        return jnp.stack(rows, axis=0)                         # (ss, L)

    pow_arr = jnp.concatenate([_pows(c_u), _pows(c_vs), _pows(c_p)], axis=0)

    flat = [x0, pow_arr]
    in_specs = [_full_spec(x0.shape), _full_spec(pow_arr.shape)]
    for phase in (params6[:3], params6[3:]):
        for li in range(_N_LAYERS):
            wbig, bbig = _pack_layer(phase, li, B)
            flat += [wbig, bbig]
            in_specs += [_full_spec(wbig.shape), _full_spec(bbig.shape)]

    out = pl.pallas_call(
        functools.partial(_fused_kernel, B=B, ss=ss),
        out_shape=jax.ShapeDtypeStruct((n_seg * ss, L), jnp.float32),
        grid=(1,),
        in_specs=in_specs,
        out_specs=_full_spec((n_seg * ss, L)),
        compiler_params=pltpu.CompilerParams(
            dimension_semantics=("arbitrary",)),
    )(*flat)

    u_o = out[0:B * ss].reshape(B, ss, L)
    v_o = out[B * ss:2 * B * ss].reshape(B, ss, L)
    p_o = out[2 * B * ss:3 * B * ss].reshape(B, ss, L)
    return u_o, v_o, p_o


# ---------------------------------------------------------------------------
# Exact-f32 pure-JAX reference (no MXU dots), mirroring the PyTorch forward
# ---------------------------------------------------------------------------
def _ref_conv(x, w, b, pad):
    K = w.shape[2]
    out = jnp.zeros((x.shape[0], w.shape[0], x.shape[2]), jnp.float32) + b.reshape(1, -1, 1)
    for k in range(K):
        xs = jnp.roll(x, pad - k, axis=2)
        out = out + jnp.sum(w[None, :, :, k, None] * xs[:, None, :, :], axis=2)
    return out


def _ref_cnn5(x, params):
    h = x
    for li, (w, b) in enumerate(params):
        h = _ref_conv(h, w, b, _PADS[li])
        if li < len(params) - 1:
            h = jnp.maximum(h, 0.0)
    return h


def _ref_forward(u, v, p, params6, Ainv, Bmat):
    pu, pv, pp, pu_, pv_, pp_ = params6
    u1, v1, p1 = _ref_cnn5(u, pu), _ref_cnn5(v, pv), _ref_cnn5(p, pp)
    L = u1.shape[2]
    z = jnp.concatenate([u1, v1, p1], axis=2)
    c = jnp.sum(Ainv.sum(axis=0)[:, None] * Bmat, axis=0)
    for i in range(STACKSIZE - 1):
        z = z.at[:, i + 1, :].set(c[None, :] * z[:, i, :])
    return (u1 + _ref_cnn5(z[:, :, :L], pu_),
            v1 + _ref_cnn5(z[:, :, L + 1:2 * L + 1], pv_),   # off-by-one as in spec
            p1 + _ref_cnn5(z[:, :, 2 * L:], pp_))


if __name__ == "__main__":
    key = jax.random.PRNGKey(0)
    ss = STACKSIZE
    chans = [ss, SIZE1 * ss, SIZE2 * ss, SIZE2 * ss, SIZE1 * ss, ss]

    def make_cnn(key):
        ps = []
        for li in range(_N_LAYERS):
            key, kw, kb = jax.random.split(key, 3)
            c_in, c_out, K = chans[li], chans[li + 1], _KERNEL_SIZES[li]
            bound = 1.0 / (c_in * K) ** 0.5
            w = jax.random.uniform(kw, (c_out, c_in, K), jnp.float32, -bound, bound)
            b = jax.random.uniform(kb, (c_out,), jnp.float32, -bound, bound)
            ps.append((w, b))
        return key, ps

    # Six independent branches (cnn_u, cnn_v, cnn_p, cnn_u_, cnn_v_, cnn_p_).
    # In the PyTorch module they start as deepcopies (identical values); here we
    # use distinct values, which exercises the general case.
    branch_params = []
    for _ in range(6):
        key, ps = make_cnn(key)
        branch_params.append(ps)
    params6 = tuple(branch_params)

    key, ka, kb2, ku, kv, kp = jax.random.split(key, 6)
    Ainv = jax.random.uniform(ka, (ss, ss), jnp.float32, -0.5, 0.5)
    Bmat = jax.random.uniform(kb2, (ss, 3 * LENGTH), jnp.float32, -0.5, 0.5)
    u = jax.random.normal(ku, (BATCH, ss, LENGTH), jnp.float32)
    v = jax.random.normal(kv, (BATCH, ss, LENGTH), jnp.float32)
    p = jax.random.normal(kp, (BATCH, ss, LENGTH), jnp.float32)

    fwd = jax.jit(forward)
    u_o, v_o, p_o = fwd(u, v, p, params6, Ainv, Bmat)
    jax.block_until_ready((u_o, v_o, p_o))

    u_r, v_r, p_r = _ref_forward(u, v, p, params6, Ainv, Bmat)
    for got, ref in ((u_o, u_r), (v_o, v_r), (p_o, p_r)):
        assert got.shape == ref.shape
        err = float(jnp.max(jnp.abs(got - ref)))
        assert jnp.allclose(got, ref, rtol=1e-3, atol=1e-3), err

    print("KERNEL_OK")
</pallas_src>

<mosaic_0001>
module attributes {stable_mosaic.version = 11 : i64} {
  func.func @_fused_kernel(%arg0: i32, %arg1: memref<24x128xf32, #tpu.memory_space<vmem>>, %arg2: memref<12x128xf32, #tpu.memory_space<vmem>>, %arg3: memref<48x72xf32, #tpu.memory_space<vmem>>, %arg4: memref<48x1xf32, #tpu.memory_space<vmem>>, %arg5: memref<72x240xf32, #tpu.memory_space<vmem>>, %arg6: memref<72x1xf32, #tpu.memory_space<vmem>>, %arg7: memref<72x504xf32, #tpu.memory_space<vmem>>, %arg8: memref<72x1xf32, #tpu.memory_space<vmem>>, %arg9: memref<48x360xf32, #tpu.memory_space<vmem>>, %arg10: memref<48x1xf32, #tpu.memory_space<vmem>>, %arg11: memref<24x144xf32, #tpu.memory_space<vmem>>, %arg12: memref<24x1xf32, #tpu.memory_space<vmem>>, %arg13: memref<48x72xf32, #tpu.memory_space<vmem>>, %arg14: memref<48x1xf32, #tpu.memory_space<vmem>>, %arg15: memref<72x240xf32, #tpu.memory_space<vmem>>, %arg16: memref<72x1xf32, #tpu.memory_space<vmem>>, %arg17: memref<72x504xf32, #tpu.memory_space<vmem>>, %arg18: memref<72x1xf32, #tpu.memory_space<vmem>>, %arg19: memref<48x360xf32, #tpu.memory_space<vmem>>, %arg20: memref<48x1xf32, #tpu.memory_space<vmem>>, %arg21: memref<24x144xf32, #tpu.memory_space<vmem>>, %arg22: memref<24x1xf32, #tpu.memory_space<vmem>>, %arg23: memref<24x128xf32, #tpu.memory_space<vmem>>) attributes {dimension_semantics = [#tpu.dimension_semantics<arbitrary>], iteration_bounds = array<i64: 1>, scalar_prefetch = 0 : i64, scratch_operands = 0 : i64, tpu.core_type = #tpu.core_type<tc>, window_params = [{pipeline_mode = #tpu.pipeline_mode<synchronous>, transform_indices = @transform_0, window_bounds = array<i64: 24, 128>}, {pipeline_mode = #tpu.pipeline_mode<synchronous>, transform_indices = @transform_1, window_bounds = array<i64: 12, 128>}, {pipeline_mode = #tpu.pipeline_mode<synchronous>, transform_indices = @transform_2, window_bounds = array<i64: 48, 72>}, {pipeline_mode = #tpu.pipeline_mode<synchronous>, transform_indices = @transform_3, window_bounds = array<i64: 48, 1>}, {pipeline_mode = #tpu.pipeline_mode<synchronous>, transform_indices = @transform_4, window_bounds = array<i64: 72, 240>}, {pipeline_mode = #tpu.pipeline_mode<synchronous>, transform_indices = @transform_5, window_bounds = array<i64: 72, 1>}, {pipeline_mode = #tpu.pipeline_mode<synchronous>, transform_indices = @transform_6, window_bounds = array<i64: 72, 504>}, {pipeline_mode = #tpu.pipeline_mode<synchronous>, transform_indices = @transform_7, window_bounds = array<i64: 72, 1>}, {pipeline_mode = #tpu.pipeline_mode<synchronous>, transform_indices = @transform_8, window_bounds = array<i64: 48, 360>}, {pipeline_mode = #tpu.pipeline_mode<synchronous>, transform_indices = @transform_9, window_bounds = array<i64: 48, 1>}, {pipeline_mode = #tpu.pipeline_mode<synchronous>, transform_indices = @transform_10, window_bounds = array<i64: 24, 144>}, {pipeline_mode = #tpu.pipeline_mode<synchronous>, transform_indices = @transform_11, window_bounds = array<i64: 24, 1>}, {pipeline_mode = #tpu.pipeline_mode<synchronous>, transform_indices = @transform_12, window_bounds = array<i64: 48, 72>}, {pipeline_mode = #tpu.pipeline_mode<synchronous>, transform_indices = @transform_13, window_bounds = array<i64: 48, 1>}, {pipeline_mode = #tpu.pipeline_mode<synchronous>, transform_indices = @transform_14, window_bounds = array<i64: 72, 240>}, {pipeline_mode = #tpu.pipeline_mode<synchronous>, transform_indices = @transform_15, window_bounds = array<i64: 72, 1>}, {pipeline_mode = #tpu.pipeline_mode<synchronous>, transform_indices = @transform_16, window_bounds = array<i64: 72, 504>}, {pipeline_mode = #tpu.pipeline_mode<synchronous>, transform_indices = @transform_17, window_bounds = array<i64: 72, 1>}, {pipeline_mode = #tpu.pipeline_mode<synchronous>, transform_indices = @transform_18, window_bounds = array<i64: 48, 360>}, {pipeline_mode = #tpu.pipeline_mode<synchronous>, transform_indices = @transform_19, window_bounds = array<i64: 48, 1>}, {pipeline_mode = #tpu.pipeline_mode<synchronous>, transform_indices = @transform_20, window_bounds = array<i64: 24, 144>}, {pipeline_mode = #tpu.pipeline_mode<synchronous>, transform_indices = @transform_21, window_bounds = array<i64: 24, 1>}, {pipeline_mode = #tpu.pipeline_mode<synchronous>, transform_indices = @transform_22, window_bounds = array<i64: 24, 128>}]} {
    %c0 = arith.constant 0 : index
    %c0_0 = arith.constant 0 : index
    %0 = vector.load %arg1[%c0, %c0_0] : memref<24x128xf32, #tpu.memory_space<vmem>>, vector<24x128xf32>
    %c1_i32 = arith.constant 1 : i32
    %1 = tpu.dynamic_rotate %0 by %c1_i32 dim 1 : vector<24x128xf32>, i32 -> vector<24x128xf32>
    %c127_i32 = arith.constant 127 : i32
    %2 = tpu.dynamic_rotate %0 by %c127_i32 dim 1 : vector<24x128xf32>, i32 -> vector<24x128xf32>
    %3 = tpu.concatenate %1, %0, %2 in 0 : vector<24x128xf32>, vector<24x128xf32>, vector<24x128xf32> -> vector<72x128xf32>
    %c0_1 = arith.constant 0 : index
    %c0_2 = arith.constant 0 : index
    %4 = vector.load %arg3[%c0_1, %c0_2] : memref<48x72xf32, #tpu.memory_space<vmem>>, vector<48x72xf32>
    %cst = arith.constant dense<0.000000e+00> : vector<48x128xf32>
    %5 = tpu.matmul %4, %3, %cst {dimension_numbers = #tpu.dot_dimension_numbers<[1], [0], [0], [1], [0, 0, 1, 1], [], []>} : vector<48x72xf32>, vector<72x128xf32>, vector<48x128xf32> -> vector<48x128xf32>
    %c0_3 = arith.constant 0 : index
    %c0_4 = arith.constant 0 : index
    %6 = vector.load %arg4[%c0_3, %c0_4] : memref<48x1xf32, #tpu.memory_space<vmem>>, vector<48x1xf32>
    %7 = vector.broadcast %6 : vector<48x1xf32> to vector<48x128xf32>
    %8 = arith.addf %5, %7 : vector<48x128xf32>
    %cst_5 = arith.constant 0.000000e+00 : f32
    %9 = vector.broadcast %cst_5 : f32 to vector<48x128xf32>
    %10 = arith.maximumf %8, %9 : vector<48x128xf32>
    %c2_i32 = arith.constant 2 : i32
    %11 = tpu.dynamic_rotate %10 by %c2_i32 dim 1 : vector<48x128xf32>, i32 -> vector<48x128xf32>
    %c1_i32_6 = arith.constant 1 : i32
    %12 = tpu.dynamic_rotate %10 by %c1_i32_6 dim 1 : vector<48x128xf32>, i32 -> vector<48x128xf32>
    %c127_i32_7 = arith.constant 127 : i32
    %13 = tpu.dynamic_rotate %10 by %c127_i32_7 dim 1 : vector<48x128xf32>, i32 -> vector<48x128xf32>
    %c126_i32 = arith.constant 126 : i32
    %14 = tpu.dynamic_rotate %10 by %c126_i32 dim 1 : vector<48x128xf32>, i32 -> vector<48x128xf32>
    %15 = tpu.concatenate %11, %12, %10, %13, %14 in 0 : vector<48x128xf32>, vector<48x128xf32>, vector<48x128xf32>, vector<48x128xf32>, vector<48x128xf32> -> vector<240x128xf32>
    %c0_8 = arith.constant 0 : index
    %c0_9 = arith.constant 0 : index
    %16 = vector.load %arg5[%c0_8, %c0_9] : memref<72x240xf32, #tpu.memory_space<vmem>>, vector<72x240xf32>
    %cst_10 = arith.constant dense<0.000000e+00> : vector<72x128xf32>
    %17 = tpu.matmul %16, %15, %cst_10 {dimension_numbers = #tpu.dot_dimension_numbers<[1], [0], [0], [1], [0, 0, 1, 1], [], []>} : vector<72x240xf32>, vector<240x128xf32>, vector<72x128xf32> -> vector<72x128xf32>
    %c0_11 = arith.constant 0 : index
    %c0_12 = arith.constant 0 : index
    %18 = vector.load %arg6[%c0_11, %c0_12] : memref<72x1xf32, #tpu.memory_space<vmem>>, vector<72x1xf32>
    %19 = vector.broadcast %18 : vector<72x1xf32> to vector<72x128xf32>
    %20 = arith.addf %17, %19 : vector<72x128xf32>
    %cst_13 = arith.constant 0.000000e+00 : f32
    %21 = vector.broadcast %cst_13 : f32 to vector<72x128xf32>
    %22 = arith.maximumf %20, %21 : vector<72x128xf32>
    %c3_i32 = arith.constant 3 : i32
    %23 = tpu.dynamic_rotate %22 by %c3_i32 dim 1 : vector<72x128xf32>, i32 -> vector<72x128xf32>
    %c2_i32_14 = arith.constant 2 : i32
    %24 = tpu.dynamic_rotate %22 by %c2_i32_14 dim 1 : vector<72x128xf32>, i32 -> vector<72x128xf32>
    %c1_i32_15 = arith.constant 1 : i32
    %25 = tpu.dynamic_rotate %22 by %c1_i32_15 dim 1 : vector<72x128xf32>, i32 -> vector<72x128xf32>
    %c127_i32_16 = arith.constant 127 : i32
    %26 = tpu.dynamic_rotate %22 by %c127_i32_16 dim 1 : vector<72x128xf32>, i32 -> vector<72x128xf32>
    %c126_i32_17 = arith.constant 126 : i32
    %27 = tpu.dynamic_rotate %22 by %c126_i32_17 dim 1 : vector<72x128xf32>, i32 -> vector<72x128xf32>
    %c125_i32 = arith.constant 125 : i32
    %28 = tpu.dynamic_rotate %22 by %c125_i32 dim 1 : vector<72x128xf32>, i32 -> vector<72x128xf32>
    %29 = tpu.concatenate %23, %24, %25, %22, %26, %27, %28 in 0 : vector<72x128xf32>, vector<72x128xf32>, vector<72x128xf32>, vector<72x128xf32>, vector<72x128xf32>, vector<72x128xf32>, vector<72x128xf32> -> vector<504x128xf32>
    %c0_18 = arith.constant 0 : index
    %c0_19 = arith.constant 0 : index
    %30 = vector.load %arg7[%c0_18, %c0_19] : memref<72x504xf32, #tpu.memory_space<vmem>>, vector<72x504xf32>
    %cst_20 = arith.constant dense<0.000000e+00> : vector<72x128xf32>
    %31 = tpu.matmul %30, %29, %cst_20 {dimension_numbers = #tpu.dot_dimension_numbers<[1], [0], [0], [1], [0, 0, 1, 1], [], []>} : vector<72x504xf32>, vector<504x128xf32>, vector<72x128xf32> -> vector<72x128xf32>
    %c0_21 = arith.constant 0 : index
    %c0_22 = arith.constant 0 : index
    %32 = vector.load %arg8[%c0_21, %c0_22] : memref<72x1xf32, #tpu.memory_space<vmem>>, vector<72x1xf32>
    %33 = vector.broadcast %32 : vector<72x1xf32> to vector<72x128xf32>
    %34 = arith.addf %31, %33 : vector<72x128xf32>
    %cst_23 = arith.constant 0.000000e+00 : f32
    %35 = vector.broadcast %cst_23 : f32 to vector<72x128xf32>
    %36 = arith.maximumf %34, %35 : vector<72x128xf32>
    %c2_i32_24 = arith.constant 2 : i32
    %37 = tpu.dynamic_rotate %36 by %c2_i32_24 dim 1 : vector<72x128xf32>, i32 -> vector<72x128xf32>
    %c1_i32_25 = arith.constant 1 : i32
    %38 = tpu.dynamic_rotate %36 by %c1_i32_25 dim 1 : vector<72x128xf32>, i32 -> vector<72x128xf32>
    %c127_i32_26 = arith.constant 127 : i32
    %39 = tpu.dynamic_rotate %36 by %c127_i32_26 dim 1 : vector<72x128xf32>, i32 -> vector<72x128xf32>
    %c126_i32_27 = arith.constant 126 : i32
    %40 = tpu.dynamic_rotate %36 by %c126_i32_27 dim 1 : vector<72x128xf32>, i32 -> vector<72x128xf32>
    %41 = tpu.concatenate %37, %38, %36, %39, %40 in 0 : vector<72x128xf32>, vector<72x128xf32>, vector<72x128xf32>, vector<72x128xf32>, vector<72x128xf32> -> vector<360x128xf32>
    %c0_28 = arith.constant 0 : index
    %c0_29 = arith.constant 0 : index
    %42 = vector.load %arg9[%c0_28, %c0_29] : memref<48x360xf32, #tpu.memory_space<vmem>>, vector<48x360xf32>
    %cst_30 = arith.constant dense<0.000000e+00> : vector<48x128xf32>
    %43 = tpu.matmul %42, %41, %cst_30 {dimension_numbers = #tpu.dot_dimension_numbers<[1], [0], [0], [1], [0, 0, 1, 1], [], []>} : vector<48x360xf32>, vector<360x128xf32>, vector<48x128xf32> -> vector<48x128xf32>
    %c0_31 = arith.constant 0 : index
    %c0_32 = arith.constant 0 : index
    %44 = vector.load %arg10[%c0_31, %c0_32] : memref<48x1xf32, #tpu.memory_space<vmem>>, vector<48x1xf32>
    %45 = vector.broadcast %44 : vector<48x1xf32> to vector<48x128xf32>
    %46 = arith.addf %43, %45 : vector<48x128xf32>
    %cst_33 = arith.constant 0.000000e+00 : f32
    %47 = vector.broadcast %cst_33 : f32 to vector<48x128xf32>
    %48 = arith.maximumf %46, %47 : vector<48x128xf32>
    %c1_i32_34 = arith.constant 1 : i32
    %49 = tpu.dynamic_rotate %48 by %c1_i32_34 dim 1 : vector<48x128xf32>, i32 -> vector<48x128xf32>
    %c127_i32_35 = arith.constant 127 : i32
    %50 = tpu.dynamic_rotate %48 by %c127_i32_35 dim 1 : vector<48x128xf32>, i32 -> vector<48x128xf32>
    %51 = tpu.concatenate %49, %48, %50 in 0 : vector<48x128xf32>, vector<48x128xf32>, vector<48x128xf32> -> vector<144x128xf32>
    %c0_36 = arith.constant 0 : index
    %c0_37 = arith.constant 0 : index
    %52 = vector.load %arg11[%c0_36, %c0_37] : memref<24x144xf32, #tpu.memory_space<vmem>>, vector<24x144xf32>
    %cst_38 = arith.constant dense<0.000000e+00> : vector<24x128xf32>
    %53 = tpu.matmul %52, %51, %cst_38 {dimension_numbers = #tpu.dot_dimension_numbers<[1], [0], [0], [1], [0, 0, 1, 1], [], []>} : vector<24x144xf32>, vector<144x128xf32>, vector<24x128xf32> -> vector<24x128xf32>
    %c0_39 = arith.constant 0 : index
    %c0_40 = arith.constant 0 : index
    %54 = vector.load %arg12[%c0_39, %c0_40] : memref<24x1xf32, #tpu.memory_space<vmem>>, vector<24x1xf32>
    %55 = vector.broadcast %54 : vector<24x1xf32> to vector<24x128xf32>
    %56 = arith.addf %53, %55 : vector<24x128xf32>
    %c0_41 = arith.constant 0 : index
    %c0_42 = arith.constant 0 : index
    %57 = vector.load %arg2[%c0_41, %c0_42] : memref<12x128xf32, #tpu.memory_space<vmem>>, vector<12x128xf32>
    %58 = vector.extract_strided_slice %57 {offsets = [0, 0], sizes = [4, 128], strides = [1, 1]} : vector<12x128xf32> to vector<4x128xf32>
    %59 = vector.extract_strided_slice %57 {offsets = [4, 0], sizes = [4, 128], strides = [1, 1]} : vector<12x128xf32> to vector<4x128xf32>
    %60 = vector.extract_strided_slice %57 {offsets = [8, 0], sizes = [4, 128], strides = [1, 1]} : vector<12x128xf32> to vector<4x128xf32>
    %61 = tpu.iota {dimensions = array<i32: 1>} : vector<1x128xi32>
    %62 = vector.extract_strided_slice %56 {offsets = [0, 0], sizes = [1, 128], strides = [1, 1]} : vector<24x128xf32> to vector<1x128xf32>
    %63 = vector.broadcast %62 : vector<1x128xf32> to vector<4x128xf32>
    %64 = arith.mulf %58, %63 : vector<4x128xf32>
    %65 = vector.extract_strided_slice %56 {offsets = [4, 0], sizes = [1, 128], strides = [1, 1]} : vector<24x128xf32> to vector<1x128xf32>
    %66 = vector.broadcast %65 : vector<1x128xf32> to vector<4x128xf32>
    %67 = arith.mulf %58, %66 : vector<4x128xf32>
    %68 = vector.extract_strided_slice %56 {offsets = [8, 0], sizes = [1, 128], strides = [1, 1]} : vector<24x128xf32> to vector<1x128xf32>
    %69 = vector.extract_strided_slice %56 {offsets = [16, 0], sizes = [1, 128], strides = [1, 1]} : vector<24x128xf32> to vector<1x128xf32>
    %c127_i32_43 = arith.constant 127 : i32
    %70 = vector.broadcast %c127_i32_43 : i32 to vector<1x128xi32>
    %71 = arith.cmpi eq, %61, %70 : vector<1x128xi32>
    %c127_i32_44 = arith.constant 127 : i32
    %72 = tpu.dynamic_rotate %69 by %c127_i32_44 dim 1 : vector<1x128xf32>, i32 -> vector<1x128xf32>
    %c127_i32_45 = arith.constant 127 : i32
    %73 = tpu.dynamic_rotate %68 by %c127_i32_45 dim 1 : vector<1x128xf32>, i32 -> vector<1x128xf32>
    %74 = arith.select %71, %72, %73 : vector<1x128xi1>, vector<1x128xf32>
    %75 = vector.broadcast %74 : vector<1x128xf32> to vector<4x128xf32>
    %76 = arith.mulf %59, %75 : vector<4x128xf32>
    %77 = vector.extract_strided_slice %56 {offsets = [12, 0], sizes = [1, 128], strides = [1, 1]} : vector<24x128xf32> to vector<1x128xf32>
    %78 = vector.extract_strided_slice %56 {offsets = [20, 0], sizes = [1, 128], strides = [1, 1]} : vector<24x128xf32> to vector<1x128xf32>
    %c127_i32_46 = arith.constant 127 : i32
    %79 = vector.broadcast %c127_i32_46 : i32 to vector<1x128xi32>
    %80 = arith.cmpi eq, %61, %79 : vector<1x128xi32>
    %c127_i32_47 = arith.constant 127 : i32
    %81 = tpu.dynamic_rotate %78 by %c127_i32_47 dim 1 : vector<1x128xf32>, i32 -> vector<1x128xf32>
    %c127_i32_48 = arith.constant 127 : i32
    %82 = tpu.dynamic_rotate %77 by %c127_i32_48 dim 1 : vector<1x128xf32>, i32 -> vector<1x128xf32>
    %83 = arith.select %80, %81, %82 : vector<1x128xi1>, vector<1x128xf32>
    %84 = vector.broadcast %83 : vector<1x128xf32> to vector<4x128xf32>
    %85 = arith.mulf %59, %84 : vector<4x128xf32>
    %86 = vector.extract_strided_slice %56 {offsets = [16, 0], sizes = [1, 128], strides = [1, 1]} : vector<24x128xf32> to vector<1x128xf32>
    %87 = vector.broadcast %86 : vector<1x128xf32> to vector<4x128xf32>
    %88 = arith.mulf %60, %87 : vector<4x128xf32>
    %89 = vector.extract_strided_slice %56 {offsets = [20, 0], sizes = [1, 128], strides = [1, 1]} : vector<24x128xf32> to vector<1x128xf32>
    %90 = vector.broadcast %89 : vector<1x128xf32> to vector<4x128xf32>
    %91 = arith.mulf %60, %90 : vector<4x128xf32>
    %92 = tpu.concatenate %64, %67, %76, %85, %88, %91 in 0 : vector<4x128xf32>, vector<4x128xf32>, vector<4x128xf32>, vector<4x128xf32>, vector<4x128xf32>, vector<4x128xf32> -> vector<24x128xf32>
    %c1_i32_49 = arith.constant 1 : i32
    %93 = tpu.dynamic_rotate %92 by %c1_i32_49 dim 1 : vector<24x128xf32>, i32 -> vector<24x128xf32>
    %c127_i32_50 = arith.constant 127 : i32
    %94 = tpu.dynamic_rotate %92 by %c127_i32_50 dim 1 : vector<24x128xf32>, i32 -> vector<24x128xf32>
    %95 = tpu.concatenate %93, %92, %94 in 0 : vector<24x128xf32>, vector<24x128xf32>, vector<24x128xf32> -> vector<72x128xf32>
    %c0_51 = arith.constant 0 : index
    %c0_52 = arith.constant 0 : index
    %96 = vector.load %arg13[%c0_51, %c0_52] : memref<48x72xf32, #tpu.memory_space<vmem>>, vector<48x72xf32>
    %cst_53 = arith.constant dense<0.000000e+00> : vector<48x128xf32>
    %97 = tpu.matmul %96, %95, %cst_53 {dimension_numbers = #tpu.dot_dimension_numbers<[1], [0], [0], [1], [0, 0, 1, 1], [], []>} : vector<48x72xf32>, vector<72x128xf32>, vector<48x128xf32> -> vector<48x128xf32>
    %c0_54 = arith.constant 0 : index
    %c0_55 = arith.constant 0 : index
    %98 = vector.load %arg14[%c0_54, %c0_55] : memref<48x1xf32, #tpu.memory_space<vmem>>, vector<48x1xf32>
    %99 = vector.broadcast %98 : vector<48x1xf32> to vector<48x128xf32>
    %100 = arith.addf %97, %99 : vector<48x128xf32>
    %cst_56 = arith.constant 0.000000e+00 : f32
    %101 = vector.broadcast %cst_56 : f32 to vector<48x128xf32>
    %102 = arith.maximumf %100, %101 : vector<48x128xf32>
    %c2_i32_57 = arith.constant 2 : i32
    %103 = tpu.dynamic_rotate %102 by %c2_i32_57 dim 1 : vector<48x128xf32>, i32 -> vector<48x128xf32>
    %c1_i32_58 = arith.constant 1 : i32
    %104 = tpu.dynamic_rotate %102 by %c1_i32_58 dim 1 : vector<48x128xf32>, i32 -> vector<48x128xf32>
    %c127_i32_59 = arith.constant 127 : i32
    %105 = tpu.dynamic_rotate %102 by %c127_i32_59 dim 1 : vector<48x128xf32>, i32 -> vector<48x128xf32>
    %c126_i32_60 = arith.constant 126 : i32
    %106 = tpu.dynamic_rotate %102 by %c126_i32_60 dim 1 : vector<48x128xf32>, i32 -> vector<48x128xf32>
    %107 = tpu.concatenate %103, %104, %102, %105, %106 in 0 : vector<48x128xf32>, vector<48x128xf32>, vector<48x128xf32>, vector<48x128xf32>, vector<48x128xf32> -> vector<240x128xf32>
    %c0_61 = arith.constant 0 : index
    %c0_62 = arith.constant 0 : index
    %108 = vector.load %arg15[%c0_61, %c0_62] : memref<72x240xf32, #tpu.memory_space<vmem>>, vector<72x240xf32>
    %cst_63 = arith.constant dense<0.000000e+00> : vector<72x128xf32>
    %109 = tpu.matmul %108, %107, %cst_63 {dimension_numbers = #tpu.dot_dimension_numbers<[1], [0], [0], [1], [0, 0, 1, 1], [], []>} : vector<72x240xf32>, vector<240x128xf32>, vector<72x128xf32> -> vector<72x128xf32>
    %c0_64 = arith.constant 0 : index
    %c0_65 = arith.constant 0 : index
    %110 = vector.load %arg16[%c0_64, %c0_65] : memref<72x1xf32, #tpu.memory_space<vmem>>, vector<72x1xf32>
    %111 = vector.broadcast %110 : vector<72x1xf32> to vector<72x128xf32>
    %112 = arith.addf %109, %111 : vector<72x128xf32>
    %cst_66 = arith.constant 0.000000e+00 : f32
    %113 = vector.broadcast %cst_66 : f32 to vector<72x128xf32>
    %114 = arith.maximumf %112, %113 : vector<72x128xf32>
    %c3_i32_67 = arith.constant 3 : i32
    %115 = tpu.dynamic_rotate %114 by %c3_i32_67 dim 1 : vector<72x128xf32>, i32 -> vector<72x128xf32>
    %c2_i32_68 = arith.constant 2 : i32
    %116 = tpu.dynamic_rotate %114 by %c2_i32_68 dim 1 : vector<72x128xf32>, i32 -> vector<72x128xf32>
    %c1_i32_69 = arith.constant 1 : i32
    %117 = tpu.dynamic_rotate %114 by %c1_i32_69 dim 1 : vector<72x128xf32>, i32 -> vector<72x128xf32>
    %c127_i32_70 = arith.constant 127 : i32
    %118 = tpu.dynamic_rotate %114 by %c127_i32_70 dim 1 : vector<72x128xf32>, i32 -> vector<72x128xf32>
    %c126_i32_71 = arith.constant 126 : i32
    %119 = tpu.dynamic_rotate %114 by %c126_i32_71 dim 1 : vector<72x128xf32>, i32 -> vector<72x128xf32>
    %c125_i32_72 = arith.constant 125 : i32
    %120 = tpu.dynamic_rotate %114 by %c125_i32_72 dim 1 : vector<72x128xf32>, i32 -> vector<72x128xf32>
    %121 = tpu.concatenate %115, %116, %117, %114, %118, %119, %120 in 0 : vector<72x128xf32>, vector<72x128xf32>, vector<72x128xf32>, vector<72x128xf32>, vector<72x128xf32>, vector<72x128xf32>, vector<72x128xf32> -> vector<504x128xf32>
    %c0_73 = arith.constant 0 : index
    %c0_74 = arith.constant 0 : index
    %122 = vector.load %arg17[%c0_73, %c0_74] : memref<72x504xf32, #tpu.memory_space<vmem>>, vector<72x504xf32>
    %cst_75 = arith.constant dense<0.000000e+00> : vector<72x128xf32>
    %123 = tpu.matmul %122, %121, %cst_75 {dimension_numbers = #tpu.dot_dimension_numbers<[1], [0], [0], [1], [0, 0, 1, 1], [], []>} : vector<72x504xf32>, vector<504x128xf32>, vector<72x128xf32> -> vector<72x128xf32>
    %c0_76 = arith.constant 0 : index
    %c0_77 = arith.constant 0 : index
    %124 = vector.load %arg18[%c0_76, %c0_77] : memref<72x1xf32, #tpu.memory_space<vmem>>, vector<72x1xf32>
    %125 = vector.broadcast %124 : vector<72x1xf32> to vector<72x128xf32>
    %126 = arith.addf %123, %125 : vector<72x128xf32>
    %cst_78 = arith.constant 0.000000e+00 : f32
    %127 = vector.broadcast %cst_78 : f32 to vector<72x128xf32>
    %128 = arith.maximumf %126, %127 : vector<72x128xf32>
    %c2_i32_79 = arith.constant 2 : i32
    %129 = tpu.dynamic_rotate %128 by %c2_i32_79 dim 1 : vector<72x128xf32>, i32 -> vector<72x128xf32>
    %c1_i32_80 = arith.constant 1 : i32
    %130 = tpu.dynamic_rotate %128 by %c1_i32_80 dim 1 : vector<72x128xf32>, i32 -> vector<72x128xf32>
    %c127_i32_81 = arith.constant 127 : i32
    %131 = tpu.dynamic_rotate %128 by %c127_i32_81 dim 1 : vector<72x128xf32>, i32 -> vector<72x128xf32>
    %c126_i32_82 = arith.constant 126 : i32
    %132 = tpu.dynamic_rotate %128 by %c126_i32_82 dim 1 : vector<72x128xf32>, i32 -> vector<72x128xf32>
    %133 = tpu.concatenate %129, %130, %128, %131, %132 in 0 : vector<72x128xf32>, vector<72x128xf32>, vector<72x128xf32>, vector<72x128xf32>, vector<72x128xf32> -> vector<360x128xf32>
    %c0_83 = arith.constant 0 : index
    %c0_84 = arith.constant 0 : index
    %134 = vector.load %arg19[%c0_83, %c0_84] : memref<48x360xf32, #tpu.memory_space<vmem>>, vector<48x360xf32>
    %cst_85 = arith.constant dense<0.000000e+00> : vector<48x128xf32>
    %135 = tpu.matmul %134, %133, %cst_85 {dimension_numbers = #tpu.dot_dimension_numbers<[1], [0], [0], [1], [0, 0, 1, 1], [], []>} : vector<48x360xf32>, vector<360x128xf32>, vector<48x128xf32> -> vector<48x128xf32>
    %c0_86 = arith.constant 0 : index
    %c0_87 = arith.constant 0 : index
    %136 = vector.load %arg20[%c0_86, %c0_87] : memref<48x1xf32, #tpu.memory_space<vmem>>, vector<48x1xf32>
    %137 = vector.broadcast %136 : vector<48x1xf32> to vector<48x128xf32>
    %138 = arith.addf %135, %137 : vector<48x128xf32>
    %cst_88 = arith.constant 0.000000e+00 : f32
    %139 = vector.broadcast %cst_88 : f32 to vector<48x128xf32>
    %140 = arith.maximumf %138, %139 : vector<48x128xf32>
    %c1_i32_89 = arith.constant 1 : i32
    %141 = tpu.dynamic_rotate %140 by %c1_i32_89 dim 1 : vector<48x128xf32>, i32 -> vector<48x128xf32>
    %c127_i32_90 = arith.constant 127 : i32
    %142 = tpu.dynamic_rotate %140 by %c127_i32_90 dim 1 : vector<48x128xf32>, i32 -> vector<48x128xf32>
    %143 = tpu.concatenate %141, %140, %142 in 0 : vector<48x128xf32>, vector<48x128xf32>, vector<48x128xf32> -> vector<144x128xf32>
    %c0_91 = arith.constant 0 : index
    %c0_92 = arith.constant 0 : index
    %144 = vector.load %arg21[%c0_91, %c0_92] : memref<24x144xf32, #tpu.memory_space<vmem>>, vector<24x144xf32>
    %cst_93 = arith.constant dense<0.000000e+00> : vector<24x128xf32>
    %145 = tpu.matmul %144, %143, %cst_93 {dimension_numbers = #tpu.dot_dimension_numbers<[1], [0], [0], [1], [0, 0, 1, 1], [], []>} : vector<24x144xf32>, vector<144x128xf32>, vector<24x128xf32> -> vector<24x128xf32>
    %c0_94 = arith.constant 0 : index
    %c0_95 = arith.constant 0 : index
    %146 = vector.load %arg22[%c0_94, %c0_95] : memref<24x1xf32, #tpu.memory_space<vmem>>, vector<24x1xf32>
    %147 = vector.broadcast %146 : vector<24x1xf32> to vector<24x128xf32>
    %148 = arith.addf %145, %147 : vector<24x128xf32>
    %149 = arith.addf %56, %148 : vector<24x128xf32>
    %c0_96 = arith.constant 0 : index
    %c0_97 = arith.constant 0 : index
    %150 = vector.load %arg23[%c0_96, %c0_97] : memref<24x128xf32, #tpu.memory_space<vmem>>, vector<24x128xf32>
    tpu.vector_store %arg23[%c0_96, %c0_97], %149 {strides = array<i32>} : memref<24x128xf32, #tpu.memory_space<vmem>>, vector<24x128xf32>,
    return
  }
  func.func @transform_0(%arg0: i32) -> (i32, i32) {
    %c0_i32 = arith.constant 0 : i32
    %c0_i32_0 = arith.constant 0 : i32
    %c0_i32_1 = arith.constant 0 : i32
    return %c0_i32, %c0_i32_0 : i32, i32
  }
  func.func @transform_1(%arg0: i32) -> (i32, i32) {
    %c0_i32 = arith.constant 0 : i32
    %c0_i32_0 = arith.constant 0 : i32
    %c0_i32_1 = arith.constant 0 : i32
    return %c0_i32, %c0_i32_0 : i32, i32
  }
  func.func @transform_2(%arg0: i32) -> (i32, i32) {
    %c0_i32 = arith.constant 0 : i32
    %c0_i32_0 = arith.constant 0 : i32
    %c0_i32_1 = arith.constant 0 : i32
    return %c0_i32, %c0_i32_0 : i32, i32
  }
  func.func @transform_3(%arg0: i32) -> (i32, i32) {
    %c0_i32 = arith.constant 0 : i32
    %c0_i32_0 = arith.constant 0 : i32
    %c0_i32_1 = arith.constant 0 : i32
    return %c0_i32, %c0_i32_0 : i32, i32
  }
  func.func @transform_4(%arg0: i32) -> (i32, i32) {
    %c0_i32 = arith.constant 0 : i32
    %c0_i32_0 = arith.constant 0 : i32
    %c0_i32_1 = arith.constant 0 : i32
    return %c0_i32, %c0_i32_0 : i32, i32
  }
  func.func @transform_5(%arg0: i32) -> (i32, i32) {
    %c0_i32 = arith.constant 0 : i32
    %c0_i32_0 = arith.constant 0 : i32
    %c0_i32_1 = arith.constant 0 : i32
    return %c0_i32, %c0_i32_0 : i32, i32
  }
  func.func @transform_6(%arg0: i32) -> (i32, i32) {
    %c0_i32 = arith.constant 0 : i32
    %c0_i32_0 = arith.constant 0 : i32
    %c0_i32_1 = arith.constant 0 : i32
    return %c0_i32, %c0_i32_0 : i32, i32
  }
  func.func @transform_7(%arg0: i32) -> (i32, i32) {
    %c0_i32 = arith.constant 0 : i32
    %c0_i32_0 = arith.constant 0 : i32
    %c0_i32_1 = arith.constant 0 : i32
    return %c0_i32, %c0_i32_0 : i32, i32
  }
  func.func @transform_8(%arg0: i32) -> (i32, i32) {
    %c0_i32 = arith.constant 0 : i32
    %c0_i32_0 = arith.constant 0 : i32
    %c0_i32_1 = arith.constant 0 : i32
    return %c0_i32, %c0_i32_0 : i32, i32
  }
  func.func @transform_9(%arg0: i32) -> (i32, i32) {
    %c0_i32 = arith.constant 0 : i32
    %c0_i32_0 = arith.constant 0 : i32
    %c0_i32_1 = arith.constant 0 : i32
    return %c0_i32, %c0_i32_0 : i32, i32
  }
  func.func @transform_10(%arg0: i32) -> (i32, i32) {
    %c0_i32 = arith.constant 0 : i32
    %c0_i32_0 = arith.constant 0 : i32
    %c0_i32_1 = arith.constant 0 : i32
    return %c0_i32, %c0_i32_0 : i32, i32
  }
  func.func @transform_11(%arg0: i32) -> (i32, i32) {
    %c0_i32 = arith.constant 0 : i32
    %c0_i32_0 = arith.constant 0 : i32
    %c0_i32_1 = arith.constant 0 : i32
    return %c0_i32, %c0_i32_0 : i32, i32
  }
  func.func @transform_12(%arg0: i32) -> (i32, i32) {
    %c0_i32 = arith.constant 0 : i32
    %c0_i32_0 = arith.constant 0 : i32
    %c0_i32_1 = arith.constant 0 : i32
    return %c0_i32, %c0_i32_0 : i32, i32
  }
  func.func @transform_13(%arg0: i32) -> (i32, i32) {
    %c0_i32 = arith.constant 0 : i32
    %c0_i32_0 = arith.constant 0 : i32
    %c0_i32_1 = arith.constant 0 : i32
    return %c0_i32, %c0_i32_0 : i32, i32
  }
  func.func @transform_14(%arg0: i32) -> (i32, i32) {
    %c0_i32 = arith.constant 0 : i32
    %c0_i32_0 = arith.constant 0 : i32
    %c0_i32_1 = arith.constant 0 : i32
    return %c0_i32, %c0_i32_0 : i32, i32
  }
  func.func @transform_15(%arg0: i32) -> (i32, i32) {
    %c0_i32 = arith.constant 0 : i32
    %c0_i32_0 = arith.constant 0 : i32
    %c0_i32_1 = arith.constant 0 : i32
    return %c0_i32, %c0_i32_0 : i32, i32
  }
  func.func @transform_16(%arg0: i32) -> (i32, i32) {
    %c0_i32 = arith.constant 0 : i32
    %c0_i32_0 = arith.constant 0 : i32
    %c0_i32_1 = arith.constant 0 : i32
    return %c0_i32, %c0_i32_0 : i32, i32
  }
  func.func @transform_17(%arg0: i32) -> (i32, i32) {
    %c0_i32 = arith.constant 0 : i32
    %c0_i32_0 = arith.constant 0 : i32
    %c0_i32_1 = arith.constant 0 : i32
    return %c0_i32, %c0_i32_0 : i32, i32
  }
  func.func @transform_18(%arg0: i32) -> (i32, i32) {
    %c0_i32 = arith.constant 0 : i32
    %c0_i32_0 = arith.constant 0 : i32
    %c0_i32_1 = arith.constant 0 : i32
    return %c0_i32, %c0_i32_0 : i32, i32
  }
  func.func @transform_19(%arg0: i32) -> (i32, i32) {
    %c0_i32 = arith.constant 0 : i32
    %c0_i32_0 = arith.constant 0 : i32
    %c0_i32_1 = arith.constant 0 : i32
    return %c0_i32, %c0_i32_0 : i32, i32
  }
  func.func @transform_20(%arg0: i32) -> (i32, i32) {
    %c0_i32 = arith.constant 0 : i32
    %c0_i32_0 = arith.constant 0 : i32
    %c0_i32_1 = arith.constant 0 : i32
    return %c0_i32, %c0_i32_0 : i32, i32
  }
  func.func @transform_21(%arg0: i32) -> (i32, i32) {
    %c0_i32 = arith.constant 0 : i32
    %c0_i32_0 = arith.constant 0 : i32
    %c0_i32_1 = arith.constant 0 : i32
    return %c0_i32, %c0_i32_0 : i32, i32
  }
  func.func @transform_22(%arg0: i32) -> (i32, i32) {
    %c0_i32 = arith.constant 0 : i32
    %c0_i32_0 = arith.constant 0 : i32
    %c0_i32_1 = arith.constant 0 : i32
    return %c0_i32, %c0_i32_0 : i32, i32
  }
}

</mosaic_0001>

<bundles_post_ra>
// kernel: forward.1
= control target key start
LH: loop header
LB: loop body
LE: loop exit
PB: predicated region body
PF: predicated region fallthrough
CT: control target
= control target key end

     0   :  { %vm128_vm0 = vcmask 588800   ;;  %v3381_v4 = vmov 0   ;;  %v3382_v22 = vmov 0.0   ;;  %vm368_vm1 = vcmask 916480   ;;  %s5117_s28 = smov 127   ;;  %s5100_s30 = smov 125   ;;  %s5068_s0 = inlined_call_operand.vmem [shape: f32[24,128], index: 0, kind: input, shape index: {}]   ;;  %s5069_s2 = inlined_call_operand.vmem [shape: f32[48,72], index: 2, kind: input, shape index: {}]   ;;  %s5070_s3 = inlined_call_operand.vmem [shape: f32[48,1], index: 3, kind: input, shape index: {}]   ;;  %s5071_s4 = inlined_call_operand.vmem [shape: f32[72,240], index: 4, kind: input, shape index: {}]   ;;  %s5072_s5 = inlined_call_operand.vmem [shape: f32[72,1], index: 5, kind: input, shape index: {}]   ;;  %s5073_s6 = inlined_call_operand.vmem [shape: f32[72,504], index: 6, kind: input, shape index: {}]   ;;  %s5074_s7 = inlined_call_operand.vmem [shape: f32[72,1], index: 7, kind: input, shape index: {}]   ;;  %s5075_s8 = inlined_call_operand.vmem [shape: f32[48,360], index: 8, kind: input, shape index: {}]   ;;  %s5076_s9 = inlined_call_operand.vmem [shape: f32[48,1], index: 9, kind: input, shape index: {}]   ;;  %s5077_s11 = inlined_call_operand.vmem [shape: f32[24,1], index: 11, kind: input, shape index: {}]   ;;  %s5078_s10 = inlined_call_operand.vmem [shape: f32[24,144], index: 10, kind: input, shape index: {}]   ;;  %s5079_s1 = inlined_call_operand.vmem [shape: f32[12,128], index: 1, kind: input, shape index: {}]   ;;  %s5080_s13 = inlined_call_operand.vmem [shape: f32[48,1], index: 13, kind: input, shape index: {}]   ;;  %s5081_s12 = inlined_call_operand.vmem [shape: f32[48,72], index: 12, kind: input, shape index: {}]   ;;  %s5082_s14 = inlined_call_operand.vmem [shape: f32[72,240], index: 14, kind: input, shape index: {}]   ;;  %s5083_s15 = inlined_call_operand.vmem [shape: f32[72,1], index: 15, kind: input, shape index: {}]   ;;  %s5084_s16 = inlined_call_operand.vmem [shape: f32[72,504], index: 16, kind: input, shape index: {}]   ;;  %s5085_s17 = inlined_call_operand.vmem [shape: f32[72,1], index: 17, kind: input, shape index: {}]   ;;  %s5086_s18 = inlined_call_operand.vmem [shape: f32[48,360], index: 18, kind: input, shape index: {}]   ;;  %s5087_s19 = inlined_call_operand.vmem [shape: f32[48,1], index: 19, kind: input, shape index: {}]   ;;  %s5088_s21 = inlined_call_operand.vmem [shape: f32[24,1], index: 21, kind: input, shape index: {}]   ;;  %s5089_s20 = inlined_call_operand.vmem [shape: f32[24,144], index: 20, kind: input, shape index: {}]   ;;  %s5090_s22 = inlined_call_operand.vmem [shape: f32[24,128], index: 22, kind: output, shape index: {}]  }
   0x1   :  { %5104 = sst [smem:[#allocation2_spill]] %s5068_s0  ;;  %s5098_s0 = smov 127   ;;  %3378 = vset.pattern.permute.xlu1 %v3381_v4  ;;  %3377 = vset.pattern.permute.xlu0 %v3381_v4  ;;  %vm713_vm2 = vcmask 982016   ;;  %vm1096_vm3 = vcmask 850944   ;;  %vm1359_vm4 = vcmask 130048   ;;  %vm1509_vm5 = vcmask 1043456  }
   0x2   :  { %5105 = sst [smem:[#allocation3_spill]] %s5069_s2  ;;  %396 = vmatprep.subr.mxu1 %v3382_v22 }
   0x3   :  { %5106 = sst [smem:[#allocation4_spill]] %s5070_s3 }
   0x4   :  { %5107 = sst [smem:[#allocation5_spill]] %s5071_s4 }
   0x5   :  { %5108 = sst [smem:[#allocation6_spill]] %s5072_s5 }
   0x6   :  { %5109 = sst [smem:[#allocation7_spill]] %s5073_s6  ;;  %s3380_s6 = smov 1  }
   0x7   :  { %5110 = sst [smem:[#allocation8_spill]] %s5074_s7  ;;  %s3384_s7 = smov 126  }
   0x8   :  { %s5111_s29 = sld [smem:[#allocation2_spill]] }
   0x9   :  { %s5112_s25 = sld [smem:[#allocation3_spill]] }
   0xa   :  { %s5113_s27 = sld [smem:[#allocation4_spill]] }
   0xb   :  { %s5116_s4 = sld [smem:[#allocation7_spill]] }
   0xc   :  { %s5118_s2 = sld [smem:[#allocation8_spill]] }
   0xe   :  { %v73_v0 = vld [vmem:[%s5111_s29 + $0x10] sm:$0xff]  ;;  %v71_v1 = vld [vmem:[%s5111_s29] sm:$0xff]  ;;  %v72_v2 = vld [vmem:[%s5111_s29 + $0x8] sm:$0xff]  ;;  %s5115_s29 = sld [smem:[#allocation6_spill]] }
   0xf   :  { %84 = vrot.lane.b32.xlu0 %v73_v0, %s5098_s0  ;;  %80 = vrot.lane.b32.xlu1 %v71_v1, %s5098_s0  ;;  %v86_v3 = vld [vmem:[%s5112_s25] sm:$0xff]  ;;  %v87_v17 = vld [vmem:[%s5112_s25 + $0x8] sm:$0xff] }
  0x10   :  { %3263 = vmatprep.mubr.msk.f32.mxu0 %vm128_vm0, %v86_v3  ;;  %v96_v5 = vld [vmem:[%s5113_s27 + $0x20] sm:$0xff]  ;;  %v97_v6 = vld [vmem:[%s5113_s27 + $0x28] sm:$0xff]  ;;  %v95_v7 = vld [vmem:[%s5113_s27 + $0x18] sm:$0xff] }
  0x11   :  { %v94_v8 = vld [vmem:[%s5113_s27 + $0x10] sm:$0xff]  ;;  %v93_v9 = vld [vmem:[%s5113_s27 + $0x8] sm:$0xff]  ;;  %v92_v10 = vld [vmem:[%s5113_s27] sm:$0xff]  ;;  %s5114_s27 = sld [smem:[#allocation5_spill]] }
  0x12   :  { %v88_v18 = vld [vmem:[%s5112_s25 + $0x10] sm:$0xff]  ;;  %v89_v19 = vld [vmem:[%s5112_s25 + $0x18] sm:$0xff]  ;;  %v90_v20 = vld [vmem:[%s5112_s25 + $0x20] sm:$0xff] }
  0x13   :  { %82 = vrot.lane.b32.xlu0 %v72_v2, %s5098_s0  ;;  %78 = vrot.lane.b32.xlu1 %v73_v0, %s3380_s6  ;;  %v91_v21 = vld [vmem:[%s5112_s25 + $0x28] sm:$0xff]  ;;  %s3383_s25 = smov 2  }
  0x14   :  { %v320_v48 = vld [vmem:[%s5115_s29 + $0x30] sm:$0xff]  ;;  %v319_v49 = vld [vmem:[%s5115_s29 + $0x28] sm:$0xff]  ;;  %v318_v50 = vld [vmem:[%s5115_s29 + $0x20] sm:$0xff] }
  0x15   :  { %v317_v51 = vld [vmem:[%s5115_s29 + $0x18] sm:$0xff]  ;;  %v316_v52 = vld [vmem:[%s5115_s29 + $0x10] sm:$0xff]  ;;  %v322_v53 = vld [vmem:[%s5115_s29 + $0x40] sm:$0xff] }
  0x16   :  { %v315_v54 = vld [vmem:[%s5115_s29 + $0x8] sm:$0xff]  ;;  %v321_v55 = vld [vmem:[%s5115_s29 + $0x38] sm:$0xff]  ;;  %v314_v56 = vld [vmem:[%s5115_s29] sm:$0xff] }
  0x17   :  { %76 = vrot.lane.b32.xlu0 %v72_v2, %s3380_s6  ;;  %74 = vrot.lane.b32.xlu1 %v71_v1, %s3380_s6  ;;  %v297_v47 = vld [vmem:[%s5114_s27 + $0x8] sm:$0xff] }
  0x18   :  { %2899 = vmatprep.mubr.msk.f32.mxu1 %vm368_vm1, %v297_v47 }
  0x1b   :  { %120 = vperm.xlu1 %3378, %v96_v5   ;;  %125 = vperm.xlu0 %3377, %v97_v6  }
  0x1f   :  { %115 = vperm.xlu1 %3378, %v95_v7   ;;  %110 = vperm.xlu0 %3377, %v94_v8  }
  0x23   :  { %105 = vperm.xlu1 %3378, %v93_v9   ;;  %100 = vperm.xlu0 %3377, %v92_v10  }
  0x81   :  { %v85_v11 = vpop.permute.xlu0 %84  ;;  %v81_v13 = vpop.permute.xlu1 %80 }
  0x82   :  { %3245 = vmatprep.subr.mxu0 %v85_v11 }
  0x83   :  { %3246 = vmatpush3.msra.mxu0 %v85_v11 }
  0x85   :  { %v83_v12 = vpop.permute.xlu0 %82  ;;  %v79_v14 = vpop.permute.xlu1 %78 }
  0x86   :  { %3247 = vmatprep.subr.mxu0 %v83_v12 }
  0x87   :  { %3248 = vmatpush3.msra.mxu0 %v83_v12 }
  0x88   :  { %3249 = vmatprep.subr.mxu0 %v81_v13 }
  0x89   :  { %3250 = vmatpush3.msra.mxu0 %v81_v13  ;;  %v77_v15 = vpop.permute.xlu0 %76  ;;  %v75_v16 = vpop.permute.xlu1 %74 }
  0x8a   :  { %3251 = vmatprep.subr.mxu0 %v73_v0 }
  0x8b   :  { %3252 = vmatpush3.msra.mxu0 %v73_v0 }
  0x8c   :  { %3253 = vmatprep.subr.mxu0 %v72_v2 }
  0x8d   :  { %3254 = vmatpush3.msra.mxu0 %v72_v2 }
  0x8e   :  { %3255 = vmatprep.subr.mxu0 %v71_v1 }
  0x8f   :  { %3256 = vmatpush3.msra.mxu0 %v71_v1 }
  0x90   :  { %3257 = vmatprep.subr.mxu0 %v79_v14 }
  0x91   :  { %3258 = vmatpush3.msra.mxu0 %v79_v14 }
  0x92   :  { %3259 = vmatprep.subr.mxu0 %v77_v15 }
  0x93   :  { %3260 = vmatpush3.msra.mxu0 %v77_v15 }
  0x94   :  { %3261 = vmatprep.subr.mxu0 %v75_v16 }
  0x95   :  { %3262 = vmatpush3.msra.mxu0 %v75_v16 }
  0x96   :  { %3264 = vmatmul.mubr.msk.f32.vlgmr.msra.gmra.mxu0 %vm128_vm0, %v87_v17  ;;  %v121_v23 = vpop.permute.xlu1 %120  ;;  %v126_v24 = vpop.permute.xlu0 %125  ;;  %v296_v17 = vld [vmem:[%s5114_s27] sm:$0xff] }
  0x97   :  { %3266 = vmatprep.mubr.msk.f32.mxu0 %vm128_vm0, %v88_v18  ;;  %v299_v18 = vld [vmem:[%s5114_s27 + $0x18] sm:$0xff] }
  0x9a   :  { %3267 = vmatmul.mubr.msk.f32.gmra.mxu0 %vm128_vm0, %v89_v19  ;;  %v116_v25 = vpop.permute.xlu1 %115  ;;  %v111_v26 = vpop.permute.xlu0 %110  ;;  %v298_v19 = vld [vmem:[%s5114_s27 + $0x10] sm:$0xff] }
  0x9b   :  { %3269 = vmatprep.mubr.msk.f32.mxu0 %vm128_vm0, %v90_v20  ;;  %v301_v20 = vld [vmem:[%s5114_s27 + $0x28] sm:$0xff] }
  0x9e   :  { %3270 = vmatmul.mubr.msk.f32.gmra.mxu0 %vm128_vm0, %v91_v21  ;;  %v106_v29 = vpop.permute.xlu1 %105  ;;  %v101_v32 = vpop.permute.xlu0 %100  ;;  %v300_v21 = vld [vmem:[%s5114_s27 + $0x20] sm:$0xff] }
 0x156   :  { %v3265_v27 = vpop.f32.mrf.mxu0 }
 0x157   :  { %v219_v34 = vadd.f32 %v3265_v27, %v106_v29  ;;  %v307_v27 = vld [vmem:[%s5114_s27 + $0x58] sm:$0xff]  ;;  %v309_v29 = vld [vmem:[%s5114_s27 + $0x68] sm:$0xff] }
 0x158   :  { %v213_v28 = vpop.f32.mrf.mxu0 }
 0x159   :  { %v214_v38 = vadd.f32 %v213_v28, %v101_v32  ;;  %v243_v42 = vmax.f32 %v219_v34, 0.0  ;;  %v306_v28 = vld [vmem:[%s5114_s27 + $0x50] sm:$0xff]  ;;  %v312_v34 = vld [vmem:[%s5114_s27 + $0x80] sm:$0xff] }
 0x15a   :  { %v3268_v30 = vpop.f32.mrf.mxu0  ;;  %v310_v32 = vld [vmem:[%s5114_s27 + $0x70] sm:$0xff] }
 0x15b   :  { %v229_v31 = vadd.f32 %v3268_v30, %v116_v25  ;;  %v242_v45 = vmax.f32 %v214_v38, 0.0  ;;  %v305_v25 = vld [vmem:[%s5114_s27 + $0x48] sm:$0xff]  ;;  %v308_v30 = vld [vmem:[%s5114_s27 + $0x60] sm:$0xff] }
 0x15c   :  { %v223_v33 = vpop.f32.mrf.mxu0 }
 0x15d   :  { %v245_v35 = vmax.f32 %v229_v31, 0.0  ;;  %v224_v36 = vadd.f32 %v223_v33, %v111_v26  ;;  %v304_v26 = vld [vmem:[%s5114_s27 + $0x40] sm:$0xff]  ;;  %v311_v31 = vld [vmem:[%s5114_s27 + $0x78] sm:$0xff]  ;;  %v313_v33 = vld [vmem:[%s5114_s27 + $0x88] sm:$0xff] }
 0x15e   :  { %v3271_v37 = vpop.f32.mrf.mxu0 }
 0x15f   :  { %v244_v39 = vmax.f32 %v224_v36, 0.0  ;;  %v239_v40 = vadd.f32 %v3271_v37, %v126_v24  ;;  %397 = vmatpush1.msra.mxu1 %v245_v35  ;;  %v302_v24 = vld [vmem:[%s5114_s27 + $0x30] sm:$0xff] }
 0x160   :  { %v233_v41 = vpop.f32.mrf.mxu0  ;;  %398 = vmatprep.subr.mxu1 %v3382_v22 }
 0x161   :  { %v3561_v43 = vmax.f32 %v239_v40, 0.0  ;;  %v234_v44 = vadd.f32 %v233_v41, %v121_v23  ;;  %399 = vmatpush1.msra.mxu1 %v244_v39  ;;  %v303_v23 = vld [vmem:[%s5114_s27 + $0x38] sm:$0xff]  ;;  %s5102_s27 = smov 3  }
 0x162   :  { %400 = vmatprep.subr.mxu1 %v3382_v22 }
 0x163   :  { %v3564_v46 = vmax.f32 %v234_v44, 0.0  ;;  %270 = vrot.lane.b32.xlu1 %v3561_v43, %s3380_s6  ;;  %401 = vmatpush1.msra.mxu1 %v243_v42 }
 0x164   :  { %402 = vmatprep.subr.mxu1 %v3382_v22 }
 0x165   :  { %268 = vrot.lane.b32.xlu0 %v3564_v46, %s3380_s6  ;;  %403 = vmatpush1.msra.mxu1 %v242_v45 }
 0x166   :  { %404 = vmatprep.subr.mxu1 %v3382_v22 }
 0x167   :  { %266 = vrot.lane.b32.xlu1 %v245_v35, %s3380_s6 }
 0x169   :  { %264 = vrot.lane.b32.xlu0 %v244_v39, %s3380_s6 }
 0x16b   :  { %262 = vrot.lane.b32.xlu1 %v243_v42, %s3380_s6 }
 0x16d   :  { %260 = vrot.lane.b32.xlu0 %v242_v45, %s3380_s6 }
 0x16f   :  { %258 = vrot.lane.b32.xlu1 %v3561_v43, %s3383_s25 }
 0x171   :  { %256 = vrot.lane.b32.xlu0 %v3564_v46, %s3383_s25 }
 0x173   :  { %254 = vrot.lane.b32.xlu1 %v245_v35, %s3383_s25 }
 0x175   :  { %252 = vrot.lane.b32.xlu0 %v244_v39, %s3383_s25 }
 0x177   :  { %250 = vrot.lane.b32.xlu1 %v243_v42, %s3383_s25 }
 0x179   :  { %248 = vrot.lane.b32.xlu0 %v242_v45, %s3383_s25 }
 0x17b   :  { %294 = vrot.lane.b32.xlu1 %v3561_v43, %s3384_s7 }
 0x17d   :  { %292 = vrot.lane.b32.xlu0 %v3564_v46, %s3384_s7 }
 0x17f   :  { %290 = vrot.lane.b32.xlu1 %v245_v35, %s3384_s7 }
 0x181   :  { %288 = vrot.lane.b32.xlu0 %v244_v39, %s3384_s7 }
 0x183   :  { %286 = vrot.lane.b32.xlu1 %v243_v42, %s3384_s7 }
 0x185   :  { %284 = vrot.lane.b32.xlu0 %v242_v45, %s3384_s7 }
 0x187   :  { %282 = vrot.lane.b32.xlu1 %v3561_v43, %s5098_s0 }
 0x189   :  { %280 = vrot.lane.b32.xlu0 %v3564_v46, %s5098_s0 }
 0x18b   :  { %278 = vrot.lane.b32.xlu1 %v245_v35, %s5098_s0 }
 0x18d   :  { %276 = vrot.lane.b32.xlu0 %v244_v39, %s5098_s0 }
 0x18f   :  { %274 = vrot.lane.b32.xlu1 %v243_v42, %s5098_s0 }
 0x191   :  { %272 = vrot.lane.b32.xlu0 %v242_v45, %s5098_s0 }
 0x193   :  { %355 = vperm.xlu1 %3378, %v320_v48  }
 0x195   :  { %350 = vperm.xlu0 %3377, %v319_v49  }
 0x197   :  { %345 = vperm.xlu1 %3378, %v318_v50  }
 0x199   :  { %340 = vperm.xlu0 %3377, %v317_v51  }
 0x19b   :  { %335 = vperm.xlu1 %3378, %v316_v52  }
 0x19d   :  { %365 = vperm.xlu0 %3377, %v322_v53  }
 0x19f   :  { %330 = vperm.xlu1 %3378, %v315_v54  }
 0x1a1   :  { %360 = vperm.xlu0 %3377, %v321_v55  }
 0x1a3   :  { %325 = vperm.xlu1 %3378, %v314_v56  }
 0x1d5   :  { %v271_v57 = vpop.permute.xlu1 %270 }
 0x1d6   :  { %405 = vmatpush1.msra.mxu1 %v271_v57 }
 0x1d7   :  { %v269_v58 = vpop.permute.xlu0 %268  ;;  %406 = vmatprep.subr.mxu1 %v3382_v22 }
 0x1d8   :  { %407 = vmatpush1.msra.mxu1 %v269_v58 }
 0x1d9   :  { %408 = vmatprep.subr.mxu1 %v3382_v22  ;;  %v267_v59 = vpop.permute.xlu1 %266 }
 0x1da   :  { %409 = vmatpush1.msra.mxu1 %v267_v59 }
 0x1db   :  { %v265_v60 = vpop.permute.xlu0 %264  ;;  %410 = vmatprep.subr.mxu1 %v3382_v22 }
 0x1dc   :  { %411 = vmatpush1.msra.mxu1 %v265_v60 }
 0x1dd   :  { %412 = vmatprep.subr.mxu1 %v3382_v22  ;;  %v263_v61 = vpop.permute.xlu1 %262 }
 0x1de   :  { %413 = vmatpush1.msra.mxu1 %v263_v61 }
 0x1df   :  { %v261_v62 = vpop.permute.xlu0 %260  ;;  %414 = vmatprep.subr.mxu1 %v3382_v22 }
 0x1e0   :  { %415 = vmatpush1.msra.mxu1 %v261_v62 }
 0x1e1   :  { %416 = vmatprep.subr.mxu1 %v3382_v22  ;;  %v259_v63 = vpop.permute.xlu1 %258 }
 0x1e2   :  { %417 = vmatpush1.msra.mxu1 %v259_v63 }
 0x1e3   :  { %v257_v0 = vpop.permute.xlu0 %256  ;;  %418 = vmatprep.subr.mxu1 %v3382_v22 }
 0x1e4   :  { %419 = vmatpush1.msra.mxu1 %v257_v0 }
 0x1e5   :  { %420 = vmatprep.subr.mxu1 %v3382_v22  ;;  %v255_v1 = vpop.permute.xlu1 %254 }
 0x1e6   :  { %421 = vmatpush1.msra.mxu1 %v255_v1 }
 0x1e7   :  { %v253_v2 = vpop.permute.xlu0 %252  ;;  %422 = vmatprep.subr.mxu1 %v3382_v22 }
 0x1e8   :  { %423 = vmatpush1.msra.mxu1 %v253_v2 }
 0x1e9   :  { %424 = vmatprep.subr.mxu1 %v3382_v22  ;;  %v251_v3 = vpop.permute.xlu1 %250 }
 0x1ea   :  { %425 = vmatpush1.msra.mxu1 %v251_v3 }
 0x1eb   :  { %v249_v4 = vpop.permute.xlu0 %248  ;;  %426 = vmatprep.subr.mxu1 %v3382_v22 }
 0x1ec   :  { %427 = vmatpush1.msra.mxu1 %v249_v4 }
 0x1ed   :  { %432 = vmatprep.subr.mxu1 %v3382_v22  ;;  %v295_v5 = vpop.permute.xlu1 %294 }
 0x1ee   :  { %433 = vmatpush2.msra.mxu1 %v295_v5 }
 0x1ef   :  { %v293_v6 = vpop.permute.xlu0 %292  ;;  %434 = vmatprep.subr.mxu1 %v3382_v22 }
 0x1f0   :  { %435 = vmatpush2.msra.mxu1 %v293_v6 }
 0x1f1   :  { %436 = vmatprep.subr.mxu1 %v3382_v22  ;;  %v291_v7 = vpop.permute.xlu1 %290 }
 0x1f2   :  { %437 = vmatpush2.msra.mxu1 %v291_v7 }
 0x1f3   :  { %v289_v8 = vpop.permute.xlu0 %288  ;;  %438 = vmatprep.subr.mxu1 %v3382_v22 }
 0x1f4   :  { %439 = vmatpush2.msra.mxu1 %v289_v8 }
 0x1f5   :  { %440 = vmatprep.subr.mxu1 %v3382_v22  ;;  %v287_v9 = vpop.permute.xlu1 %286 }
 0x1f6   :  { %441 = vmatpush2.msra.mxu1 %v287_v9 }
 0x1f7   :  { %v285_v10 = vpop.permute.xlu0 %284  ;;  %442 = vmatprep.subr.mxu1 %v3382_v22 }
 0x1f8   :  { %443 = vmatpush2.msra.mxu1 %v285_v10 }
 0x1f9   :  { %444 = vmatprep.subr.mxu1 %v3382_v22  ;;  %v283_v11 = vpop.permute.xlu1 %282 }
 0x1fa   :  { %445 = vmatpush2.msra.mxu1 %v283_v11 }
 0x1fb   :  { %v281_v12 = vpop.permute.xlu0 %280  ;;  %446 = vmatprep.subr.mxu1 %v3382_v22 }
 0x1fc   :  { %447 = vmatpush2.msra.mxu1 %v281_v12 }
 0x1fd   :  { %448 = vmatprep.subr.mxu1 %v3382_v22  ;;  %v279_v13 = vpop.permute.xlu1 %278 }
 0x1fe   :  { %449 = vmatpush2.msra.mxu1 %v279_v13 }
 0x1ff   :  { %v277_v14 = vpop.permute.xlu0 %276  ;;  %450 = vmatprep.subr.mxu1 %v3382_v22 }
 0x200   :  { %451 = vmatpush2.msra.mxu1 %v277_v14 }
 0x201   :  { %452 = vmatprep.subr.mxu1 %v3382_v22  ;;  %v275_v15 = vpop.permute.xlu1 %274 }
 0x202   :  { %453 = vmatpush2.msra.mxu1 %v275_v15 }
 0x203   :  { %v273_v16 = vpop.permute.xlu0 %272  ;;  %454 = vmatprep.subr.mxu1 %v3382_v22 }
 0x204   :  { %455 = vmatpush2.msra.mxu1 %v273_v16  ;;  %v624_v16 = vld [vmem:[%s5116_s4 + $0x8] sm:$0xff] }
 0x205   :  { %456 = vmatprep.subr.mxu1 %v3382_v22  ;;  %805 = vmatprep.mubr.f32.mxu0 %v624_v16  ;;  %v648_v16 = vld [vmem:[%s5116_s4 + $0xc8] sm:$0xff] }
 0x206   :  { %457 = vmatpush2.msra.mxu1 %v3561_v43 }
 0x207   :  { %458 = vmatprep.subr.mxu1 %v3382_v22 }
 0x208   :  { %459 = vmatpush2.msra.mxu1 %v3564_v46 }
 0x209   :  { %461 = vmatmul.mubr.f32.vlgmr.msra.gmra.mxu1 %v296_v17  ;;  %v663_v17 = vld [vmem:[%s5118_s2 + $0x20] sm:$0xff] }
 0x20a   :  { %2900 = vmatprep.mubr.msk.f32.mxu1 %vm368_vm1, %v299_v18  ;;  %v662_v18 = vld [vmem:[%s5118_s2 + $0x18] sm:$0xff] }
 0x20d   :  { %466 = vmatmul.mubr.f32.gmra.mxu1 %v298_v19 }
 0x20e   :  { %2901 = vmatprep.mubr.msk.f32.mxu1 %vm368_vm1, %v301_v20  ;;  %v356_v35 = vpop.permute.xlu1 %355  ;;  %v665_v20 = vld [vmem:[%s5118_s2 + $0x30] sm:$0xff] }
 0x210   :  { %v351_v46 = vpop.permute.xlu0 %350 }
 0x211   :  { %471 = vmatmul.mubr.f32.gmra.mxu1 %v300_v21  ;;  %v661_v21 = vld [vmem:[%s5118_s2 + $0x10] sm:$0xff] }
 0x212   :  { %2902 = vmatprep.mubr.msk.f32.mxu1 %vm368_vm1, %v303_v23  ;;  %v346_v36 = vpop.permute.xlu1 %345 }
 0x214   :  { %v341_v53 = vpop.permute.xlu0 %340 }
 0x215   :  { %476 = vmatmul.mubr.f32.gmra.mxu1 %v302_v24  ;;  %v664_v24 = vld [vmem:[%s5118_s2 + $0x28] sm:$0xff] }
 0x216   :  { %2903 = vmatprep.mubr.msk.f32.mxu1 %vm368_vm1, %v305_v25  ;;  %v336_v37 = vpop.permute.xlu1 %335  ;;  %v659_v25 = vld [vmem:[%s5118_s2] sm:$0xff] }
 0x218   :  { %v366_v3 = vpop.permute.xlu0 %365 }
 0x219   :  { %481 = vmatmul.mubr.f32.gmra.mxu1 %v304_v26  ;;  %v660_v26 = vld [vmem:[%s5118_s2 + $0x8] sm:$0xff] }
 0x21a   :  { %2904 = vmatprep.mubr.msk.f32.mxu1 %vm368_vm1, %v307_v27  ;;  %v331_v38 = vpop.permute.xlu1 %330 }
 0x21c   :  { %v361_v9 = vpop.permute.xlu0 %360 }
 0x21d   :  { %486 = vmatmul.mubr.f32.gmra.mxu1 %v306_v28  ;;  %v666_v28 = vld [vmem:[%s5118_s2 + $0x38] sm:$0xff] }
 0x21e   :  { %2905 = vmatprep.mubr.msk.f32.mxu1 %vm368_vm1, %v309_v29  ;;  %v326_v39 = vpop.permute.xlu1 %325 }
 0x221   :  { %491 = vmatmul.mubr.f32.gmra.mxu1 %v308_v30  ;;  %v667_v30 = vld [vmem:[%s5118_s2 + $0x40] sm:$0xff] }
 0x222   :  { %2906 = vmatprep.mubr.msk.f32.mxu1 %vm368_vm1, %v311_v31 }
 0x225   :  { %496 = vmatmul.mubr.f32.gmra.mxu1 %v310_v32 }
 0x226   :  { %2907 = vmatprep.mubr.msk.f32.mxu1 %vm368_vm1, %v313_v33 }
 0x229   :  { %501 = vmatmul.mubr.f32.gmra.mxu1 %v312_v34 }
 0x2c9   :  { %v462_v40 = vpop.f32.mrf.mxu1 }
 0x2ca   :  { %v463_v41 = vadd.f32 %v462_v40, %v326_v39 }
 0x2cb   :  { %v464_v42 = vpop.f32.mrf.mxu1 }
 0x2cc   :  { %v3717_v43 = vmax.f32 %v463_v41, 0.0 }
 0x2cd   :  { %v467_v44 = vpop.f32.mrf.mxu1 }
 0x2ce   :  { %v468_v45 = vadd.f32 %v467_v44, %v331_v38  ;;  %533 = vrot.lane.b32.xlu0 %v3717_v43, %s3383_s25 }
 0x2cf   :  { %v469_v47 = vpop.f32.mrf.mxu1 }
 0x2d0   :  { %v3721_v48 = vmax.f32 %v468_v45, 0.0 }
 0x2d1   :  { %v472_v49 = vpop.f32.mrf.mxu1 }
 0x2d2   :  { %v473_v50 = vadd.f32 %v472_v49, %v336_v37  ;;  %535 = vrot.lane.b32.xlu0 %v3721_v48, %s3383_s25 }
 0x2d3   :  { %v474_v51 = vpop.f32.mrf.mxu1 }
 0x2d4   :  { %v3725_v52 = vmax.f32 %v473_v50, 0.0 }
 0x2d5   :  { %v477_v54 = vpop.f32.mrf.mxu1 }
 0x2d6   :  { %v478_v55 = vadd.f32 %v477_v54, %v341_v53  ;;  %537 = vrot.lane.b32.xlu0 %v3725_v52, %s3383_s25  ;;  %v623_v54 = vld [vmem:[%s5116_s4] sm:$0xff] }
 0x2d7   :  { %v479_v56 = vpop.f32.mrf.mxu1 }
 0x2d8   :  { %v3729_v57 = vmax.f32 %v478_v55, 0.0  ;;  %v628_v56 = vld [vmem:[%s5116_s4 + $0x28] sm:$0xff] }
 0x2d9   :  { %v482_v58 = vpop.f32.mrf.mxu1 }
 0x2da   :  { %v483_v59 = vadd.f32 %v482_v58, %v346_v36  ;;  %539 = vrot.lane.b32.xlu1 %v3729_v57, %s3383_s25  ;;  %v627_v58 = vld [vmem:[%s5116_s4 + $0x20] sm:$0xff] }
 0x2db   :  { %v484_v60 = vpop.f32.mrf.mxu1 }
 0x2dc   :  { %v3733_v61 = vmax.f32 %v483_v59, 0.0  ;;  %v632_v60 = vld [vmem:[%s5116_s4 + $0x48] sm:$0xff] }
 0x2dd   :  { %v487_v62 = vpop.f32.mrf.mxu1 }
 0x2de   :  { %v488_v63 = vadd.f32 %v487_v62, %v351_v46  ;;  %557 = vrot.lane.b32.xlu1 %v3729_v57, %s3380_s6  ;;  %2974 = vmatprep.subr.mxu0 %v3733_v61  ;;  %v631_v62 = vld [vmem:[%s5116_s4 + $0x40] sm:$0xff] }
 0x2df   :  { %541 = vrot.lane.b32.xlu0 %v3733_v61, %s3383_s25  ;;  %v489_v0 = vpop.f32.mrf.mxu1 }
 0x2e0   :  { %v3740_v1 = vmax.f32 %v488_v63, 0.0  ;;  %v636_v0 = vld [vmem:[%s5116_s4 + $0x68] sm:$0xff] }
 0x2e1   :  { %v492_v2 = vpop.f32.mrf.mxu1 }
 0x2e2   :  { %v493_v4 = vadd.f32 %v492_v2, %v356_v35  ;;  %559 = vrot.lane.b32.xlu1 %v3733_v61, %s3380_s6 }
 0x2e3   :  { %525 = vrot.lane.b32.xlu0 %v3740_v1, %s5102_s27  ;;  %v494_v5 = vpop.f32.mrf.mxu1 }
 0x2e4   :  { %v3746_v6 = vmax.f32 %v493_v4, 0.0  ;;  %v640_v5 = vld [vmem:[%s5116_s4 + $0x88] sm:$0xff] }
 0x2e5   :  { %v497_v7 = vpop.f32.mrf.mxu1 }
 0x2e6   :  { %543 = vrot.lane.b32.xlu1 %v3740_v1, %s3383_s25  ;;  %v498_v10 = vadd.f32 %v497_v7, %v361_v9 }
 0x2e7   :  { %545 = vrot.lane.b32.xlu0 %v3746_v6, %s3383_s25  ;;  %v499_v8 = vpop.f32.mrf.mxu1 }
 0x2e8   :  { %v3756_v13 = vmax.f32 %v498_v10, 0.0  ;;  %v639_v8 = vld [vmem:[%s5116_s4 + $0x80] sm:$0xff]  ;;  %v644_v10 = vld [vmem:[%s5116_s4 + $0xa8] sm:$0xff] }
 0x2e9   :  { %v502_v11 = vpop.f32.mrf.mxu1 }
 0x2ea   :  { %561 = vrot.lane.b32.xlu1 %v3740_v1, %s3380_s6  ;;  %v503_v14 = vadd.f32 %v502_v11, %v366_v3  ;;  %v635_v3 = vld [vmem:[%s5116_s4 + $0x60] sm:$0xff] }
 0x2eb   :  { %527 = vrot.lane.b32.xlu0 %v3746_v6, %s5102_s27  ;;  %v504_v12 = vpop.f32.mrf.mxu1 }
 0x2ec   :  { %v3766_v15 = vmax.f32 %v503_v14, 0.0  ;;  %v643_v12 = vld [vmem:[%s5116_s4 + $0xa0] sm:$0xff] }
 0x2ee   :  { %563 = vrot.lane.b32.xlu1 %v3746_v6, %s3380_s6 }
 0x2ef   :  { %529 = vrot.lane.b32.xlu0 %v3756_v13, %s5102_s27 }
 0x2f2   :  { %565 = vrot.lane.b32.xlu1 %v3756_v13, %s3380_s6 }
 0x2f3   :  { %523 = vrot.lane.b32.xlu0 %v3733_v61, %s5102_s27 }
 0x2f6   :  { %567 = vrot.lane.b32.xlu1 %v3766_v15, %s3380_s6 }
 0x2f7   :  { %531 = vrot.lane.b32.xlu0 %v3766_v15, %s5102_s27 }
 0x2fa   :  { %555 = vrot.lane.b32.xlu1 %v3725_v52, %s3380_s6 }
 0x2fb   :  { %521 = vrot.lane.b32.xlu0 %v3729_v57, %s5102_s27 }
 0x2fe   :  { %553 = vrot.lane.b32.xlu1 %v3721_v48, %s3380_s6 }
 0x2ff   :  { %519 = vrot.lane.b32.xlu0 %v3725_v52, %s5102_s27 }
 0x302   :  { %551 = vrot.lane.b32.xlu1 %v3717_v43, %s3380_s6 }
 0x303   :  { %517 = vrot.lane.b32.xlu0 %v3721_v48, %s5102_s27 }
 0x306   :  { %549 = vrot.lane.b32.xlu1 %v3766_v15, %s3383_s25 }
 0x307   :  { %515 = vrot.lane.b32.xlu0 %v3717_v43, %s5102_s27 }
 0x30a   :  { %547 = vrot.lane.b32.xlu1 %v3756_v13, %s3383_s25 }
 0x30b   :  { %589 = vrot.lane.b32.xlu0 %v3721_v48, %s3384_s7 }
 0x30e   :  { %591 = vrot.lane.b32.xlu1 %v3725_v52, %s3384_s7 }
 0x30f   :  { %585 = vrot.lane.b32.xlu0 %v3766_v15, %s5117_s28 }
 0x312   :  { %587 = vrot.lane.b32.xlu1 %v3717_v43, %s3384_s7 }
 0x313   :  { %581 = vrot.lane.b32.xlu0 %v3746_v6, %s5117_s28 }
 0x316   :  { %583 = vrot.lane.b32.xlu1 %v3756_v13, %s5117_s28 }
 0x317   :  { %577 = vrot.lane.b32.xlu0 %v3733_v61, %s5117_s28 }
 0x31a   :  { %579 = vrot.lane.b32.xlu1 %v3740_v1, %s5117_s28 }
 0x31b   :  { %573 = vrot.lane.b32.xlu0 %v3725_v52, %s5117_s28 }
 0x31e   :  { %575 = vrot.lane.b32.xlu1 %v3729_v57, %s5117_s28 }
 0x31f   :  { %569 = vrot.lane.b32.xlu0 %v3717_v43, %s5117_s28 }
 0x322   :  { %571 = vrot.lane.b32.xlu1 %v3721_v48, %s5117_s28 }
 0x323   :  { %619 = vrot.lane.b32.xlu0 %v3756_v13, %s5100_s30 }
 0x326   :  { %621 = vrot.lane.b32.xlu1 %v3766_v15, %s5100_s30 }
 0x327   :  { %615 = vrot.lane.b32.xlu0 %v3740_v1, %s5100_s30 }
 0x32a   :  { %617 = vrot.lane.b32.xlu1 %v3746_v6, %s5100_s30 }
 0x32b   :  { %611 = vrot.lane.b32.xlu0 %v3729_v57, %s5100_s30 }
 0x32e   :  { %613 = vrot.lane.b32.xlu1 %v3733_v61, %s5100_s30 }
 0x32f   :  { %607 = vrot.lane.b32.xlu0 %v3721_v48, %s5100_s30 }
 0x332   :  { %609 = vrot.lane.b32.xlu1 %v3725_v52, %s5100_s30 }
 0x333   :  { %603 = vrot.lane.b32.xlu0 %v3766_v15, %s3384_s7 }
 0x336   :  { %605 = vrot.lane.b32.xlu1 %v3717_v43, %s5100_s30 }
 0x337   :  { %599 = vrot.lane.b32.xlu0 %v3746_v6, %s3384_s7 }
 0x33a   :  { %601 = vrot.lane.b32.xlu1 %v3756_v13, %s3384_s7 }
 0x33b   :  { %595 = vrot.lane.b32.xlu0 %v3733_v61, %s3384_s7 }
 0x33e   :  { %597 = vrot.lane.b32.xlu1 %v3740_v1, %s3384_s7 }
 0x33f   :  { %690 = vperm.xlu0 %3377, %v663_v17  }
 0x340   :  { %v534_v19 = vpop.permute.xlu0 %533 }
 0x342   :  { %593 = vrot.lane.b32.xlu1 %v3729_v57, %s3384_s7 }
 0x343   :  { %685 = vperm.xlu0 %3377, %v662_v18   ;;  %v647_v18 = vld [vmem:[%s5116_s4 + $0xc0] sm:$0xff] }
 0x344   :  { %v536_v23 = vpop.permute.xlu0 %535 }
 0x346   :  { %700 = vperm.xlu1 %3378, %v665_v20  }
 0x347   :  { %680 = vperm.xlu0 %3377, %v661_v21  }
 0x348   :  { %v538_v29 = vpop.permute.xlu0 %537 }
 0x34a   :  { %695 = vperm.xlu1 %3378, %v664_v24   ;;  %v656_v24 = vld [vmem:[%s5116_s4 + $0x108] sm:$0xff] }
 0x34b   :  { %670 = vperm.xlu0 %3377, %v659_v25  }
 0x34c   :  { %v540_v27 = vpop.permute.xlu1 %539 }
 0x34e   :  { %675 = vperm.xlu1 %3378, %v660_v26   ;;  %v655_v26 = vld [vmem:[%s5116_s4 + $0x100] sm:$0xff] }
 0x34f   :  { %705 = vperm.xlu0 %3377, %v666_v28   ;;  %v626_v28 = vld [vmem:[%s5116_s4 + $0x18] sm:$0xff] }
 0x350   :  { %v558_v31 = vpop.permute.xlu1 %557 }
 0x351   :  { %v542_v32 = vpop.permute.xlu0 %541 }
 0x352   :  { %710 = vperm.xlu1 %3378, %v667_v30  }
 0x354   :  { %v560_v33 = vpop.permute.xlu1 %559 }
 0x355   :  { %v526_v34 = vpop.permute.xlu0 %525 }
 0x358   :  { %v544_v35 = vpop.permute.xlu1 %543 }
 0x359   :  { %v546_v36 = vpop.permute.xlu0 %545 }
 0x35a   :  { %2975 = vmatpush3.msra.mxu0 %v546_v36 }
 0x35b   :  { %2976 = vmatprep.subr.mxu0 %v3729_v57 }
 0x35c   :  { %2977 = vmatpush3.msra.mxu0 %v544_v35  ;;  %v562_v37 = vpop.permute.xlu1 %561  ;;  %v625_v35 = vld [vmem:[%s5116_s4 + $0x10] sm:$0xff] }
 0x35d   :  { %v528_v38 = vpop.permute.xlu0 %527  ;;  %2978 = vmatprep.subr.mxu0 %v3725_v52 }
 0x35e   :  { %2979 = vmatpush3.msra.mxu0 %v542_v32 }
 0x35f   :  { %2980 = vmatprep.subr.mxu0 %v3721_v48 }
 0x360   :  { %2981 = vmatpush3.msra.mxu0 %v540_v27  ;;  %v564_v39 = vpop.permute.xlu1 %563 }
 0x361   :  { %v530_v40 = vpop.permute.xlu0 %529  ;;  %2982 = vmatprep.subr.mxu0 %v3717_v43 }
 0x362   :  { %2983 = vmatpush3.msra.mxu0 %v538_v29 }
 0x364   :  { %v566_v41 = vpop.permute.xlu1 %565 }
 0x365   :  { %v524_v42 = vpop.permute.xlu0 %523 }
 0x368   :  { %v568_v44 = vpop.permute.xlu1 %567 }
 0x369   :  { %v532_v45 = vpop.permute.xlu0 %531  ;;  %2984 = vmatprep.subr.mxu0 %v568_v44  ;;  %v642_v44 = vld [vmem:[%s5116_s4 + $0x98] sm:$0xff] }
 0x36a   :  { %2985 = vmatpush3.msra.mxu0 %v536_v23  ;;  %v651_v23 = vld [vmem:[%s5116_s4 + $0xe0] sm:$0xff] }
 0x36b   :  { %2986 = vmatprep.subr.mxu0 %v566_v41  ;;  %v638_v41 = vld [vmem:[%s5116_s4 + $0x78] sm:$0xff] }
 0x36c   :  { %2987 = vmatpush3.msra.mxu0 %v534_v19  ;;  %v556_v46 = vpop.permute.xlu1 %555  ;;  %v652_v19 = vld [vmem:[%s5116_s4 + $0xe8] sm:$0xff] }
 0x36d   :  { %v522_v47 = vpop.permute.xlu0 %521  ;;  %2988 = vmatprep.subr.mxu0 %v564_v39  ;;  %v634_v39 = vld [vmem:[%s5116_s4 + $0x58] sm:$0xff] }
 0x36e   :  { %2989 = vmatpush3.msra.mxu0 %v532_v45  ;;  %v641_v45 = vld [vmem:[%s5116_s4 + $0x90] sm:$0xff] }
 0x36f   :  { %2990 = vmatprep.subr.mxu0 %v562_v37  ;;  %v630_v37 = vld [vmem:[%s5116_s4 + $0x38] sm:$0xff] }
 0x370   :  { %2991 = vmatpush3.msra.mxu0 %v530_v40  ;;  %v554_v48 = vpop.permute.xlu1 %553  ;;  %v633_v40 = vld [vmem:[%s5116_s4 + $0x50] sm:$0xff] }
 0x371   :  { %v520_v49 = vpop.permute.xlu0 %519  ;;  %2992 = vmatprep.subr.mxu0 %v560_v33 }
 0x372   :  { %2993 = vmatpush3.msra.mxu0 %v528_v38  ;;  %v629_v38 = vld [vmem:[%s5116_s4 + $0x30] sm:$0xff] }
 0x373   :  { %2994 = vmatprep.subr.mxu0 %v558_v31 }
 0x374   :  { %2995 = vmatpush3.msra.mxu0 %v526_v34  ;;  %v552_v43 = vpop.permute.xlu1 %551 }
 0x375   :  { %v518_v50 = vpop.permute.xlu0 %517  ;;  %2996 = vmatprep.subr.mxu0 %v556_v46  ;;  %v646_v46 = vld [vmem:[%s5116_s4 + $0xb8] sm:$0xff] }
 0x376   :  { %2997 = vmatpush3.msra.mxu0 %v524_v42  ;;  %v637_v42 = vld [vmem:[%s5116_s4 + $0x70] sm:$0xff] }
 0x377   :  { %2998 = vmatprep.subr.mxu0 %v554_v48  ;;  %v650_v48 = vld [vmem:[%s5116_s4 + $0xd8] sm:$0xff] }
 0x378   :  { %2999 = vmatpush3.msra.mxu0 %v522_v47  ;;  %v550_v51 = vpop.permute.xlu1 %549  ;;  %v645_v47 = vld [vmem:[%s5116_s4 + $0xb0] sm:$0xff] }
 0x379   :  { %v516_v52 = vpop.permute.xlu0 %515  ;;  %3000 = vmatprep.subr.mxu0 %v552_v43  ;;  %v654_v43 = vld [vmem:[%s5116_s4 + $0xf8] sm:$0xff] }
 0x37a   :  { %3001 = vmatpush3.msra.mxu0 %v520_v49  ;;  %v649_v49 = vld [vmem:[%s5116_s4 + $0xd0] sm:$0xff] }
 0x37b   :  { %3002 = vmatprep.subr.mxu0 %v550_v51  ;;  %v658_v51 = vld [vmem:[%s5116_s4 + $0x118] sm:$0xff] }
 0x37c   :  { %3003 = vmatpush3.msra.mxu0 %v518_v50  ;;  %v548_v53 = vpop.permute.xlu1 %547  ;;  %v653_v50 = vld [vmem:[%s5116_s4 + $0xf0] sm:$0xff] }
 0x37d   :  { %v590_v55 = vpop.permute.xlu0 %589  ;;  %3004 = vmatprep.subr.mxu0 %v548_v53 }
 0x37e   :  { %3005 = vmatpush3.msra.mxu0 %v516_v52  ;;  %v657_v52 = vld [vmem:[%s5116_s4 + $0x110] sm:$0xff] }
 0x37f   :  { %806 = vmatmul.mubr.f32.vlgmr.msra.gmra.mxu0 %v623_v54  ;;  %851 = vmatprep.subr.mxu0 %v3382_v22 }
 0x380   :  { %v592_v57 = vpop.permute.xlu1 %591  ;;  %810 = vmatprep.mubr.f32.mxu0 %v628_v56 }
 0x381   :  { %v586_v59 = vpop.permute.xlu0 %585  ;;  %852 = vmatpush1.msra.mxu0 %v592_v57 }
 0x382   :  { %853 = vmatprep.subr.mxu0 %v3382_v22 }
 0x383   :  { %811 = vmatmul.mubr.f32.gmra.mxu0 %v627_v58 }
 0x384   :  { %854 = vmatpush1.msra.mxu0 %v590_v55  ;;  %v588_v61 = vpop.permute.xlu1 %587  ;;  %815 = vmatprep.mubr.f32.mxu0 %v632_v60 }
 0x385   :  { %v582_v63 = vpop.permute.xlu0 %581  ;;  %855 = vmatprep.subr.mxu0 %v3382_v22 }
 0x386   :  { %856 = vmatpush1.msra.mxu0 %v588_v61 }
 0x387   :  { %857 = vmatprep.subr.mxu0 %v3382_v22  ;;  %816 = vmatmul.mubr.f32.gmra.mxu0 %v631_v62 }
 0x388   :  { %858 = vmatpush1.msra.mxu0 %v586_v59  ;;  %v584_v2 = vpop.permute.xlu1 %583  ;;  %820 = vmatprep.mubr.f32.mxu0 %v636_v0 }
 0x389   :  { %v578_v4 = vpop.permute.xlu0 %577  ;;  %859 = vmatprep.subr.mxu0 %v3382_v22 }
 0x38a   :  { %860 = vmatpush1.msra.mxu0 %v584_v2 }
 0x38b   :  { %861 = vmatprep.subr.mxu0 %v3382_v22  ;;  %821 = vmatmul.mubr.f32.gmra.mxu0 %v635_v3 }
 0x38c   :  { %862 = vmatpush1.msra.mxu0 %v582_v63  ;;  %v580_v7 = vpop.permute.xlu1 %579  ;;  %825 = vmatprep.mubr.f32.mxu0 %v640_v5 }
 0x38d   :  { %v574_v9 = vpop.permute.xlu0 %573  ;;  %863 = vmatprep.subr.mxu0 %v3382_v22 }
 0x38e   :  { %864 = vmatpush1.msra.mxu0 %v580_v7 }
 0x38f   :  { %865 = vmatprep.subr.mxu0 %v3382_v22  ;;  %826 = vmatmul.mubr.f32.gmra.mxu0 %v639_v8 }
 0x390   :  { %866 = vmatpush1.msra.mxu0 %v578_v4  ;;  %v576_v11 = vpop.permute.xlu1 %575  ;;  %830 = vmatprep.mubr.f32.mxu0 %v644_v10 }
 0x391   :  { %v570_v14 = vpop.permute.xlu0 %569  ;;  %867 = vmatprep.subr.mxu0 %v3382_v22 }
 0x392   :  { %868 = vmatpush1.msra.mxu0 %v576_v11 }
 0x393   :  { %869 = vmatprep.subr.mxu0 %v3382_v22  ;;  %831 = vmatmul.mubr.f32.gmra.mxu0 %v643_v12 }
 0x394   :  { %870 = vmatpush1.msra.mxu0 %v574_v9  ;;  %v572_v17 = vpop.permute.xlu1 %571  ;;  %835 = vmatprep.mubr.f32.mxu0 %v648_v16 }
 0x395   :  { %871 = vmatprep.subr.mxu0 %v3382_v22  ;;  %v620_v20 = vpop.permute.xlu0 %619 }
 0x396   :  { %872 = vmatpush1.msra.mxu0 %v572_v17 }
 0x397   :  { %873 = vmatprep.subr.mxu0 %v3382_v22  ;;  %836 = vmatmul.mubr.f32.gmra.mxu0 %v647_v18 }
 0x398   :  { %874 = vmatpush1.msra.mxu0 %v570_v14  ;;  %v622_v21 = vpop.permute.xlu1 %621  ;;  %840 = vmatprep.mubr.f32.mxu0 %v652_v19 }
 0x399   :  { %875 = vmatprep.subr.mxu0 %v3382_v22  ;;  %v616_v27 = vpop.permute.xlu0 %615 }
 0x39a   :  { %876 = vmatpush1.msra.mxu0 %v3766_v15 }
 0x39b   :  { %877 = vmatprep.subr.mxu0 %v3382_v22  ;;  %841 = vmatmul.mubr.f32.gmra.mxu0 %v651_v23 }
 0x39c   :  { %878 = vmatpush1.msra.mxu0 %v3756_v13  ;;  %v618_v25 = vpop.permute.xlu1 %617  ;;  %845 = vmatprep.mubr.f32.mxu0 %v656_v24 }
 0x39d   :  { %879 = vmatprep.subr.mxu0 %v3382_v22  ;;  %v612_v15 = vpop.permute.xlu0 %611 }
 0x39e   :  { %880 = vmatpush1.msra.mxu0 %v3746_v6 }
 0x39f   :  { %881 = vmatprep.subr.mxu0 %v3382_v22  ;;  %846 = vmatmul.mubr.f32.gmra.mxu0 %v655_v26 }
 0x3a0   :  { %882 = vmatpush1.msra.mxu0 %v3740_v1  ;;  %v614_v13 = vpop.permute.xlu1 %613  ;;  %2908 = vmatprep.mubr.msk.f32.mxu0 %vm713_vm2, %v626_v28 }
 0x3a1   :  { %885 = vmatprep.subr.mxu0 %v3382_v22  ;;  %v608_v6 = vpop.permute.xlu0 %607 }
 0x3a2   :  { %886 = vmatpush2.msra.mxu0 %v622_v21 }
 0x3a3   :  { %887 = vmatprep.subr.mxu0 %v3382_v22 }
 0x3a4   :  { %888 = vmatpush2.msra.mxu0 %v620_v20  ;;  %v610_v29 = vpop.permute.xlu1 %609 }
 0x3a5   :  { %889 = vmatprep.subr.mxu0 %v3382_v22  ;;  %v604_v30 = vpop.permute.xlu0 %603 }
 0x3a6   :  { %890 = vmatpush2.msra.mxu0 %v618_v25 }
 0x3a7   :  { %891 = vmatprep.subr.mxu0 %v3382_v22 }
 0x3a8   :  { %892 = vmatpush2.msra.mxu0 %v616_v27  ;;  %v606_v1 = vpop.permute.xlu1 %605 }
 0x3a9   :  { %893 = vmatprep.subr.mxu0 %v3382_v22  ;;  %v600_v32 = vpop.permute.xlu0 %599 }
 0x3aa   :  { %894 = vmatpush2.msra.mxu0 %v614_v13 }
 0x3ab   :  { %895 = vmatprep.subr.mxu0 %v3382_v22 }
 0x3ac   :  { %896 = vmatpush2.msra.mxu0 %v612_v15  ;;  %v602_v31 = vpop.permute.xlu1 %601 }
 0x3ad   :  { %897 = vmatprep.subr.mxu0 %v3382_v22  ;;  %v596_v34 = vpop.permute.xlu0 %595 }
 0x3ae   :  { %898 = vmatpush2.msra.mxu0 %v610_v29 }
 0x3af   :  { %899 = vmatprep.subr.mxu0 %v3382_v22 }
 0x3b0   :  { %900 = vmatpush2.msra.mxu0 %v608_v6  ;;  %v598_v33 = vpop.permute.xlu1 %597 }
 0x3b1   :  { %901 = vmatprep.subr.mxu0 %v3382_v22 }
 0x3b2   :  { %902 = vmatpush2.msra.mxu0 %v606_v1 }
 0x3b3   :  { %903 = vmatprep.subr.mxu0 %v3382_v22 }
 0x3b4   :  { %904 = vmatpush2.msra.mxu0 %v604_v30  ;;  %v594_v36 = vpop.permute.xlu1 %593 }
 0x3b5   :  { %905 = vmatprep.subr.mxu0 %v3382_v22 }
 0x3b6   :  { %906 = vmatpush2.msra.mxu0 %v602_v31 }
 0x3b7   :  { %907 = vmatprep.subr.mxu0 %v3382_v22 }
 0x3b8   :  { %908 = vmatpush2.msra.mxu0 %v600_v32 }
 0x3b9   :  { %909 = vmatprep.subr.mxu0 %v3382_v22 }
 0x3ba   :  { %910 = vmatpush2.msra.mxu0 %v598_v33  ;;  %v691_v8 = vpop.permute.xlu0 %690 }
 0x3bb   :  { %911 = vmatprep.subr.mxu0 %v3382_v22 }
 0x3bc   :  { %912 = vmatpush2.msra.mxu0 %v596_v34 }
 0x3bd   :  { %913 = vmatprep.subr.mxu0 %v3382_v22 }
 0x3be   :  { %914 = vmatpush2.msra.mxu0 %v594_v36  ;;  %v686_v14 = vpop.permute.xlu0 %685 }
 0x3bf   :  { %916 = vmatmul.mubr.f32.vlgmr.msra.gmra.mxu0 %v625_v35  ;;  %1369 = vmatprep.subr.mxu0 %v3382_v22 }
 0x3c0   :  { %2909 = vmatprep.mubr.msk.f32.mxu0 %vm713_vm2, %v630_v37 }
 0x3c1   :  { %v701_v5 = vpop.permute.xlu1 %700 }
 0x3c2   :  { %v681_v24 = vpop.permute.xlu0 %680 }
 0x3c3   :  { %921 = vmatmul.mubr.f32.gmra.mxu0 %v629_v38 }
 0x3c4   :  { %2910 = vmatprep.mubr.msk.f32.mxu0 %vm713_vm2, %v634_v39 }
 0x3c5   :  { %v696_v10 = vpop.permute.xlu1 %695 }
 0x3c6   :  { %v671_v38 = vpop.permute.xlu0 %670 }
 0x3c7   :  { %926 = vmatmul.mubr.f32.gmra.mxu0 %v633_v40 }
 0x3c8   :  { %2911 = vmatprep.mubr.msk.f32.mxu0 %vm713_vm2, %v638_v41 }
 0x3c9   :  { %v676_v17 = vpop.permute.xlu1 %675 }
 0x3cb   :  { %931 = vmatmul.mubr.f32.gmra.mxu0 %v637_v42 }
 0x3cc   :  { %2912 = vmatprep.mubr.msk.f32.mxu0 %vm713_vm2, %v642_v44 }
 0x3cf   :  { %936 = vmatmul.mubr.f32.gmra.mxu0 %v641_v45 }
 0x3d0   :  { %2913 = vmatprep.mubr.msk.f32.mxu0 %vm713_vm2, %v646_v46 }
 0x3d3   :  { %941 = vmatmul.mubr.f32.gmra.mxu0 %v645_v47 }
 0x3d4   :  { %2914 = vmatprep.mubr.msk.f32.mxu0 %vm713_vm2, %v650_v48 }
 0x3d7   :  { %946 = vmatmul.mubr.f32.gmra.mxu0 %v649_v49 }
 0x3d8   :  { %2915 = vmatprep.mubr.msk.f32.mxu0 %vm713_vm2, %v654_v43 }
 0x3db   :  { %951 = vmatmul.mubr.f32.gmra.mxu0 %v653_v50 }
 0x3dc   :  { %2916 = vmatprep.mubr.msk.f32.mxu0 %vm713_vm2, %v658_v51 }
 0x3df   :  { %956 = vmatmul.mubr.f32.gmra.mxu0 %v657_v52 }
 0x43f   :  { %v3006_v53 = vpop.f32.mrf.mxu0 }
 0x441   :  { %v3007_v54 = vpop.f32.mrf.mxu0 }
 0x442   :  { %v3008_v32 = vadd.f32 %v3007_v54, %v3006_v53 }
 0x443   :  { %v3009_v55 = vpop.f32.mrf.mxu0 }
 0x444   :  { %v808_v40 = vadd.f32 %v3008_v32, %v671_v38 }
 0x445   :  { %v3010_v56 = vpop.f32.mrf.mxu0 }
 0x446   :  { %v3011_v12 = vadd.f32 %v3010_v56, %v3009_v55 }
 0x447   :  { %v3012_v57 = vpop.f32.mrf.mxu0 }
 0x448   :  { %v813_v20 = vadd.f32 %v3011_v12, %v676_v17  ;;  %v1062_v12 = vld [vmem:[%s5076_s9 + $0x10] sm:$0xff]  ;;  %v1064_v17 = vld [vmem:[%s5076_s9 + $0x20] sm:$0xff] }
 0x449   :  { %v3013_v58 = vpop.f32.mrf.mxu0 }
 0x44a   :  { %v3014_v19 = vadd.f32 %v3013_v58, %v3012_v57 }
 0x44b   :  { %v3015_v59 = vpop.f32.mrf.mxu0 }
 0x44c   :  { %v818_v28 = vadd.f32 %v3014_v19, %v681_v24 }
 0x44d   :  { %v3016_v60 = vpop.f32.mrf.mxu0 }
 0x44e   :  { %v3017_v26 = vadd.f32 %v3016_v60, %v3015_v59  ;;  %v711_v59 = vpop.permute.xlu1 %710 }
 0x44f   :  { %v3018_v61 = vpop.f32.mrf.mxu0 }
 0x450   :  { %v823_v30 = vadd.f32 %v3017_v26, %v686_v14  ;;  %v1065_v14 = vld [vmem:[%s5076_s9 + $0x28] sm:$0xff] }
 0x451   :  { %v3019_v62 = vpop.f32.mrf.mxu0 }
 0x452   :  { %v3020_v6 = vadd.f32 %v3019_v62, %v3018_v61 }
 0x453   :  { %v3021_v63 = vpop.f32.mrf.mxu0 }
 0x454   :  { %v828_v37 = vadd.f32 %v3020_v6, %v691_v8 }
 0x455   :  { %v3022_v0 = vpop.f32.mrf.mxu0 }
 0x456   :  { %v3023_v35 = vadd.f32 %v3022_v0, %v3021_v63 }
 0x457   :  { %v3024_v2 = vpop.f32.mrf.mxu0 }
 0x458   :  { %v833_v47 = vadd.f32 %v3023_v35, %v696_v10  ;;  %v1063_v10 = vld [vmem:[%s5076_s9 + $0x18] sm:$0xff] }
 0x459   :  { %v3025_v3 = vpop.f32.mrf.mxu0 }
 0x45a   :  { %v3026_v44 = vadd.f32 %v3025_v3, %v3024_v2 }
 0x45b   :  { %v4028_v4 = vpop.f32.mrf.mxu0 }
 0x45c   :  { %v838_v52 = vadd.f32 %v3026_v44, %v701_v5  ;;  %v706_v5 = vpop.permute.xlu0 %705  ;;  %v1045_v44 = vld [vmem:[%s5075_s8 + $0x18] sm:$0xff] }
 0x45d   :  { %v4030_v7 = vpop.f32.mrf.mxu0 }
 0x45e   :  { %v3029_v63 = vadd.f32 %v4030_v7, %v4028_v4  ;;  %v1043_v7 = vld [vmem:[%s5075_s8 + $0x8] sm:$0xff] }
 0x45f   :  { %v3030_v9 = vpop.f32.mrf.mxu0  ;;  %1179 = vmatprep.mubr.f32.mxu1 %v1043_v7 }
 0x460   :  { %v843_v8 = vadd.f32 %v3029_v63, %v706_v5  ;;  %v1047_v63 = vld [vmem:[%s5075_s8 + $0x28] sm:$0xff] }
 0x461   :  { %v3031_v11 = vpop.f32.mrf.mxu0  ;;  %v1059_v5 = vld [vmem:[%s5075_s8 + $0x88] sm:$0xff] }
 0x462   :  { %v3032_v56 = vadd.f32 %v3031_v11, %v3030_v9  ;;  %v1061_v11 = vld [vmem:[%s5076_s9 + $0x8] sm:$0xff] }
 0x464   :  { %v848_v61 = vadd.f32 %v3032_v56, %v711_v59  ;;  %v1044_v59 = vld [vmem:[%s5075_s8 + $0x10] sm:$0xff] }
 0x47f   :  { %v917_v16 = vpop.f32.mrf.mxu0 }
 0x480   :  { %v918_v45 = vadd.f32 %v917_v16, %v808_v40  ;;  %v1060_v16 = vld [vmem:[%s5076_s9] sm:$0xff] }
 0x481   :  { %v919_v18 = vpop.f32.mrf.mxu0 }
 0x482   :  { %v4052_v50 = vmax.f32 %v918_v45, 0.0  ;;  %v1049_v45 = vld [vmem:[%s5075_s8 + $0x38] sm:$0xff] }
 0x483   :  { %v922_v21 = vpop.f32.mrf.mxu0 }
 0x484   :  { %v923_v23 = vadd.f32 %v922_v21, %v813_v20 }
 0x485   :  { %v924_v25 = vpop.f32.mrf.mxu0 }
 0x486   :  { %v4032_v27 = vmax.f32 %v923_v23, 0.0 }
 0x487   :  { %v927_v13 = vpop.f32.mrf.mxu0 }
 0x488   :  { %v928_v15 = vadd.f32 %v927_v13, %v818_v28  ;;  %1008 = vrot.lane.b32.xlu1 %v4032_v27, %s5117_s28 }
 0x489   :  { %v929_v29 = vpop.f32.mrf.mxu0 }
 0x48a   :  { %v4036_v1 = vmax.f32 %v928_v15, 0.0 }
 0x48b   :  { %v932_v31 = vpop.f32.mrf.mxu0 }
 0x48c   :  { %v933_v33 = vadd.f32 %v932_v31, %v823_v30  ;;  %1010 = vrot.lane.b32.xlu1 %v4036_v1, %s5117_s28 }
 0x48d   :  { %v934_v34 = vpop.f32.mrf.mxu0 }
 0x48e   :  { %v4040_v36 = vmax.f32 %v933_v33, 0.0 }
 0x48f   :  { %v937_v39 = vpop.f32.mrf.mxu0 }
 0x490   :  { %v938_v41 = vadd.f32 %v937_v39, %v828_v37  ;;  %994 = vrot.lane.b32.xlu0 %v4040_v36, %s3380_s6  ;;  %1012 = vrot.lane.b32.xlu1 %v4040_v36, %s5117_s28 }
 0x491   :  { %v939_v42 = vpop.f32.mrf.mxu0 }
 0x492   :  { %v4046_v46 = vmax.f32 %v938_v41, 0.0 }
 0x493   :  { %v942_v48 = vpop.f32.mrf.mxu0 }
 0x494   :  { %v943_v49 = vadd.f32 %v942_v48, %v833_v47  ;;  %996 = vrot.lane.b32.xlu0 %v4046_v46, %s3380_s6  ;;  %1014 = vrot.lane.b32.xlu1 %v4046_v46, %s5117_s28  ;;  %v1048_v48 = vld [vmem:[%s5075_s8 + $0x30] sm:$0xff] }
 0x495   :  { %v944_v43 = vpop.f32.mrf.mxu0 }
 0x496   :  { %v4054_v51 = vmax.f32 %v943_v49, 0.0  ;;  %v1052_v49 = vld [vmem:[%s5075_s8 + $0x50] sm:$0xff] }
 0x497   :  { %v947_v53 = vpop.f32.mrf.mxu0 }
 0x498   :  { %v948_v54 = vadd.f32 %v947_v53, %v838_v52  ;;  %998 = vrot.lane.b32.xlu0 %v4054_v51, %s3380_s6  ;;  %1006 = vrot.lane.b32.xlu1 %v4052_v50, %s5117_s28  ;;  %v1055_v52 = vld [vmem:[%s5075_s8 + $0x68] sm:$0xff] }
 0x499   :  { %v949_v55 = vpop.f32.mrf.mxu0 }
 0x49a   :  { %v4060_v57 = vmax.f32 %v948_v54, 0.0  ;;  %v1054_v54 = vld [vmem:[%s5075_s8 + $0x60] sm:$0xff] }
 0x49b   :  { %v952_v58 = vpop.f32.mrf.mxu0  ;;  %v1058_v55 = vld [vmem:[%s5075_s8 + $0x80] sm:$0xff] }
 0x49c   :  { %1000 = vrot.lane.b32.xlu0 %v4060_v57, %s3380_s6  ;;  %990 = vrot.lane.b32.xlu1 %v4032_v27, %s3380_s6  ;;  %v953_v9 = vadd.f32 %v952_v58, %v843_v8  ;;  %v1057_v58 = vld [vmem:[%s5075_s8 + $0x78] sm:$0xff] }
 0x49d   :  { %v954_v60 = vpop.f32.mrf.mxu0 }
 0x49e   :  { %v4082_v4 = vmax.f32 %v953_v9, 0.0 }
 0x49f   :  { %v957_v62 = vpop.f32.mrf.mxu0 }
 0x4a0   :  { %v958_v0 = vadd.f32 %v957_v62, %v848_v61  ;;  %992 = vrot.lane.b32.xlu0 %v4036_v1, %s3380_s6  ;;  %982 = vrot.lane.b32.xlu1 %v4060_v57, %s3383_s25 }
 0x4a1   :  { %v959_v2 = vpop.f32.mrf.mxu0 }
 0x4a2   :  { %v4072_v3 = vmax.f32 %v958_v0, 0.0  ;;  %v1050_v0 = vld [vmem:[%s5075_s8 + $0x40] sm:$0xff]  ;;  %v1053_v2 = vld [vmem:[%s5075_s8 + $0x58] sm:$0xff] }
 0x4a4   :  { %988 = vrot.lane.b32.xlu0 %v4052_v50, %s3380_s6  ;;  %986 = vrot.lane.b32.xlu1 %v4072_v3, %s3383_s25 }
 0x4a8   :  { %980 = vrot.lane.b32.xlu0 %v4054_v51, %s3383_s25  ;;  %978 = vrot.lane.b32.xlu1 %v4046_v46, %s3383_s25 }
 0x4ac   :  { %984 = vrot.lane.b32.xlu0 %v4082_v4, %s3383_s25  ;;  %974 = vrot.lane.b32.xlu1 %v4036_v1, %s3383_s25 }
 0x4b0   :  { %976 = vrot.lane.b32.xlu0 %v4040_v36, %s3383_s25  ;;  %972 = vrot.lane.b32.xlu1 %v4032_v27, %s3383_s25 }
 0x4b4   :  { %1002 = vrot.lane.b32.xlu0 %v4082_v4, %s3380_s6  ;;  %970 = vrot.lane.b32.xlu1 %v4052_v50, %s3383_s25 }
 0x4b8   :  { %1004 = vrot.lane.b32.xlu0 %v4072_v3, %s3380_s6  ;;  %1038 = vrot.lane.b32.xlu1 %v4082_v4, %s3384_s7 }
 0x4bc   :  { %1040 = vrot.lane.b32.xlu0 %v4072_v3, %s3384_s7  ;;  %1034 = vrot.lane.b32.xlu1 %v4054_v51, %s3384_s7 }
 0x4c0   :  { %1036 = vrot.lane.b32.xlu0 %v4060_v57, %s3384_s7  ;;  %1030 = vrot.lane.b32.xlu1 %v4040_v36, %s3384_s7 }
 0x4c4   :  { %1032 = vrot.lane.b32.xlu0 %v4046_v46, %s3384_s7  ;;  %1026 = vrot.lane.b32.xlu1 %v4032_v27, %s3384_s7 }
 0x4c8   :  { %1028 = vrot.lane.b32.xlu0 %v4036_v1, %s3384_s7  ;;  %1022 = vrot.lane.b32.xlu1 %v4072_v3, %s5117_s28 }
 0x4cc   :  { %1024 = vrot.lane.b32.xlu0 %v4052_v50, %s3384_s7  ;;  %1018 = vrot.lane.b32.xlu1 %v4060_v57, %s5117_s28 }
 0x4d0   :  { %1020 = vrot.lane.b32.xlu0 %v4082_v4, %s5117_s28  ;;  %1083 = vperm.xlu1 %3378, %v1063_v10  }
 0x4d4   :  { %1016 = vrot.lane.b32.xlu0 %v4054_v51, %s5117_s28  ;;  %1073 = vperm.xlu1 %3378, %v1061_v11  }
 0x4d8   :  { %1078 = vperm.xlu0 %3377, %v1062_v12   ;;  %1093 = vperm.xlu1 %3378, %v1065_v14  }
 0x4dc   :  { %1068 = vperm.xlu0 %3377, %v1060_v16  }
 0x4e0   :  { %1088 = vperm.xlu0 %3377, %v1064_v17  }
 0x4fa   :  { %v1009_v18 = vpop.permute.xlu1 %1008 }
 0x4fe   :  { %v1011_v19 = vpop.permute.xlu1 %1010 }
 0x502   :  { %v995_v20 = vpop.permute.xlu0 %994  ;;  %v1013_v21 = vpop.permute.xlu1 %1012 }
 0x506   :  { %v997_v23 = vpop.permute.xlu0 %996  ;;  %v1015_v24 = vpop.permute.xlu1 %1014 }
 0x507   :  { %3033 = vmatprep.subr.mxu1 %v1015_v24 }
 0x50a   :  { %v999_v25 = vpop.permute.xlu0 %998  ;;  %v1007_v26 = vpop.permute.xlu1 %1006 }
 0x50e   :  { %v1001_v28 = vpop.permute.xlu0 %1000  ;;  %v991_v13 = vpop.permute.xlu1 %990 }
 0x50f   :  { %3034 = vmatpush3.msra.mxu1 %v1001_v28 }
 0x510   :  { %3035 = vmatprep.subr.mxu1 %v1013_v21 }
 0x511   :  { %3036 = vmatpush3.msra.mxu1 %v999_v25 }
 0x512   :  { %v993_v15 = vpop.permute.xlu0 %992  ;;  %3037 = vmatprep.subr.mxu1 %v1011_v19  ;;  %v983_v29 = vpop.permute.xlu1 %982 }
 0x513   :  { %3038 = vmatpush3.msra.mxu1 %v997_v23 }
 0x514   :  { %3039 = vmatprep.subr.mxu1 %v1009_v18 }
 0x515   :  { %3040 = vmatpush3.msra.mxu1 %v995_v20 }
 0x516   :  { %v989_v6 = vpop.permute.xlu0 %988  ;;  %3041 = vmatprep.subr.mxu1 %v1007_v26  ;;  %v987_v30 = vpop.permute.xlu1 %986 }
 0x517   :  { %3042 = vmatpush3.msra.mxu1 %v993_v15 }
 0x518   :  { %3043 = vmatprep.subr.mxu1 %v4072_v3  ;;  %v1056_v3 = vld [vmem:[%s5075_s8 + $0x70] sm:$0xff] }
 0x519   :  { %3044 = vmatpush3.msra.mxu1 %v991_v13 }
 0x51a   :  { %v981_v31 = vpop.permute.xlu0 %980  ;;  %3045 = vmatprep.subr.mxu1 %v4082_v4  ;;  %v979_v32 = vpop.permute.xlu1 %978 }
 0x51b   :  { %3046 = vmatpush3.msra.mxu1 %v989_v6 }
 0x51c   :  { %3047 = vmatprep.subr.mxu1 %v4060_v57 }
 0x51d   :  { %3048 = vmatpush3.msra.mxu1 %v987_v30 }
 0x51e   :  { %v985_v33 = vpop.permute.xlu0 %984  ;;  %3049 = vmatprep.subr.mxu1 %v4054_v51  ;;  %v975_v34 = vpop.permute.xlu1 %974  ;;  %v1051_v51 = vld [vmem:[%s5075_s8 + $0x48] sm:$0xff] }
 0x51f   :  { %3050 = vmatpush3.msra.mxu1 %v985_v33 }
 0x520   :  { %3051 = vmatprep.subr.mxu1 %v4046_v46 }
 0x521   :  { %3052 = vmatpush3.msra.mxu1 %v983_v29 }
 0x522   :  { %v977_v35 = vpop.permute.xlu0 %976  ;;  %3053 = vmatprep.subr.mxu1 %v4040_v36  ;;  %v973_v37 = vpop.permute.xlu1 %972  ;;  %v1042_v36 = vld [vmem:[%s5075_s8] sm:$0xff] }
 0x523   :  { %3054 = vmatpush3.msra.mxu1 %v981_v31 }
 0x524   :  { %3055 = vmatprep.subr.mxu1 %v4036_v1  ;;  %v1046_v1 = vld [vmem:[%s5075_s8 + $0x20] sm:$0xff] }
 0x525   :  { %3056 = vmatpush3.msra.mxu1 %v979_v32 }
 0x526   :  { %v1003_v38 = vpop.permute.xlu0 %1002  ;;  %3057 = vmatprep.subr.mxu1 %v4032_v27  ;;  %v971_v39 = vpop.permute.xlu1 %970 }
 0x527   :  { %3058 = vmatpush3.msra.mxu1 %v977_v35 }
 0x528   :  { %3059 = vmatprep.subr.mxu1 %v4052_v50 }
 0x529   :  { %3060 = vmatpush3.msra.mxu1 %v975_v34 }
 0x52a   :  { %v1005_v40 = vpop.permute.xlu0 %1004  ;;  %v1039_v41 = vpop.permute.xlu1 %1038 }
 0x52b   :  { %3061 = vmatprep.subr.mxu1 %v1005_v40 }
 0x52c   :  { %3062 = vmatpush3.msra.mxu1 %v973_v37 }
 0x52d   :  { %3063 = vmatprep.subr.mxu1 %v1003_v38 }
 0x52e   :  { %v1041_v42 = vpop.permute.xlu0 %1040  ;;  %3064 = vmatpush3.msra.mxu1 %v971_v39  ;;  %v1035_v27 = vpop.permute.xlu1 %1034 }
 0x52f   :  { %1180 = vmatmul.mubr.f32.vlgmr.msra.gmra.mxu1 %v1042_v36  ;;  %3272 = vmatprep.subr.mxu1 %v1041_v42 }
 0x530   :  { %3273 = vmatpush3.msra.mxu1 %v1041_v42  ;;  %1184 = vmatprep.mubr.f32.mxu1 %v1046_v1 }
 0x531   :  { %3274 = vmatprep.subr.mxu1 %v1039_v41 }
 0x532   :  { %v1037_v46 = vpop.permute.xlu0 %1036  ;;  %3275 = vmatpush3.msra.mxu1 %v1039_v41  ;;  %v1031_v47 = vpop.permute.xlu1 %1030 }
 0x533   :  { %1185 = vmatmul.mubr.f32.gmra.mxu1 %v1045_v44  ;;  %3276 = vmatprep.subr.mxu1 %v1037_v46 }
 0x534   :  { %3277 = vmatpush3.msra.mxu1 %v1037_v46  ;;  %1189 = vmatprep.mubr.f32.mxu1 %v1049_v45 }
 0x535   :  { %3278 = vmatprep.subr.mxu1 %v1035_v27 }
 0x536   :  { %v1033_v43 = vpop.permute.xlu0 %1032  ;;  %3279 = vmatpush3.msra.mxu1 %v1035_v27  ;;  %v1027_v50 = vpop.permute.xlu1 %1026 }
 0x537   :  { %1190 = vmatmul.mubr.f32.gmra.mxu1 %v1048_v48  ;;  %3280 = vmatprep.subr.mxu1 %v1033_v43 }
 0x538   :  { %3281 = vmatpush3.msra.mxu1 %v1033_v43  ;;  %1194 = vmatprep.mubr.f32.mxu1 %v1052_v49 }
 0x539   :  { %3282 = vmatprep.subr.mxu1 %v1031_v47 }
 0x53a   :  { %v1029_v53 = vpop.permute.xlu0 %1028  ;;  %3283 = vmatpush3.msra.mxu1 %v1031_v47  ;;  %v1023_v56 = vpop.permute.xlu1 %1022 }
 0x53b   :  { %1195 = vmatmul.mubr.f32.gmra.mxu1 %v1051_v51  ;;  %3284 = vmatprep.subr.mxu1 %v1029_v53 }
 0x53c   :  { %3285 = vmatpush3.msra.mxu1 %v1029_v53  ;;  %1199 = vmatprep.mubr.f32.mxu1 %v1055_v52  ;;  %v1336_v53 = vld [vmem:[%s5078_s10 + $0x8] sm:$0xff] }
 0x53d   :  { %3286 = vmatprep.subr.mxu1 %v1027_v50  ;;  %2923 = vmatprep.mubr.msk.f32.mxu0 %vm1359_vm4, %v1336_v53 }
 0x53e   :  { %v1025_v57 = vpop.permute.xlu0 %1024  ;;  %3287 = vmatpush3.msra.mxu1 %v1027_v50  ;;  %v1019_v61 = vpop.permute.xlu1 %1018 }
 0x53f   :  { %1200 = vmatmul.mubr.f32.gmra.mxu1 %v1054_v54  ;;  %3288 = vmatprep.subr.mxu1 %v1025_v57  ;;  %v1342_v54 = vld [vmem:[%s5077_s11 + $0x8] sm:$0xff] }
 0x540   :  { %3289 = vmatpush3.msra.mxu1 %v1025_v57  ;;  %1204 = vmatprep.mubr.f32.mxu1 %v1058_v55  ;;  %v1343_v55 = vld [vmem:[%s5077_s11 + $0x10] sm:$0xff] }
 0x541   :  { %3290 = vmatprep.subr.mxu1 %v1023_v56 }
 0x542   :  { %v1021_v60 = vpop.permute.xlu0 %1020  ;;  %3291 = vmatpush3.msra.mxu1 %v1023_v56  ;;  %v1341_v56 = vld [vmem:[%s5077_s11] sm:$0xff] }
 0x543   :  { %1205 = vmatmul.mubr.f32.gmra.mxu1 %v1057_v58  ;;  %3292 = vmatprep.subr.mxu1 %v1021_v60 }
 0x544   :  { %3293 = vmatpush3.msra.mxu1 %v1021_v60  ;;  %3298 = vmatprep.mubr.msk.f32.mxu1 %vm1096_vm3, %v1044_v59 }
 0x545   :  { %3294 = vmatprep.subr.mxu1 %v1019_v61 }
 0x546   :  { %v1017_v62 = vpop.permute.xlu0 %1016  ;;  %3295 = vmatpush3.msra.mxu1 %v1019_v61 }
 0x547   :  { %3296 = vmatprep.subr.mxu1 %v1017_v62 }
 0x548   :  { %3297 = vmatpush3.msra.mxu1 %v1017_v62 }
 0x549   :  { %3299 = vmatmul.mubr.msk.f32.vlgmr.msra.gmra.mxu1 %vm1096_vm3, %v1047_v63 }
 0x54a   :  { %3301 = vmatprep.mubr.msk.f32.mxu1 %vm1096_vm3, %v1050_v0 }
 0x54b   :  { %v1084_v19 = vpop.permute.xlu1 %1083 }
 0x54d   :  { %3302 = vmatmul.mubr.msk.f32.gmra.mxu1 %vm1096_vm3, %v1053_v2 }
 0x54e   :  { %3304 = vmatprep.mubr.msk.f32.mxu1 %vm1096_vm3, %v1056_v3 }
 0x54f   :  { %v1074_v28 = vpop.permute.xlu1 %1073 }
 0x551   :  { %3305 = vmatmul.mubr.msk.f32.gmra.mxu1 %vm1096_vm3, %v1059_v5 }
 0x553   :  { %v1079_v20 = vpop.permute.xlu0 %1078  ;;  %v1094_v36 = vpop.permute.xlu1 %1093 }
 0x557   :  { %v1069_v6 = vpop.permute.xlu0 %1068 }
 0x55b   :  { %v1089_v45 = vpop.permute.xlu0 %1088 }
 0x5ef   :  { %v3065_v8 = vpop.f32.mrf.mxu1 }
 0x5f1   :  { %v3066_v9 = vpop.f32.mrf.mxu1 }
 0x5f2   :  { %v3067_v13 = vadd.f32 %v3066_v9, %v3065_v8  ;;  %v1335_v8 = vld [vmem:[%s5078_s10] sm:$0xff] }
 0x5f3   :  { %v3068_v4 = vpop.f32.mrf.mxu1 }
 0x5f4   :  { %v1182_v35 = vadd.f32 %v3067_v13, %v1069_v6 }
 0x5f5   :  { %v3069_v7 = vpop.f32.mrf.mxu1 }
 0x5f6   :  { %v3070_v25 = vadd.f32 %v3069_v7, %v3068_v4  ;;  %v1338_v4 = vld [vmem:[%s5078_s10 + $0x18] sm:$0xff]  ;;  %v1337_v7 = vld [vmem:[%s5078_s10 + $0x10] sm:$0xff] }
 0x5f7   :  { %v3071_v10 = vpop.f32.mrf.mxu1 }
 0x5f8   :  { %v1187_v32 = vadd.f32 %v3070_v25, %v1074_v28 }
 0x5f9   :  { %v3072_v11 = vpop.f32.mrf.mxu1 }
 0x5fa   :  { %v3073_v26 = vadd.f32 %v3072_v11, %v3071_v10  ;;  %v1340_v10 = vld [vmem:[%s5078_s10 + $0x28] sm:$0xff]  ;;  %v1339_v11 = vld [vmem:[%s5078_s10 + $0x20] sm:$0xff] }
 0x5fb   :  { %v3074_v12 = vpop.f32.mrf.mxu1 }
 0x5fc   :  { %v1192_v34 = vadd.f32 %v3073_v26, %v1079_v20 }
 0x5fd   :  { %v3075_v14 = vpop.f32.mrf.mxu1 }
 0x5fe   :  { %v3076_v23 = vadd.f32 %v3075_v14, %v3074_v12  ;;  %v1451_v12 = vlaneseq }
 0x5ff   :  { %v3077_v16 = vpop.f32.mrf.mxu1 }
 0x600   :  { %v1197_v29 = vadd.f32 %v3076_v23, %v1084_v19 }
 0x601   :  { %v3078_v17 = vpop.f32.mrf.mxu1 }
 0x602   :  { %v3079_v38 = vadd.f32 %v3078_v17, %v3077_v16  ;;  %v1454_v17 = vshrl.u32 %v1451_v12, 7 }
 0x603   :  { %v3080_v18 = vpop.f32.mrf.mxu1 }
 0x604   :  { %v1202_v49 = vadd.f32 %v3079_v38, %v1089_v45  ;;  %v1455_v13 = vsub.s32 0, %v1454_v17 }
 0x605   :  { %v3081_v21 = vpop.f32.mrf.mxu1 }
 0x606   :  { %v3082_v31 = vadd.f32 %v3081_v21, %v3080_v18 }
 0x608   :  { %v1207_v44 = vadd.f32 %v3082_v31, %v1094_v36  ;;  %v1450_v31 = vld [vmem:[%s5079_s1 + $0x8] sm:$0xf] }
 0x609   :  { %v3300_v24 = vpop.f32.mrf.mxu1 }
 0x60a   :  { %v1282_v39 = vadd.f32 %v3300_v24, %v1187_v32  ;;  %v1460_v24 = vsub.s32 4, %v1454_v17  ;;  %v1449_v32 = vld [vmem:[%s5079_s1] sm:$0xff] }
 0x60b   :  { %v1276_v15 = vpop.f32.mrf.mxu1 }
 0x60c   :  { %v1277_v42 = vadd.f32 %v1276_v15, %v1182_v35  ;;  %v1306_v47 = vmax.f32 %v1282_v39, 0.0 }
 0x60d   :  { %v3303_v30 = vpop.f32.mrf.mxu1 }
 0x60e   :  { %v1292_v33 = vadd.f32 %v3303_v30, %v1197_v29  ;;  %v1305_v43 = vmax.f32 %v1277_v42, 0.0 }
 0x60f   :  { %v1286_v37 = vpop.f32.mrf.mxu1 }
 0x610   :  { %v1308_v40 = vmax.f32 %v1292_v33, 0.0  ;;  %v1287_v41 = vadd.f32 %v1286_v37, %v1192_v34 }
 0x611   :  { %v3306_v1 = vpop.f32.mrf.mxu1 }
 0x612   :  { %v1307_v27 = vmax.f32 %v1287_v41, 0.0  ;;  %1329 = vrot.lane.b32.xlu1 %v1308_v40, %s5117_s28  ;;  %v1302_v48 = vadd.f32 %v3306_v1, %v1207_v44  ;;  %v1452_v44 = vand.u32 127, %v1451_v12 }
 0x613   :  { %v1296_v46 = vpop.f32.mrf.mxu1 }
 0x614   :  { %1327 = vrot.lane.b32.xlu0 %v1307_v27, %s5117_s28  ;;  %v1297_v50 = vadd.f32 %v1296_v46, %v1202_v49  ;;  %v1310_v51 = vmax.f32 %v1302_v48, 0.0  ;;  %vm1463_vm6 = vcmp.eq.s32.totalorder %v1452_v44, 127  ;;  %v1754_v44 = vld [vmem:[%s5083_s15 + $0x10] sm:$0xff] }
 0x616   :  { %1325 = vrot.lane.b32.xlu1 %v1306_v47, %s5117_s28  ;;  %v1309_v52 = vmax.f32 %v1297_v50, 0.0 }
 0x618   :  { %1323 = vrot.lane.b32.xlu0 %v1305_v43, %s5117_s28 }
 0x61a   :  { %1321 = vrot.lane.b32.xlu1 %v1310_v51, %s3380_s6 }
 0x61c   :  { %1319 = vrot.lane.b32.xlu0 %v1309_v52, %s3380_s6 }
 0x61e   :  { %1317 = vrot.lane.b32.xlu1 %v1308_v40, %s3380_s6 }
 0x620   :  { %1315 = vrot.lane.b32.xlu0 %v1307_v27, %s3380_s6 }
 0x622   :  { %1313 = vrot.lane.b32.xlu1 %v1306_v47, %s3380_s6 }
 0x624   :  { %1311 = vrot.lane.b32.xlu0 %v1305_v43, %s3380_s6 }
 0x626   :  { %1333 = vrot.lane.b32.xlu1 %v1310_v51, %s5117_s28 }
 0x628   :  { %1331 = vrot.lane.b32.xlu0 %v1309_v52, %s5117_s28 }
 0x62a   :  { %1351 = vperm.xlu1 %3378, %v1342_v54  }
 0x62c   :  { %1356 = vperm.xlu0 %3377, %v1343_v55  }
 0x62e   :  { %1346 = vperm.xlu1 %3378, %v1341_v56  }
 0x684   :  { %v1330_v57 = vpop.permute.xlu1 %1329 }
 0x685   :  { %1370 = vmatpush1.msra.mxu0 %v1330_v57  ;;  %v1536_v57 = vld [vmem:[%s5080_s13 + $0x28] sm:$0xff] }
 0x686   :  { %v1328_v58 = vpop.permute.xlu0 %1327  ;;  %1371 = vmatprep.subr.mxu0 %v3382_v22 }
 0x687   :  { %1372 = vmatpush1.msra.mxu0 %v1328_v58  ;;  %v1525_v58 = vld [vmem:[%s5081_s12] sm:$0xff] }
 0x688   :  { %1373 = vmatprep.subr.mxu0 %v3382_v22  ;;  %v1326_v59 = vpop.permute.xlu1 %1325  ;;  %3325 = vmatprep.mubr.msk.f32.mxu1 %vm128_vm0, %v1525_v58 }
 0x689   :  { %1374 = vmatpush1.msra.mxu0 %v1326_v59  ;;  %v1534_v59 = vld [vmem:[%s5080_s13 + $0x18] sm:$0xff] }
 0x68a   :  { %v1324_v60 = vpop.permute.xlu0 %1323  ;;  %1375 = vmatprep.subr.mxu0 %v3382_v22 }
 0x68b   :  { %1376 = vmatpush1.msra.mxu0 %v1324_v60  ;;  %v1532_v60 = vld [vmem:[%s5080_s13 + $0x8] sm:$0xff] }
 0x68c   :  { %1377 = vmatprep.subr.mxu0 %v3382_v22  ;;  %v1322_v61 = vpop.permute.xlu1 %1321 }
 0x68d   :  { %1378 = vmatpush1.msra.mxu0 %v1310_v51 }
 0x68e   :  { %1379 = vmatprep.subr.mxu0 %v3382_v22  ;;  %v1320_v62 = vpop.permute.xlu0 %1319 }
 0x68f   :  { %1380 = vmatpush1.msra.mxu0 %v1309_v52 }
 0x690   :  { %1381 = vmatprep.subr.mxu0 %v3382_v22  ;;  %v1318_v63 = vpop.permute.xlu1 %1317 }
 0x691   :  { %1382 = vmatpush1.msra.mxu0 %v1308_v40 }
 0x692   :  { %1383 = vmatprep.subr.mxu0 %v3382_v22  ;;  %v1316_v0 = vpop.permute.xlu0 %1315 }
 0x693   :  { %1384 = vmatpush1.msra.mxu0 %v1307_v27 }
 0x694   :  { %1385 = vmatprep.subr.mxu0 %v3382_v22  ;;  %v1314_v2 = vpop.permute.xlu1 %1313 }
 0x695   :  { %1386 = vmatpush1.msra.mxu0 %v1306_v47 }
 0x696   :  { %1387 = vmatprep.subr.mxu0 %v3382_v22  ;;  %v1312_v3 = vpop.permute.xlu0 %1311 }
 0x697   :  { %1388 = vmatpush1.msra.mxu0 %v1305_v43 }
 0x698   :  { %1389 = vmatprep.subr.mxu0 %v3382_v22  ;;  %v1334_v5 = vpop.permute.xlu1 %1333 }
 0x699   :  { %1390 = vmatpush1.msra.mxu0 %v1322_v61  ;;  %v1535_v61 = vld [vmem:[%s5080_s13 + $0x20] sm:$0xff] }
 0x69a   :  { %1391 = vmatprep.subr.mxu0 %v3382_v22  ;;  %v1332_v9 = vpop.permute.xlu0 %1331 }
 0x69b   :  { %1392 = vmatpush1.msra.mxu0 %v1320_v62  ;;  %v1533_v62 = vld [vmem:[%s5080_s13 + $0x10] sm:$0xff] }
 0x69c   :  { %1393 = vmatprep.subr.mxu0 %v3382_v22 }
 0x69d   :  { %1394 = vmatpush1.msra.mxu0 %v1318_v63  ;;  %v1531_v63 = vld [vmem:[%s5080_s13] sm:$0xff] }
 0x69e   :  { %1395 = vmatprep.subr.mxu0 %v3382_v22 }
 0x69f   :  { %1396 = vmatpush1.msra.mxu0 %v1316_v0 }
 0x6a0   :  { %1397 = vmatprep.subr.mxu0 %v3382_v22 }
 0x6a1   :  { %1398 = vmatpush1.msra.mxu0 %v1314_v2 }
 0x6a2   :  { %1399 = vmatprep.subr.mxu0 %v3382_v22 }
 0x6a3   :  { %1400 = vmatpush1.msra.mxu0 %v1312_v3 }
 0x6a4   :  { %1429 = vmatprep.subr.mxu0 %v3382_v22 }
 0x6a5   :  { %1430 = vmatpush2.msra.mxu0 %v1334_v5  ;;  %v1352_v14 = vpop.permute.xlu1 %1351 }
 0x6a6   :  { %1431 = vmatprep.subr.mxu0 %v3382_v22 }
 0x6a7   :  { %1432 = vmatpush2.msra.mxu0 %v1332_v9  ;;  %v1357_v26 = vpop.permute.xlu0 %1356  ;;  %v1526_v9 = vld [vmem:[%s5081_s12 + $0x8] sm:$0xff] }
 0x6a8   :  { %1434 = vmatmul.mubr.f32.vlgmr.msra.gmra.mxu0 %v1335_v8 }
 0x6a9   :  { %2924 = vmatprep.mubr.msk.f32.mxu0 %vm1359_vm4, %v1338_v4  ;;  %v1347_v20 = vpop.permute.xlu1 %1346  ;;  %v1527_v4 = vld [vmem:[%s5081_s12 + $0x10] sm:$0xff] }
 0x6ac   :  { %1439 = vmatmul.mubr.f32.gmra.mxu0 %v1337_v7  ;;  %v1528_v7 = vld [vmem:[%s5081_s12 + $0x18] sm:$0xff] }
 0x6ad   :  { %2925 = vmatprep.mubr.msk.f32.mxu0 %vm1359_vm4, %v1340_v10  ;;  %v1529_v10 = vld [vmem:[%s5081_s12 + $0x20] sm:$0xff] }
 0x6b0   :  { %1444 = vmatmul.mubr.f32.gmra.mxu0 %v1339_v11  ;;  %v1530_v11 = vld [vmem:[%s5081_s12 + $0x28] sm:$0xff]  ;;  %s5120_s12 = smov 125  }
 0x768   :  { %v1435_v16 = vpop.f32.mrf.mxu0 }
 0x769   :  { %v4272_v23 = vadd.f32 %v1435_v16, %v1347_v20 }
 0x76a   :  { %v1437_v18 = vpop.f32.mrf.mxu0 }
 0x76b   :  { %v1461_v6 = vrot.slane %v4272_v23, %v1460_v24  ;;  %v1456_v41 = vrot.slane %v4272_v23, %v1455_v13 }
 0x76c   :  { %v1440_v19 = vpop.f32.mrf.mxu0 }
 0x76d   :  { %v4270_v21 = vadd.f32 %v1440_v19, %v1352_v14  ;;  %v1462_v38 = vmul.f32 %v1461_v6, %v1449_v32  ;;  %v1457_v42 = vmul.f32 %v1456_v41, %v1449_v32  ;;  %v1735_v41 = vld [vmem:[%s5082_s14 + $0x8] sm:$0xff] }
 0x76e   :  { %v1442_v25 = vpop.f32.mrf.mxu0 }
 0x76f   :  { %1466 = vrot.lane.b32.xlu1 %v4270_v21, %s5117_s28  ;;  %v1480_v15 = vrot.slane %v4270_v21, 4  ;;  %v1501_v1 = vrot.slane %v1462_v38, 4 }
 0x770   :  { %v1445_v28 = vpop.f32.mrf.mxu0 }
 0x771   :  { %v4277_v29 = vadd.f32 %v1445_v28, %v1357_v26  ;;  %v1510_v27 = vsel %vm1509_vm5, %v1457_v42, %v1501_v1  ;;  %v1757_v1 = vld [vmem:[%s5083_s15 + $0x28] sm:$0xff]  ;;  %v1756_v42 = vld [vmem:[%s5083_s15 + $0x20] sm:$0xff] }
 0x772   :  { %v1447_v30 = vpop.f32.mrf.mxu0 }
 0x773   :  { %1464 = vrot.lane.b32.xlu0 %v4277_v29, %s5117_s28  ;;  %1482 = vrot.lane.b32.xlu1 %v1480_v15, %s5117_s28  ;;  %v1493_v33 = vrot.slane %v4277_v29, %v1455_v13  ;;  %v1498_v34 = vrot.slane %v4277_v29, %v1460_v24  ;;  %v1475_v35 = vrot.slane %v4277_v29, 4 }
 0x775   :  { %v1499_v37 = vmul.f32 %v1498_v34, %v1450_v31  ;;  %v1494_v39 = vmul.f32 %v1493_v33, %v1450_v31 }
 0x777   :  { %1477 = vrot.lane.b32.xlu0 %v1475_v35, %s5117_s28  ;;  %v1507_v40 = vrot.slane %v1499_v37, 4 }
 0x779   :  { %v1512_v36 = vsel %vm1509_vm5, %v1494_v39, %v1507_v40 }
 0x77b   :  { %1523 = vrot.lane.b32.xlu0 %v1512_v36, %s5117_s28 }
 0x77f   :  { %1519 = vrot.lane.b32.xlu0 %v1510_v27, %s5117_s28 }
 0x7e1   :  { %v1467_v45 = vpop.permute.xlu1 %1466 }
 0x7e5   :  { %v1465_v46 = vpop.permute.xlu0 %1464  ;;  %v1483_v43 = vpop.permute.xlu1 %1482 }
 0x7e6   :  { %v1468_v47 = vsel %vm1463_vm6, %v1465_v46, %v1467_v45  ;;  %v1760_v45 = vld [vmem:[%s5083_s15 + $0x40] sm:$0xff]  ;;  %v1753_v46 = vld [vmem:[%s5083_s15 + $0x8] sm:$0xff] }
 0x7e7   :  { %v1472_v48 = vrot.slane %v1468_v47, %v1455_v13  ;;  %v1759_v47 = vld [vmem:[%s5083_s15 + $0x38] sm:$0xff] }
 0x7e9   :  { %v1473_v49 = vmul.f32 %v1472_v48, %v1449_v32  ;;  %v1478_v50 = vpop.permute.xlu0 %1477  ;;  %v1752_v48 = vld [vmem:[%s5083_s15] sm:$0xff] }
 0x7ea   :  { %v1484_v51 = vsel %vm1463_vm6, %v1478_v50, %v1483_v43 }
 0x7eb   :  { %v1488_v52 = vrot.slane %v1484_v51, %v1455_v13  ;;  %v1504_v53 = vrot.slane %v1473_v49, 4 }
 0x7ed   :  { %v1489_v54 = vmul.f32 %v1488_v52, %v1449_v32  ;;  %v1524_v55 = vpop.permute.xlu0 %1523 }
 0x7ee   :  { %3307 = vmatprep.subr.mxu1 %v1524_v55 }
 0x7ef   :  { %3308 = vmatpush3.msra.mxu1 %v1524_v55  ;;  %v1511_v56 = vsel %vm1509_vm5, %v1504_v53, %v1489_v54 }
 0x7f0   :  { %1515 = vrot.lane.b32.xlu0 %v1511_v56, %s3380_s6  ;;  %1521 = vrot.lane.b32.xlu1 %v1511_v56, %s5117_s28 }
 0x7f1   :  { %v1520_v2 = vpop.permute.xlu0 %1519 }
 0x7f4   :  { %1564 = vperm.xlu0 %3377, %v1536_v57   ;;  %1517 = vrot.lane.b32.xlu1 %v1512_v36, %s3380_s6 }
 0x7f8   :  { %1554 = vperm.xlu0 %3377, %v1534_v59   ;;  %1513 = vrot.lane.b32.xlu1 %v1510_v27, %s3380_s6 }
 0x7fc   :  { %1544 = vperm.xlu0 %3377, %v1532_v60   ;;  %1559 = vperm.xlu1 %3378, %v1535_v61  }
 0x800   :  { %1549 = vperm.xlu1 %3378, %v1533_v62  }
 0x804   :  { %1539 = vperm.xlu1 %3378, %v1531_v63  }
 0x862   :  { %v1522_v0 = vpop.permute.xlu1 %1521  ;;  %v1516_v5 = vpop.permute.xlu0 %1515 }
 0x863   :  { %3309 = vmatprep.subr.mxu1 %v1522_v0 }
 0x864   :  { %3310 = vmatpush3.msra.mxu1 %v1522_v0 }
 0x865   :  { %3311 = vmatprep.subr.mxu1 %v1520_v2 }
 0x866   :  { %3312 = vmatpush3.msra.mxu1 %v1520_v2  ;;  %v1518_v3 = vpop.permute.xlu1 %1517 }
 0x867   :  { %3313 = vmatprep.subr.mxu1 %v1512_v36 }
 0x868   :  { %3314 = vmatpush3.msra.mxu1 %v1512_v36  ;;  %v1758_v36 = vld [vmem:[%s5083_s15 + $0x30] sm:$0xff] }
 0x869   :  { %3315 = vmatprep.subr.mxu1 %v1511_v56 }
 0x86a   :  { %3316 = vmatpush3.msra.mxu1 %v1511_v56  ;;  %v1514_v8 = vpop.permute.xlu1 %1513 }
 0x86b   :  { %3317 = vmatprep.subr.mxu1 %v1510_v27 }
 0x86c   :  { %3318 = vmatpush3.msra.mxu1 %v1510_v27  ;;  %v1755_v27 = vld [vmem:[%s5083_s15 + $0x18] sm:$0xff] }
 0x86d   :  { %3319 = vmatprep.subr.mxu1 %v1518_v3 }
 0x86e   :  { %3320 = vmatpush3.msra.mxu1 %v1518_v3 }
 0x86f   :  { %3321 = vmatprep.subr.mxu1 %v1516_v5  ;;  %v1565_v12 = vpop.permute.xlu0 %1564 }
 0x870   :  { %3322 = vmatpush3.msra.mxu1 %v1516_v5 }
 0x871   :  { %3323 = vmatprep.subr.mxu1 %v1514_v8 }
 0x872   :  { %3324 = vmatpush3.msra.mxu1 %v1514_v8 }
 0x873   :  { %3326 = vmatmul.mubr.msk.f32.vlgmr.msra.gmra.mxu1 %vm128_vm0, %v1526_v9  ;;  %1833 = vmatprep.subr.mxu1 %v3382_v22  ;;  %v1555_v16 = vpop.permute.xlu0 %1554 }
 0x874   :  { %3328 = vmatprep.mubr.msk.f32.mxu1 %vm128_vm0, %v1527_v4 }
 0x877   :  { %3329 = vmatmul.mubr.msk.f32.gmra.mxu1 %vm128_vm0, %v1528_v7  ;;  %v1560_v14 = vpop.permute.xlu1 %1559  ;;  %v1545_v25 = vpop.permute.xlu0 %1544 }
 0x878   :  { %3331 = vmatprep.mubr.msk.f32.mxu1 %vm128_vm0, %v1529_v10  ;;  %v1734_v10 = vld [vmem:[%s5082_s14] sm:$0xff] }
 0x87b   :  { %3332 = vmatmul.mubr.msk.f32.gmra.mxu1 %vm128_vm0, %v1530_v11  ;;  %v1550_v18 = vpop.permute.xlu1 %1549  ;;  %v1737_v11 = vld [vmem:[%s5082_s14 + $0x18] sm:$0xff] }
 0x87c   :  { %2932 = vmatprep.mubr.msk.f32.mxu1 %vm368_vm1, %v1735_v41 }
 0x87f   :  { %v1540_v6 = vpop.permute.xlu1 %1539 }
 0x933   :  { %v3327_v17 = vpop.f32.mrf.mxu1 }
 0x934   :  { %v1657_v28 = vadd.f32 %v3327_v17, %v1545_v25  ;;  %v1741_v17 = vld [vmem:[%s5082_s14 + $0x38] sm:$0xff]  ;;  %v1744_v25 = vld [vmem:[%s5082_s14 + $0x50] sm:$0xff] }
 0x935   :  { %v1651_v19 = vpop.f32.mrf.mxu1 }
 0x936   :  { %v1652_v31 = vadd.f32 %v1651_v19, %v1540_v6  ;;  %v1681_v35 = vmax.f32 %v1657_v28, 0.0  ;;  %v1743_v19 = vld [vmem:[%s5082_s14 + $0x48] sm:$0xff]  ;;  %v1746_v28 = vld [vmem:[%s5082_s14 + $0x60] sm:$0xff] }
 0x937   :  { %v3330_v20 = vpop.f32.mrf.mxu1  ;;  %v1751_v6 = vld [vmem:[%s5082_s14 + $0x88] sm:$0xff] }
 0x938   :  { %v1667_v24 = vadd.f32 %v3330_v20, %v1555_v16  ;;  %v1680_v39 = vmax.f32 %v1652_v31, 0.0  ;;  %v1738_v16 = vld [vmem:[%s5082_s14 + $0x20] sm:$0xff] }
 0x939   :  { %v1661_v26 = vpop.f32.mrf.mxu1  ;;  %v1742_v20 = vld [vmem:[%s5082_s14 + $0x40] sm:$0xff] }
 0x93a   :  { %v1683_v13 = vmax.f32 %v1667_v24, 0.0  ;;  %v1662_v15 = vadd.f32 %v1661_v26, %v1550_v18  ;;  %v1740_v18 = vld [vmem:[%s5082_s14 + $0x30] sm:$0xff]  ;;  %v1745_v24 = vld [vmem:[%s5082_s14 + $0x58] sm:$0xff]  ;;  %v1747_v26 = vld [vmem:[%s5082_s14 + $0x68] sm:$0xff] }
 0x93b   :  { %v3333_v30 = vpop.f32.mrf.mxu1 }
 0x93c   :  { %v1682_v32 = vmax.f32 %v1662_v15, 0.0  ;;  %v1677_v33 = vadd.f32 %v3333_v30, %v1565_v12  ;;  %1834 = vmatpush1.msra.mxu1 %v1683_v13  ;;  %v1736_v12 = vld [vmem:[%s5082_s14 + $0x10] sm:$0xff]  ;;  %v1750_v30 = vld [vmem:[%s5082_s14 + $0x80] sm:$0xff] }
 0x93d   :  { %v1671_v34 = vpop.f32.mrf.mxu1  ;;  %1835 = vmatprep.subr.mxu1 %v3382_v22  ;;  %v1748_v15 = vld [vmem:[%s5082_s14 + $0x70] sm:$0xff] }
 0x93e   :  { %v4347_v37 = vmax.f32 %v1677_v33, 0.0  ;;  %v1672_v38 = vadd.f32 %v1671_v34, %v1560_v14  ;;  %1836 = vmatpush1.msra.mxu1 %v1682_v32  ;;  %v1739_v14 = vld [vmem:[%s5082_s14 + $0x28] sm:$0xff] }
 0x93f   :  { %1837 = vmatprep.subr.mxu1 %v3382_v22 }
 0x940   :  { %v4350_v40 = vmax.f32 %v1672_v38, 0.0  ;;  %1708 = vrot.lane.b32.xlu0 %v4347_v37, %s3380_s6  ;;  %1838 = vmatpush1.msra.mxu1 %v1681_v35 }
 0x941   :  { %1839 = vmatprep.subr.mxu1 %v3382_v22 }
 0x942   :  { %1706 = vrot.lane.b32.xlu1 %v4350_v40, %s3380_s6  ;;  %1840 = vmatpush1.msra.mxu1 %v1680_v39 }
 0x943   :  { %1841 = vmatprep.subr.mxu1 %v3382_v22 }
 0x944   :  { %1704 = vrot.lane.b32.xlu0 %v1683_v13, %s3380_s6 }
 0x946   :  { %1702 = vrot.lane.b32.xlu1 %v1682_v32, %s3380_s6 }
 0x948   :  { %1700 = vrot.lane.b32.xlu0 %v1681_v35, %s3380_s6 }
 0x94a   :  { %1698 = vrot.lane.b32.xlu1 %v1680_v39, %s3380_s6 }
 0x94c   :  { %1696 = vrot.lane.b32.xlu0 %v4347_v37, %s3383_s25 }
 0x94e   :  { %1694 = vrot.lane.b32.xlu1 %v4350_v40, %s3383_s25 }
 0x950   :  { %1692 = vrot.lane.b32.xlu0 %v1683_v13, %s3383_s25 }
 0x952   :  { %1690 = vrot.lane.b32.xlu1 %v1682_v32, %s3383_s25 }
 0x954   :  { %1688 = vrot.lane.b32.xlu0 %v1681_v35, %s3383_s25 }
 0x956   :  { %1686 = vrot.lane.b32.xlu1 %v1680_v39, %s3383_s25 }
 0x958   :  { %1732 = vrot.lane.b32.xlu0 %v4347_v37, %s3384_s7 }
 0x95a   :  { %1730 = vrot.lane.b32.xlu1 %v4350_v40, %s3384_s7 }
 0x95c   :  { %1728 = vrot.lane.b32.xlu0 %v1683_v13, %s3384_s7 }
 0x95e   :  { %1726 = vrot.lane.b32.xlu1 %v1682_v32, %s3384_s7 }
 0x960   :  { %1724 = vrot.lane.b32.xlu0 %v1681_v35, %s3384_s7 }
 0x962   :  { %1722 = vrot.lane.b32.xlu1 %v1680_v39, %s3384_s7 }
 0x964   :  { %1720 = vrot.lane.b32.xlu0 %v4347_v37, %s5117_s28 }
 0x966   :  { %1718 = vrot.lane.b32.xlu1 %v4350_v40, %s5117_s28 }
 0x968   :  { %1716 = vrot.lane.b32.xlu0 %v1683_v13, %s5117_s28  ;;  %v1749_v13 = vld [vmem:[%s5082_s14 + $0x78] sm:$0xff]  ;;  %s5119_s14 = smov 3  }
 0x96a   :  { %1714 = vrot.lane.b32.xlu1 %v1682_v32, %s5117_s28 }
 0x96c   :  { %1712 = vrot.lane.b32.xlu0 %v1681_v35, %s5117_s28 }
 0x96e   :  { %1710 = vrot.lane.b32.xlu1 %v1680_v39, %s5117_s28 }
 0x970   :  { %1793 = vperm.xlu0 %3377, %v1758_v36  }
 0x972   :  { %1788 = vperm.xlu1 %3378, %v1757_v1  }
 0x974   :  { %1783 = vperm.xlu0 %3377, %v1756_v42  }
 0x976   :  { %1778 = vperm.xlu1 %3378, %v1755_v27  }
 0x978   :  { %1773 = vperm.xlu0 %3377, %v1754_v44  }
 0x97a   :  { %1803 = vperm.xlu1 %3378, %v1760_v45  }
 0x97c   :  { %1768 = vperm.xlu0 %3377, %v1753_v46  }
 0x97e   :  { %1798 = vperm.xlu1 %3378, %v1759_v47  }
 0x980   :  { %1763 = vperm.xlu0 %3377, %v1752_v48  }
 0x9b2   :  { %v1709_v49 = vpop.permute.xlu0 %1708 }
 0x9b3   :  { %1842 = vmatpush1.msra.mxu1 %v1709_v49 }
 0x9b4   :  { %1843 = vmatprep.subr.mxu1 %v3382_v22  ;;  %v1707_v43 = vpop.permute.xlu1 %1706 }
 0x9b5   :  { %1844 = vmatpush1.msra.mxu1 %v1707_v43 }
 0x9b6   :  { %v1705_v50 = vpop.permute.xlu0 %1704  ;;  %1845 = vmatprep.subr.mxu1 %v3382_v22 }
 0x9b7   :  { %1846 = vmatpush1.msra.mxu1 %v1705_v50 }
 0x9b8   :  { %1847 = vmatprep.subr.mxu1 %v3382_v22  ;;  %v1703_v51 = vpop.permute.xlu1 %1702 }
 0x9b9   :  { %1848 = vmatpush1.msra.mxu1 %v1703_v51 }
 0x9ba   :  { %v1701_v52 = vpop.permute.xlu0 %1700  ;;  %1849 = vmatprep.subr.mxu1 %v3382_v22 }
 0x9bb   :  { %1850 = vmatpush1.msra.mxu1 %v1701_v52 }
 0x9bc   :  { %1851 = vmatprep.subr.mxu1 %v3382_v22  ;;  %v1699_v53 = vpop.permute.xlu1 %1698 }
 0x9bd   :  { %1852 = vmatpush1.msra.mxu1 %v1699_v53 }
 0x9be   :  { %v1697_v54 = vpop.permute.xlu0 %1696  ;;  %1853 = vmatprep.subr.mxu1 %v3382_v22 }
 0x9bf   :  { %1854 = vmatpush1.msra.mxu1 %v1697_v54 }
 0x9c0   :  { %1855 = vmatprep.subr.mxu1 %v3382_v22  ;;  %v1695_v55 = vpop.permute.xlu1 %1694 }
 0x9c1   :  { %1856 = vmatpush1.msra.mxu1 %v1695_v55 }
 0x9c2   :  { %v1693_v56 = vpop.permute.xlu0 %1692  ;;  %1857 = vmatprep.subr.mxu1 %v3382_v22 }
 0x9c3   :  { %1858 = vmatpush1.msra.mxu1 %v1693_v56 }
 0x9c4   :  { %1859 = vmatprep.subr.mxu1 %v3382_v22  ;;  %v1691_v57 = vpop.permute.xlu1 %1690 }
 0x9c5   :  { %1860 = vmatpush1.msra.mxu1 %v1691_v57 }
 0x9c6   :  { %v1689_v58 = vpop.permute.xlu0 %1688  ;;  %1861 = vmatprep.subr.mxu1 %v3382_v22 }
 0x9c7   :  { %1862 = vmatpush1.msra.mxu1 %v1689_v58 }
 0x9c8   :  { %1863 = vmatprep.subr.mxu1 %v3382_v22  ;;  %v1687_v59 = vpop.permute.xlu1 %1686 }
 0x9c9   :  { %1864 = vmatpush1.msra.mxu1 %v1687_v59 }
 0x9ca   :  { %v1733_v60 = vpop.permute.xlu0 %1732  ;;  %1869 = vmatprep.subr.mxu1 %v3382_v22 }
 0x9cb   :  { %1870 = vmatpush2.msra.mxu1 %v1733_v60 }
 0x9cc   :  { %1871 = vmatprep.subr.mxu1 %v3382_v22  ;;  %v1731_v61 = vpop.permute.xlu1 %1730 }
 0x9cd   :  { %1872 = vmatpush2.msra.mxu1 %v1731_v61 }
 0x9ce   :  { %v1729_v62 = vpop.permute.xlu0 %1728  ;;  %1873 = vmatprep.subr.mxu1 %v3382_v22 }
 0x9cf   :  { %1874 = vmatpush2.msra.mxu1 %v1729_v62 }
 0x9d0   :  { %1875 = vmatprep.subr.mxu1 %v3382_v22  ;;  %v1727_v63 = vpop.permute.xlu1 %1726 }
 0x9d1   :  { %1876 = vmatpush2.msra.mxu1 %v1727_v63 }
 0x9d2   :  { %v1725_v0 = vpop.permute.xlu0 %1724  ;;  %1877 = vmatprep.subr.mxu1 %v3382_v22 }
 0x9d3   :  { %1878 = vmatpush2.msra.mxu1 %v1725_v0 }
 0x9d4   :  { %1879 = vmatprep.subr.mxu1 %v3382_v22  ;;  %v1723_v2 = vpop.permute.xlu1 %1722 }
 0x9d5   :  { %1880 = vmatpush2.msra.mxu1 %v1723_v2 }
 0x9d6   :  { %v1721_v3 = vpop.permute.xlu0 %1720  ;;  %1881 = vmatprep.subr.mxu1 %v3382_v22 }
 0x9d7   :  { %1882 = vmatpush2.msra.mxu1 %v1721_v3 }
 0x9d8   :  { %1883 = vmatprep.subr.mxu1 %v3382_v22  ;;  %v1719_v5 = vpop.permute.xlu1 %1718 }
 0x9d9   :  { %1884 = vmatpush2.msra.mxu1 %v1719_v5 }
 0x9da   :  { %v1717_v8 = vpop.permute.xlu0 %1716  ;;  %1885 = vmatprep.subr.mxu1 %v3382_v22 }
 0x9db   :  { %1886 = vmatpush2.msra.mxu1 %v1717_v8 }
 0x9dc   :  { %1887 = vmatprep.subr.mxu1 %v3382_v22  ;;  %v1715_v9 = vpop.permute.xlu1 %1714 }
 0x9dd   :  { %1888 = vmatpush2.msra.mxu1 %v1715_v9 }
 0x9de   :  { %v1713_v4 = vpop.permute.xlu0 %1712  ;;  %1889 = vmatprep.subr.mxu1 %v3382_v22 }
 0x9df   :  { %1890 = vmatpush2.msra.mxu1 %v1713_v4 }
 0x9e0   :  { %1891 = vmatprep.subr.mxu1 %v3382_v22  ;;  %v1711_v7 = vpop.permute.xlu1 %1710 }
 0x9e1   :  { %1892 = vmatpush2.msra.mxu1 %v1711_v7 }
 0x9e2   :  { %1893 = vmatprep.subr.mxu1 %v3382_v22 }
 0x9e3   :  { %1894 = vmatpush2.msra.mxu1 %v4347_v37 }
 0x9e4   :  { %1895 = vmatprep.subr.mxu1 %v3382_v22 }
 0x9e5   :  { %1896 = vmatpush2.msra.mxu1 %v4350_v40 }
 0x9e6   :  { %1898 = vmatmul.mubr.f32.vlgmr.msra.gmra.mxu1 %v1734_v10 }
 0x9e7   :  { %2933 = vmatprep.mubr.msk.f32.mxu1 %vm368_vm1, %v1737_v11 }
 0x9ea   :  { %1903 = vmatmul.mubr.f32.gmra.mxu1 %v1736_v12  ;;  %v2061_v12 = vld [vmem:[%s5084_s16 + $0x8] sm:$0xff] }
 0x9eb   :  { %2934 = vmatprep.mubr.msk.f32.mxu1 %vm368_vm1, %v1739_v14  ;;  %v1794_v31 = vpop.permute.xlu0 %1793  ;;  %2241 = vmatprep.mubr.f32.mxu0 %v2061_v12  ;;  %v2100_v14 = vld [vmem:[%s5085_s17 + $0x20] sm:$0xff] }
 0x9ed   :  { %v1789_v1 = vpop.permute.xlu1 %1788 }
 0x9ee   :  { %1908 = vmatmul.mubr.f32.gmra.mxu1 %v1738_v16  ;;  %v2099_v16 = vld [vmem:[%s5085_s17 + $0x18] sm:$0xff] }
 0x9ef   :  { %2935 = vmatprep.mubr.msk.f32.mxu1 %vm368_vm1, %v1741_v17  ;;  %v1784_v32 = vpop.permute.xlu0 %1783 }
 0x9f1   :  { %v1779_v48 = vpop.permute.xlu1 %1778 }
 0x9f2   :  { %1913 = vmatmul.mubr.f32.gmra.mxu1 %v1740_v18  ;;  %v2098_v18 = vld [vmem:[%s5085_s17 + $0x10] sm:$0xff] }
 0x9f3   :  { %2936 = vmatprep.mubr.msk.f32.mxu1 %vm368_vm1, %v1743_v19  ;;  %v1774_v33 = vpop.permute.xlu0 %1773  ;;  %v2102_v19 = vld [vmem:[%s5085_s17 + $0x30] sm:$0xff] }
 0x9f5   :  { %v1804_v60 = vpop.permute.xlu1 %1803 }
 0x9f6   :  { %1918 = vmatmul.mubr.f32.gmra.mxu1 %v1742_v20 }
 0x9f7   :  { %2937 = vmatprep.mubr.msk.f32.mxu1 %vm368_vm1, %v1745_v24  ;;  %v1769_v34 = vpop.permute.xlu0 %1768  ;;  %v2096_v24 = vld [vmem:[%s5085_s17] sm:$0xff] }
 0x9f9   :  { %v1799_v3 = vpop.permute.xlu1 %1798 }
 0x9fa   :  { %1923 = vmatmul.mubr.f32.gmra.mxu1 %v1744_v25  ;;  %v2101_v25 = vld [vmem:[%s5085_s17 + $0x28] sm:$0xff] }
 0x9fb   :  { %2938 = vmatprep.mubr.msk.f32.mxu1 %vm368_vm1, %v1747_v26  ;;  %v1764_v35 = vpop.permute.xlu0 %1763  ;;  %v2103_v26 = vld [vmem:[%s5085_s17 + $0x38] sm:$0xff] }
 0x9fe   :  { %1928 = vmatmul.mubr.f32.gmra.mxu1 %v1746_v28 }
 0x9ff   :  { %2939 = vmatprep.mubr.msk.f32.mxu1 %vm368_vm1, %v1749_v13 }
 0xa02   :  { %1933 = vmatmul.mubr.f32.gmra.mxu1 %v1748_v15  ;;  %v2097_v15 = vld [vmem:[%s5085_s17 + $0x8] sm:$0xff] }
 0xa03   :  { %2940 = vmatprep.mubr.msk.f32.mxu1 %vm368_vm1, %v1751_v6 }
 0xa06   :  { %1938 = vmatmul.mubr.f32.gmra.mxu1 %v1750_v30  ;;  %v2104_v30 = vld [vmem:[%s5085_s17 + $0x40] sm:$0xff] }
 0xaa6   :  { %v1899_v37 = vpop.f32.mrf.mxu1 }
 0xaa7   :  { %v1900_v38 = vadd.f32 %v1899_v37, %v1764_v35 }
 0xaa8   :  { %v1901_v39 = vpop.f32.mrf.mxu1 }
 0xaa9   :  { %v4503_v40 = vmax.f32 %v1900_v38, 0.0 }
 0xaaa   :  { %v1904_v41 = vpop.f32.mrf.mxu1 }
 0xaab   :  { %v1905_v36 = vadd.f32 %v1904_v41, %v1769_v34  ;;  %1970 = vrot.lane.b32.xlu1 %v4503_v40, %s3383_s25 }
 0xaac   :  { %v1906_v42 = vpop.f32.mrf.mxu1 }
 0xaad   :  { %v4507_v27 = vmax.f32 %v1905_v36, 0.0 }
 0xaae   :  { %v1909_v44 = vpop.f32.mrf.mxu1 }
 0xaaf   :  { %v1910_v45 = vadd.f32 %v1909_v44, %v1774_v33  ;;  %1972 = vrot.lane.b32.xlu1 %v4507_v27, %s3383_s25 }
 0xab0   :  { %v1911_v46 = vpop.f32.mrf.mxu1 }
 0xab1   :  { %v4511_v47 = vmax.f32 %v1910_v45, 0.0 }
 0xab2   :  { %v1914_v49 = vpop.f32.mrf.mxu1 }
 0xab3   :  { %v1915_v43 = vadd.f32 %v1914_v49, %v1779_v48  ;;  %1974 = vrot.lane.b32.xlu1 %v4511_v47, %s3383_s25 }
 0xab4   :  { %v1916_v50 = vpop.f32.mrf.mxu1 }
 0xab5   :  { %v4515_v51 = vmax.f32 %v1915_v43, 0.0 }
 0xab6   :  { %v1919_v52 = vpop.f32.mrf.mxu1 }
 0xab7   :  { %v1920_v53 = vadd.f32 %v1919_v52, %v1784_v32  ;;  %1976 = vrot.lane.b32.xlu0 %v4515_v51, %s3383_s25  ;;  %v2060_v52 = vld [vmem:[%s5084_s16] sm:$0xff] }
 0xab8   :  { %v1921_v54 = vpop.f32.mrf.mxu1 }
 0xab9   :  { %v4519_v55 = vmax.f32 %v1920_v53, 0.0  ;;  %v2065_v53 = vld [vmem:[%s5084_s16 + $0x28] sm:$0xff] }
 0xaba   :  { %v1924_v56 = vpop.f32.mrf.mxu1 }
 0xabb   :  { %v1925_v57 = vadd.f32 %v1924_v56, %v1789_v1  ;;  %3117 = vmatprep.subr.mxu0 %v4519_v55  ;;  %1978 = vrot.lane.b32.xlu1 %v4519_v55, %s3383_s25  ;;  %v2064_v56 = vld [vmem:[%s5084_s16 + $0x20] sm:$0xff] }
 0xabc   :  { %1994 = vrot.lane.b32.xlu0 %v4515_v51, %s3380_s6  ;;  %v1926_v58 = vpop.f32.mrf.mxu1 }
 0xabd   :  { %v4526_v59 = vmax.f32 %v1925_v57, 0.0  ;;  %v2069_v57 = vld [vmem:[%s5084_s16 + $0x48] sm:$0xff] }
 0xabe   :  { %v1929_v61 = vpop.f32.mrf.mxu1 }
 0xabf   :  { %v1930_v62 = vadd.f32 %v1929_v61, %v1794_v31  ;;  %1962 = vrot.lane.b32.xlu1 %v4526_v59, %s5119_s14  ;;  %v2068_v61 = vld [vmem:[%s5084_s16 + $0x40] sm:$0xff] }
 0xac0   :  { %1996 = vrot.lane.b32.xlu0 %v4519_v55, %s3380_s6  ;;  %v1931_v63 = vpop.f32.mrf.mxu1 }
 0xac1   :  { %v4532_v0 = vmax.f32 %v1930_v62, 0.0  ;;  %v2073_v62 = vld [vmem:[%s5084_s16 + $0x68] sm:$0xff] }
 0xac2   :  { %v1934_v2 = vpop.f32.mrf.mxu1 }
 0xac3   :  { %1982 = vrot.lane.b32.xlu1 %v4532_v0, %s3383_s25  ;;  %v1935_v8 = vadd.f32 %v1934_v2, %v1799_v3  ;;  %v2072_v3 = vld [vmem:[%s5084_s16 + $0x60] sm:$0xff] }
 0xac4   :  { %1980 = vrot.lane.b32.xlu0 %v4526_v59, %s3383_s25  ;;  %v1936_v5 = vpop.f32.mrf.mxu1 }
 0xac5   :  { %v4542_v7 = vmax.f32 %v1935_v8, 0.0  ;;  %v2077_v5 = vld [vmem:[%s5084_s16 + $0x88] sm:$0xff] }
 0xac6   :  { %v1939_v9 = vpop.f32.mrf.mxu1 }
 0xac7   :  { %1964 = vrot.lane.b32.xlu1 %v4532_v0, %s5119_s14  ;;  %v1940_v10 = vadd.f32 %v1939_v9, %v1804_v60 }
 0xac8   :  { %1998 = vrot.lane.b32.xlu0 %v4526_v59, %s3380_s6  ;;  %v1941_v4 = vpop.f32.mrf.mxu1 }
 0xac9   :  { %v4552_v11 = vmax.f32 %v1940_v10, 0.0  ;;  %v2076_v4 = vld [vmem:[%s5084_s16 + $0x80] sm:$0xff]  ;;  %v2081_v10 = vld [vmem:[%s5084_s16 + $0xa8] sm:$0xff] }
 0xacb   :  { %1966 = vrot.lane.b32.xlu1 %v4542_v7, %s5119_s14 }
 0xacc   :  { %2000 = vrot.lane.b32.xlu0 %v4532_v0, %s3380_s6 }
 0xacf   :  { %1960 = vrot.lane.b32.xlu1 %v4519_v55, %s5119_s14 }
 0xad0   :  { %2002 = vrot.lane.b32.xlu0 %v4542_v7, %s3380_s6 }
 0xad3   :  { %1968 = vrot.lane.b32.xlu1 %v4552_v11, %s5119_s14 }
 0xad4   :  { %2004 = vrot.lane.b32.xlu0 %v4552_v11, %s3380_s6 }
 0xad7   :  { %1958 = vrot.lane.b32.xlu1 %v4515_v51, %s5119_s14 }
 0xad8   :  { %1992 = vrot.lane.b32.xlu0 %v4511_v47, %s3380_s6 }
 0xadb   :  { %1956 = vrot.lane.b32.xlu1 %v4511_v47, %s5119_s14 }
 0xadc   :  { %1990 = vrot.lane.b32.xlu0 %v4507_v27, %s3380_s6 }
 0xadf   :  { %1954 = vrot.lane.b32.xlu1 %v4507_v27, %s5119_s14 }
 0xae0   :  { %1988 = vrot.lane.b32.xlu0 %v4503_v40, %s3380_s6 }
 0xae3   :  { %1952 = vrot.lane.b32.xlu1 %v4503_v40, %s5119_s14 }
 0xae4   :  { %1986 = vrot.lane.b32.xlu0 %v4552_v11, %s3383_s25 }
 0xae7   :  { %2026 = vrot.lane.b32.xlu1 %v4507_v27, %s3384_s7 }
 0xae8   :  { %1984 = vrot.lane.b32.xlu0 %v4542_v7, %s3383_s25 }
 0xaeb   :  { %2022 = vrot.lane.b32.xlu1 %v4552_v11, %s5117_s28 }
 0xaec   :  { %2028 = vrot.lane.b32.xlu0 %v4511_v47, %s3384_s7 }
 0xaef   :  { %2018 = vrot.lane.b32.xlu1 %v4532_v0, %s5117_s28 }
 0xaf0   :  { %2024 = vrot.lane.b32.xlu0 %v4503_v40, %s3384_s7 }
 0xaf3   :  { %2014 = vrot.lane.b32.xlu1 %v4519_v55, %s5117_s28 }
 0xaf4   :  { %2020 = vrot.lane.b32.xlu0 %v4542_v7, %s5117_s28 }
 0xaf7   :  { %2010 = vrot.lane.b32.xlu1 %v4511_v47, %s5117_s28 }
 0xaf8   :  { %2016 = vrot.lane.b32.xlu0 %v4526_v59, %s5117_s28 }
 0xafb   :  { %2006 = vrot.lane.b32.xlu1 %v4503_v40, %s5117_s28 }
 0xafc   :  { %2012 = vrot.lane.b32.xlu0 %v4515_v51, %s5117_s28 }
 0xaff   :  { %2056 = vrot.lane.b32.xlu1 %v4542_v7, %s5120_s12 }
 0xb00   :  { %2008 = vrot.lane.b32.xlu0 %v4507_v27, %s5117_s28 }
 0xb03   :  { %2052 = vrot.lane.b32.xlu1 %v4526_v59, %s5120_s12 }
 0xb04   :  { %2058 = vrot.lane.b32.xlu0 %v4552_v11, %s5120_s12 }
 0xb07   :  { %2048 = vrot.lane.b32.xlu1 %v4515_v51, %s5120_s12 }
 0xb08   :  { %2054 = vrot.lane.b32.xlu0 %v4532_v0, %s5120_s12 }
 0xb0b   :  { %2044 = vrot.lane.b32.xlu1 %v4507_v27, %s5120_s12 }
 0xb0c   :  { %2050 = vrot.lane.b32.xlu0 %v4519_v55, %s5120_s12 }
 0xb0f   :  { %2040 = vrot.lane.b32.xlu1 %v4552_v11, %s3384_s7 }
 0xb10   :  { %2046 = vrot.lane.b32.xlu0 %v4511_v47, %s5120_s12 }
 0xb13   :  { %2036 = vrot.lane.b32.xlu1 %v4532_v0, %s3384_s7 }
 0xb14   :  { %2042 = vrot.lane.b32.xlu0 %v4503_v40, %s5120_s12 }
 0xb17   :  { %2032 = vrot.lane.b32.xlu1 %v4519_v55, %s3384_s7 }
 0xb18   :  { %2038 = vrot.lane.b32.xlu0 %v4542_v7, %s3384_s7 }
 0xb1b   :  { %2127 = vperm.xlu1 %3378, %v2100_v14   ;;  %v2080_v14 = vld [vmem:[%s5084_s16 + $0xa0] sm:$0xff] }
 0xb1c   :  { %2034 = vrot.lane.b32.xlu0 %v4526_v59, %s3384_s7 }
 0xb1d   :  { %v1971_v17 = vpop.permute.xlu1 %1970 }
 0xb1f   :  { %2122 = vperm.xlu1 %3378, %v2099_v16  }
 0xb20   :  { %2030 = vrot.lane.b32.xlu0 %v4515_v51, %s3384_s7 }
 0xb21   :  { %v1973_v20 = vpop.permute.xlu1 %1972 }
 0xb23   :  { %2117 = vperm.xlu1 %3378, %v2098_v18  }
 0xb24   :  { %2137 = vperm.xlu0 %3377, %v2102_v19   ;;  %v2084_v19 = vld [vmem:[%s5084_s16 + $0xc0] sm:$0xff] }
 0xb25   :  { %v1975_v28 = vpop.permute.xlu1 %1974 }
 0xb27   :  { %2107 = vperm.xlu1 %3378, %v2096_v24  }
 0xb28   :  { %2132 = vperm.xlu0 %3377, %v2101_v25  }
 0xb29   :  { %v1977_v13 = vpop.permute.xlu0 %1976 }
 0xb2b   :  { %2142 = vperm.xlu1 %3378, %v2103_v26   ;;  %v2088_v26 = vld [vmem:[%s5084_s16 + $0xe0] sm:$0xff] }
 0xb2c   :  { %2112 = vperm.xlu0 %3377, %v2097_v15   ;;  %v2092_v15 = vld [vmem:[%s5084_s16 + $0x100] sm:$0xff] }
 0xb2d   :  { %v1979_v6 = vpop.permute.xlu1 %1978 }
 0xb2e   :  { %v1995_v31 = vpop.permute.xlu0 %1994 }
 0xb30   :  { %2147 = vperm.xlu0 %3377, %v2104_v30   ;;  %v2063_v30 = vld [vmem:[%s5084_s16 + $0x18] sm:$0xff] }
 0xb31   :  { %v1963_v32 = vpop.permute.xlu1 %1962 }
 0xb32   :  { %v1997_v33 = vpop.permute.xlu0 %1996 }
 0xb35   :  { %v1983_v34 = vpop.permute.xlu1 %1982 }
 0xb36   :  { %v1981_v35 = vpop.permute.xlu0 %1980  ;;  %3118 = vmatpush3.msra.mxu0 %v1983_v34 }
 0xb37   :  { %3119 = vmatprep.subr.mxu0 %v4515_v51 }
 0xb38   :  { %3120 = vmatpush3.msra.mxu0 %v1981_v35 }
 0xb39   :  { %3121 = vmatprep.subr.mxu0 %v4511_v47  ;;  %v1965_v37 = vpop.permute.xlu1 %1964 }
 0xb3a   :  { %v1999_v38 = vpop.permute.xlu0 %1998  ;;  %3122 = vmatpush3.msra.mxu0 %v1979_v6 }
 0xb3b   :  { %3123 = vmatprep.subr.mxu0 %v4507_v27 }
 0xb3c   :  { %3124 = vmatpush3.msra.mxu0 %v1977_v13 }
 0xb3d   :  { %3125 = vmatprep.subr.mxu0 %v4503_v40  ;;  %v1967_v39 = vpop.permute.xlu1 %1966 }
 0xb3e   :  { %v2001_v41 = vpop.permute.xlu0 %2000  ;;  %3126 = vmatpush3.msra.mxu0 %v1975_v28  ;;  %v2093_v28 = vld [vmem:[%s5084_s16 + $0x108] sm:$0xff] }
 0xb41   :  { %v1961_v36 = vpop.permute.xlu1 %1960 }
 0xb42   :  { %v2003_v1 = vpop.permute.xlu0 %2002 }
 0xb45   :  { %v1969_v42 = vpop.permute.xlu1 %1968 }
 0xb46   :  { %v2005_v44 = vpop.permute.xlu0 %2004 }
 0xb47   :  { %3127 = vmatprep.subr.mxu0 %v2005_v44  ;;  %v2075_v44 = vld [vmem:[%s5084_s16 + $0x78] sm:$0xff] }
 0xb48   :  { %3128 = vmatpush3.msra.mxu0 %v1973_v20  ;;  %v2089_v20 = vld [vmem:[%s5084_s16 + $0xe8] sm:$0xff] }
 0xb49   :  { %3129 = vmatprep.subr.mxu0 %v2003_v1  ;;  %v1959_v45 = vpop.permute.xlu1 %1958  ;;  %v2071_v1 = vld [vmem:[%s5084_s16 + $0x58] sm:$0xff] }
 0xb4a   :  { %v1993_v46 = vpop.permute.xlu0 %1992  ;;  %3130 = vmatpush3.msra.mxu0 %v1971_v17  ;;  %v2085_v17 = vld [vmem:[%s5084_s16 + $0xc8] sm:$0xff] }
 0xb4b   :  { %3131 = vmatprep.subr.mxu0 %v2001_v41  ;;  %v2067_v41 = vld [vmem:[%s5084_s16 + $0x38] sm:$0xff] }
 0xb4c   :  { %3132 = vmatpush3.msra.mxu0 %v1969_v42  ;;  %v2070_v42 = vld [vmem:[%s5084_s16 + $0x50] sm:$0xff] }
 0xb4d   :  { %3133 = vmatprep.subr.mxu0 %v1999_v38  ;;  %v1957_v27 = vpop.permute.xlu1 %1956  ;;  %v2062_v38 = vld [vmem:[%s5084_s16 + $0x10] sm:$0xff] }
 0xb4e   :  { %v1991_v47 = vpop.permute.xlu0 %1990  ;;  %3134 = vmatpush3.msra.mxu0 %v1967_v39 }
 0xb4f   :  { %3135 = vmatprep.subr.mxu0 %v1997_v33 }
 0xb50   :  { %3136 = vmatpush3.msra.mxu0 %v1965_v37 }
 0xb51   :  { %3137 = vmatprep.subr.mxu0 %v1995_v31  ;;  %v1955_v40 = vpop.permute.xlu1 %1954 }
 0xb52   :  { %v1989_v48 = vpop.permute.xlu0 %1988  ;;  %3138 = vmatpush3.msra.mxu0 %v1963_v32 }
 0xb53   :  { %3139 = vmatprep.subr.mxu0 %v1993_v46  ;;  %v2079_v46 = vld [vmem:[%s5084_s16 + $0x98] sm:$0xff] }
 0xb54   :  { %3140 = vmatpush3.msra.mxu0 %v1961_v36  ;;  %v2066_v36 = vld [vmem:[%s5084_s16 + $0x30] sm:$0xff] }
 0xb55   :  { %3141 = vmatprep.subr.mxu0 %v1991_v47  ;;  %v1953_v49 = vpop.permute.xlu1 %1952  ;;  %v2083_v47 = vld [vmem:[%s5084_s16 + $0xb8] sm:$0xff] }
 0xb56   :  { %v1987_v43 = vpop.permute.xlu0 %1986  ;;  %3142 = vmatpush3.msra.mxu0 %v1959_v45  ;;  %v2074_v45 = vld [vmem:[%s5084_s16 + $0x70] sm:$0xff] }
 0xb57   :  { %3143 = vmatprep.subr.mxu0 %v1989_v48  ;;  %v2087_v48 = vld [vmem:[%s5084_s16 + $0xd8] sm:$0xff] }
 0xb58   :  { %3144 = vmatpush3.msra.mxu0 %v1957_v27  ;;  %v2078_v27 = vld [vmem:[%s5084_s16 + $0x90] sm:$0xff] }
 0xb59   :  { %3145 = vmatprep.subr.mxu0 %v1987_v43  ;;  %v2027_v50 = vpop.permute.xlu1 %2026  ;;  %v2091_v43 = vld [vmem:[%s5084_s16 + $0xf8] sm:$0xff] }
 0xb5a   :  { %v1985_v51 = vpop.permute.xlu0 %1984  ;;  %3146 = vmatpush3.msra.mxu0 %v1955_v40  ;;  %v2082_v40 = vld [vmem:[%s5084_s16 + $0xb0] sm:$0xff] }
 0xb5b   :  { %3147 = vmatprep.subr.mxu0 %v1985_v51  ;;  %v2095_v51 = vld [vmem:[%s5084_s16 + $0x118] sm:$0xff] }
 0xb5c   :  { %3148 = vmatpush3.msra.mxu0 %v1953_v49  ;;  %v2086_v49 = vld [vmem:[%s5084_s16 + $0xd0] sm:$0xff] }
 0xb5d   :  { %2242 = vmatmul.mubr.f32.vlgmr.msra.gmra.mxu0 %v2060_v52  ;;  %2287 = vmatprep.subr.mxu0 %v3382_v22  ;;  %v2023_v54 = vpop.permute.xlu1 %2022  ;;  %v2094_v52 = vld [vmem:[%s5084_s16 + $0x110] sm:$0xff] }
 0xb5e   :  { %v2029_v55 = vpop.permute.xlu0 %2028  ;;  %2246 = vmatprep.mubr.f32.mxu0 %v2065_v53 }
 0xb5f   :  { %2288 = vmatpush1.msra.mxu0 %v2029_v55 }
 0xb60   :  { %2289 = vmatprep.subr.mxu0 %v3382_v22 }
 0xb61   :  { %2247 = vmatmul.mubr.f32.gmra.mxu0 %v2064_v56  ;;  %v2019_v58 = vpop.permute.xlu1 %2018 }
 0xb62   :  { %2290 = vmatpush1.msra.mxu0 %v2027_v50  ;;  %v2025_v60 = vpop.permute.xlu0 %2024  ;;  %2251 = vmatprep.mubr.f32.mxu0 %v2069_v57  ;;  %v2090_v50 = vld [vmem:[%s5084_s16 + $0xf0] sm:$0xff] }
 0xb63   :  { %2291 = vmatprep.subr.mxu0 %v3382_v22 }
 0xb64   :  { %2292 = vmatpush1.msra.mxu0 %v2025_v60 }
 0xb65   :  { %2293 = vmatprep.subr.mxu0 %v3382_v22  ;;  %2252 = vmatmul.mubr.f32.gmra.mxu0 %v2068_v61  ;;  %v2015_v63 = vpop.permute.xlu1 %2014 }
 0xb66   :  { %2294 = vmatpush1.msra.mxu0 %v2023_v54  ;;  %v2021_v2 = vpop.permute.xlu0 %2020  ;;  %2256 = vmatprep.mubr.f32.mxu0 %v2073_v62 }
 0xb67   :  { %2295 = vmatprep.subr.mxu0 %v3382_v22 }
 0xb68   :  { %2296 = vmatpush1.msra.mxu0 %v2021_v2 }
 0xb69   :  { %2297 = vmatprep.subr.mxu0 %v3382_v22  ;;  %2257 = vmatmul.mubr.f32.gmra.mxu0 %v2072_v3  ;;  %v2011_v8 = vpop.permute.xlu1 %2010 }
 0xb6a   :  { %2298 = vmatpush1.msra.mxu0 %v2019_v58  ;;  %v2017_v9 = vpop.permute.xlu0 %2016  ;;  %2261 = vmatprep.mubr.f32.mxu0 %v2077_v5 }
 0xb6b   :  { %2299 = vmatprep.subr.mxu0 %v3382_v22 }
 0xb6c   :  { %2300 = vmatpush1.msra.mxu0 %v2017_v9 }
 0xb6d   :  { %2301 = vmatprep.subr.mxu0 %v3382_v22  ;;  %2262 = vmatmul.mubr.f32.gmra.mxu0 %v2076_v4  ;;  %v2007_v16 = vpop.permute.xlu1 %2006 }
 0xb6e   :  { %2302 = vmatpush1.msra.mxu0 %v2015_v63  ;;  %v2013_v12 = vpop.permute.xlu0 %2012  ;;  %2266 = vmatprep.mubr.f32.mxu0 %v2081_v10 }
 0xb6f   :  { %2303 = vmatprep.subr.mxu0 %v3382_v22 }
 0xb70   :  { %2304 = vmatpush1.msra.mxu0 %v2013_v12 }
 0xb71   :  { %2305 = vmatprep.subr.mxu0 %v3382_v22  ;;  %2267 = vmatmul.mubr.f32.gmra.mxu0 %v2080_v14  ;;  %v2057_v24 = vpop.permute.xlu1 %2056 }
 0xb72   :  { %2306 = vmatpush1.msra.mxu0 %v2011_v8  ;;  %v2009_v18 = vpop.permute.xlu0 %2008  ;;  %2271 = vmatprep.mubr.f32.mxu0 %v2085_v17 }
 0xb73   :  { %2307 = vmatprep.subr.mxu0 %v3382_v22 }
 0xb74   :  { %2308 = vmatpush1.msra.mxu0 %v2009_v18 }
 0xb75   :  { %2309 = vmatprep.subr.mxu0 %v3382_v22  ;;  %2272 = vmatmul.mubr.f32.gmra.mxu0 %v2084_v19  ;;  %v2053_v6 = vpop.permute.xlu1 %2052 }
 0xb76   :  { %2310 = vmatpush1.msra.mxu0 %v2007_v16  ;;  %v2059_v25 = vpop.permute.xlu0 %2058  ;;  %2276 = vmatprep.mubr.f32.mxu0 %v2089_v20 }
 0xb77   :  { %2311 = vmatprep.subr.mxu0 %v3382_v22 }
 0xb78   :  { %2312 = vmatpush1.msra.mxu0 %v4552_v11 }
 0xb79   :  { %2313 = vmatprep.subr.mxu0 %v3382_v22  ;;  %2277 = vmatmul.mubr.f32.gmra.mxu0 %v2088_v26  ;;  %v2049_v11 = vpop.permute.xlu1 %2048 }
 0xb7a   :  { %2314 = vmatpush1.msra.mxu0 %v4542_v7  ;;  %v2055_v13 = vpop.permute.xlu0 %2054  ;;  %2281 = vmatprep.mubr.f32.mxu0 %v2093_v28 }
 0xb7b   :  { %2315 = vmatprep.subr.mxu0 %v3382_v22 }
 0xb7c   :  { %2316 = vmatpush1.msra.mxu0 %v4532_v0 }
 0xb7d   :  { %2317 = vmatprep.subr.mxu0 %v3382_v22  ;;  %2282 = vmatmul.mubr.f32.gmra.mxu0 %v2092_v15  ;;  %v2045_v0 = vpop.permute.xlu1 %2044 }
 0xb7e   :  { %2318 = vmatpush1.msra.mxu0 %v4526_v59  ;;  %v2051_v7 = vpop.permute.xlu0 %2050  ;;  %2941 = vmatprep.mubr.msk.f32.mxu0 %vm713_vm2, %v2063_v30 }
 0xb7f   :  { %2321 = vmatprep.subr.mxu0 %v3382_v22 }
 0xb80   :  { %2322 = vmatpush2.msra.mxu0 %v2059_v25 }
 0xb81   :  { %2323 = vmatprep.subr.mxu0 %v3382_v22  ;;  %v2041_v32 = vpop.permute.xlu1 %2040 }
 0xb82   :  { %2324 = vmatpush2.msra.mxu0 %v2057_v24  ;;  %v2047_v31 = vpop.permute.xlu0 %2046 }
 0xb83   :  { %2325 = vmatprep.subr.mxu0 %v3382_v22 }
 0xb84   :  { %2326 = vmatpush2.msra.mxu0 %v2055_v13 }
 0xb85   :  { %2327 = vmatprep.subr.mxu0 %v3382_v22  ;;  %v2037_v34 = vpop.permute.xlu1 %2036 }
 0xb86   :  { %2328 = vmatpush2.msra.mxu0 %v2053_v6  ;;  %v2043_v59 = vpop.permute.xlu0 %2042 }
 0xb87   :  { %2329 = vmatprep.subr.mxu0 %v3382_v22 }
 0xb88   :  { %2330 = vmatpush2.msra.mxu0 %v2051_v7 }
 0xb89   :  { %2331 = vmatprep.subr.mxu0 %v3382_v22  ;;  %v2033_v37 = vpop.permute.xlu1 %2032 }
 0xb8a   :  { %2332 = vmatpush2.msra.mxu0 %v2049_v11  ;;  %v2039_v33 = vpop.permute.xlu0 %2038 }
 0xb8b   :  { %2333 = vmatprep.subr.mxu0 %v3382_v22 }
 0xb8c   :  { %2334 = vmatpush2.msra.mxu0 %v2047_v31 }
 0xb8d   :  { %2335 = vmatprep.subr.mxu0 %v3382_v22 }
 0xb8e   :  { %2336 = vmatpush2.msra.mxu0 %v2045_v0  ;;  %v2035_v35 = vpop.permute.xlu0 %2034 }
 0xb8f   :  { %2337 = vmatprep.subr.mxu0 %v3382_v22 }
 0xb90   :  { %2338 = vmatpush2.msra.mxu0 %v2043_v59 }
 0xb91   :  { %2339 = vmatprep.subr.mxu0 %v3382_v22 }
 0xb92   :  { %2340 = vmatpush2.msra.mxu0 %v2041_v32  ;;  %v2031_v39 = vpop.permute.xlu0 %2030 }
 0xb93   :  { %2341 = vmatprep.subr.mxu0 %v3382_v22 }
 0xb94   :  { %2342 = vmatpush2.msra.mxu0 %v2039_v33 }
 0xb95   :  { %2343 = vmatprep.subr.mxu0 %v3382_v22 }
 0xb96   :  { %2344 = vmatpush2.msra.mxu0 %v2037_v34  ;;  %v2128_v12 = vpop.permute.xlu1 %2127 }
 0xb97   :  { %2345 = vmatprep.subr.mxu0 %v3382_v22 }
 0xb98   :  { %2346 = vmatpush2.msra.mxu0 %v2035_v35 }
 0xb99   :  { %2347 = vmatprep.subr.mxu0 %v3382_v22 }
 0xb9a   :  { %2348 = vmatpush2.msra.mxu0 %v2033_v37  ;;  %v2123_v19 = vpop.permute.xlu1 %2122 }
 0xb9b   :  { %2349 = vmatprep.subr.mxu0 %v3382_v22 }
 0xb9c   :  { %2350 = vmatpush2.msra.mxu0 %v2031_v39 }
 0xb9d   :  { %2352 = vmatmul.mubr.f32.vlgmr.msra.gmra.mxu0 %v2062_v38  ;;  %2803 = vmatprep.subr.mxu0 %v3382_v22 }
 0xb9e   :  { %2942 = vmatprep.mubr.msk.f32.mxu0 %vm713_vm2, %v2067_v41  ;;  %v2118_v6 = vpop.permute.xlu1 %2117 }
 0xb9f   :  { %v2138_v4 = vpop.permute.xlu0 %2137 }
 0xba1   :  { %2357 = vmatmul.mubr.f32.gmra.mxu0 %v2066_v36 }
 0xba2   :  { %2943 = vmatprep.mubr.msk.f32.mxu0 %vm713_vm2, %v2071_v1 }
 0xba3   :  { %v2133_v16 = vpop.permute.xlu0 %2132 }
 0xba5   :  { %2362 = vmatmul.mubr.f32.gmra.mxu0 %v2070_v42 }
 0xba6   :  { %2944 = vmatprep.mubr.msk.f32.mxu0 %vm713_vm2, %v2075_v44  ;;  %v2108_v44 = vpop.permute.xlu1 %2107 }
 0xba7   :  { %v2113_v24 = vpop.permute.xlu0 %2112 }
 0xba9   :  { %2367 = vmatmul.mubr.f32.gmra.mxu0 %v2074_v45 }
 0xbaa   :  { %2945 = vmatprep.mubr.msk.f32.mxu0 %vm713_vm2, %v2079_v46 }
 0xbad   :  { %2372 = vmatmul.mubr.f32.gmra.mxu0 %v2078_v27 }
 0xbae   :  { %2946 = vmatprep.mubr.msk.f32.mxu0 %vm713_vm2, %v2083_v47 }
 0xbb1   :  { %2377 = vmatmul.mubr.f32.gmra.mxu0 %v2082_v40 }
 0xbb2   :  { %2947 = vmatprep.mubr.msk.f32.mxu0 %vm713_vm2, %v2087_v48 }
 0xbb5   :  { %2382 = vmatmul.mubr.f32.gmra.mxu0 %v2086_v49 }
 0xbb6   :  { %2948 = vmatprep.mubr.msk.f32.mxu0 %vm713_vm2, %v2091_v43 }
 0xbb9   :  { %2387 = vmatmul.mubr.f32.gmra.mxu0 %v2090_v50 }
 0xbba   :  { %2949 = vmatprep.mubr.msk.f32.mxu0 %vm713_vm2, %v2095_v51 }
 0xbbd   :  { %2392 = vmatmul.mubr.f32.gmra.mxu0 %v2094_v52 }
 0xc1d   :  { %v3149_v53 = vpop.f32.mrf.mxu0 }
 0xc1f   :  { %v3150_v54 = vpop.f32.mrf.mxu0 }
 0xc20   :  { %v3151_v38 = vadd.f32 %v3150_v54, %v3149_v53 }
 0xc21   :  { %v3152_v55 = vpop.f32.mrf.mxu0 }
 0xc22   :  { %v2244_v46 = vadd.f32 %v3151_v38, %v2108_v44 }
 0xc23   :  { %v3153_v56 = vpop.f32.mrf.mxu0 }
 0xc24   :  { %v3154_v18 = vadd.f32 %v3153_v56, %v3152_v55 }
 0xc25   :  { %v3155_v57 = vpop.f32.mrf.mxu0 }
 0xc26   :  { %v2249_v28 = vadd.f32 %v3154_v18, %v2113_v24  ;;  %v2501_v24 = vld [vmem:[%s5087_s19 + $0x28] sm:$0xff] }
 0xc27   :  { %v3156_v58 = vpop.f32.mrf.mxu0 }
 0xc28   :  { %v3157_v26 = vadd.f32 %v3156_v58, %v3155_v57 }
 0xc29   :  { %v3158_v60 = vpop.f32.mrf.mxu0 }
 0xc2a   :  { %v2254_v31 = vadd.f32 %v3157_v26, %v2118_v6  ;;  %v2496_v26 = vld [vmem:[%s5087_s19] sm:$0xff] }
 0xc2b   :  { %v3159_v61 = vpop.f32.mrf.mxu0 }
 0xc2c   :  { %v3160_v7 = vadd.f32 %v3159_v61, %v3158_v60 }
 0xc2d   :  { %v3161_v62 = vpop.f32.mrf.mxu0 }
 0xc2e   :  { %v2259_v35 = vadd.f32 %v3160_v7, %v2123_v19  ;;  %v2499_v19 = vld [vmem:[%s5087_s19 + $0x18] sm:$0xff] }
 0xc2f   :  { %v3162_v63 = vpop.f32.mrf.mxu0 }
 0xc30   :  { %v3163_v33 = vadd.f32 %v3162_v63, %v3161_v62  ;;  %v2148_v63 = vpop.permute.xlu0 %2147 }
 0xc31   :  { %v3164_v2 = vpop.f32.mrf.mxu0 }
 0xc32   :  { %v2264_v42 = vadd.f32 %v3163_v33, %v2128_v12 }
 0xc33   :  { %v3165_v3 = vpop.f32.mrf.mxu0 }
 0xc34   :  { %v3166_v36 = vadd.f32 %v3165_v3, %v3164_v2 }
 0xc35   :  { %v3167_v5 = vpop.f32.mrf.mxu0 }
 0xc36   :  { %v2269_v43 = vadd.f32 %v3166_v36, %v2133_v16  ;;  %v2143_v16 = vpop.permute.xlu1 %2142 }
 0xc37   :  { %v3168_v8 = vpop.f32.mrf.mxu0 }
 0xc38   :  { %v3169_v40 = vadd.f32 %v3168_v8, %v3167_v5 }
 0xc39   :  { %v4814_v9 = vpop.f32.mrf.mxu0 }
 0xc3a   :  { %v2274_v55 = vadd.f32 %v3169_v40, %v2138_v4 }
 0xc3b   :  { %v4816_v10 = vpop.f32.mrf.mxu0 }
 0xc3c   :  { %v3172_v8 = vadd.f32 %v4816_v10, %v4814_v9  ;;  %v2479_v10 = vld [vmem:[%s5086_s18 + $0x8] sm:$0xff] }
 0xc3d   :  { %v3173_v14 = vpop.f32.mrf.mxu0  ;;  %2614 = vmatprep.mubr.f32.mxu1 %v2479_v10 }
 0xc3f   :  { %v3174_v17 = vpop.f32.mrf.mxu0 }
 0xc40   :  { %v3175_v60 = vadd.f32 %v3174_v17, %v3173_v14  ;;  %v2279_v17 = vadd.f32 %v3172_v8, %v2143_v16  ;;  %v2486_v16 = vld [vmem:[%s5086_s18 + $0x40] sm:$0xff] }
 0xc42   :  { %v2284_v3 = vadd.f32 %v3175_v60, %v2148_v63 }
 0xc5d   :  { %v2353_v20 = vpop.f32.mrf.mxu0 }
 0xc5e   :  { %v2354_v48 = vadd.f32 %v2353_v20, %v2244_v46  ;;  %v2497_v20 = vld [vmem:[%s5087_s19 + $0x8] sm:$0xff] }
 0xc5f   :  { %v2355_v25 = vpop.f32.mrf.mxu0 }
 0xc60   :  { %v4838_v53 = vmax.f32 %v2354_v48, 0.0  ;;  %v2498_v25 = vld [vmem:[%s5087_s19 + $0x10] sm:$0xff] }
 0xc61   :  { %v2358_v13 = vpop.f32.mrf.mxu0 }
 0xc62   :  { %v2359_v15 = vadd.f32 %v2358_v13, %v2249_v28  ;;  %v2500_v28 = vld [vmem:[%s5087_s19 + $0x20] sm:$0xff] }
 0xc63   :  { %v2360_v30 = vpop.f32.mrf.mxu0 }
 0xc64   :  { %v4818_v11 = vmax.f32 %v2359_v15, 0.0 }
 0xc65   :  { %v2363_v0 = vpop.f32.mrf.mxu0 }
 0xc66   :  { %v2364_v59 = vadd.f32 %v2363_v0, %v2254_v31  ;;  %2444 = vrot.lane.b32.xlu0 %v4818_v11, %s5117_s28 }
 0xc67   :  { %v2365_v32 = vpop.f32.mrf.mxu0 }
 0xc68   :  { %v4822_v34 = vmax.f32 %v2364_v59, 0.0 }
 0xc69   :  { %v2368_v37 = vpop.f32.mrf.mxu0 }
 0xc6a   :  { %v2369_v39 = vadd.f32 %v2368_v37, %v2259_v35  ;;  %2446 = vrot.lane.b32.xlu0 %v4822_v34, %s5117_s28 }
 0xc6b   :  { %v2370_v41 = vpop.f32.mrf.mxu0 }
 0xc6c   :  { %v4826_v1 = vmax.f32 %v2369_v39, 0.0 }
 0xc6d   :  { %v2373_v45 = vpop.f32.mrf.mxu0 }
 0xc6e   :  { %v2374_v27 = vadd.f32 %v2373_v45, %v2264_v42  ;;  %2430 = vrot.lane.b32.xlu1 %v4826_v1, %s3380_s6  ;;  %2448 = vrot.lane.b32.xlu0 %v4826_v1, %s5117_s28 }
 0xc6f   :  { %v2375_v47 = vpop.f32.mrf.mxu0 }
 0xc70   :  { %v4832_v49 = vmax.f32 %v2374_v27, 0.0 }
 0xc71   :  { %v2378_v50 = vpop.f32.mrf.mxu0 }
 0xc72   :  { %v2379_v51 = vadd.f32 %v2378_v50, %v2269_v43  ;;  %2432 = vrot.lane.b32.xlu1 %v4832_v49, %s3380_s6  ;;  %2450 = vrot.lane.b32.xlu0 %v4832_v49, %s5117_s28  ;;  %v2481_v43 = vld [vmem:[%s5086_s18 + $0x18] sm:$0xff] }
 0xc73   :  { %v2380_v52 = vpop.f32.mrf.mxu0  ;;  %v2485_v50 = vld [vmem:[%s5086_s18 + $0x38] sm:$0xff] }
 0xc74   :  { %v4840_v54 = vmax.f32 %v2379_v51, 0.0 }
 0xc75   :  { %v2383_v56 = vpop.f32.mrf.mxu0 }
 0xc76   :  { %v2384_v57 = vadd.f32 %v2383_v56, %v2274_v55  ;;  %2434 = vrot.lane.b32.xlu1 %v4840_v54, %s3380_s6  ;;  %2442 = vrot.lane.b32.xlu0 %v4838_v53, %s5117_s28 }
 0xc77   :  { %v2385_v58 = vpop.f32.mrf.mxu0 }
 0xc78   :  { %v4846_v61 = vmax.f32 %v2384_v57, 0.0  ;;  %v2487_v57 = vld [vmem:[%s5086_s18 + $0x48] sm:$0xff] }
 0xc79   :  { %v2388_v62 = vpop.f32.mrf.mxu0  ;;  %v2491_v58 = vld [vmem:[%s5086_s18 + $0x68] sm:$0xff] }
 0xc7a   :  { %2436 = vrot.lane.b32.xlu1 %v4846_v61, %s3380_s6  ;;  %2426 = vrot.lane.b32.xlu0 %v4818_v11, %s3380_s6  ;;  %v2389_v18 = vadd.f32 %v2388_v62, %v2279_v17  ;;  %v2494_v62 = vld [vmem:[%s5086_s18 + $0x80] sm:$0xff]  ;;  %v2489_v17 = vld [vmem:[%s5086_s18 + $0x58] sm:$0xff] }
 0xc7b   :  { %v2390_v2 = vpop.f32.mrf.mxu0 }
 0xc7c   :  { %v4868_v9 = vmax.f32 %v2389_v18, 0.0  ;;  %v2492_v18 = vld [vmem:[%s5086_s18 + $0x70] sm:$0xff] }
 0xc7d   :  { %v2393_v5 = vpop.f32.mrf.mxu0 }
 0xc7e   :  { %v2394_v4 = vadd.f32 %v2393_v5, %v2284_v3  ;;  %2428 = vrot.lane.b32.xlu1 %v4822_v34, %s3380_s6  ;;  %2418 = vrot.lane.b32.xlu0 %v4846_v61, %s3383_s25  ;;  %v2493_v3 = vld [vmem:[%s5086_s18 + $0x78] sm:$0xff]  ;;  %v2480_v5 = vld [vmem:[%s5086_s18 + $0x10] sm:$0xff] }
 0xc7f   :  { %v2395_v12 = vpop.f32.mrf.mxu0 }
 0xc80   :  { %v4858_v14 = vmax.f32 %v2394_v4, 0.0 }
 0xc82   :  { %2424 = vrot.lane.b32.xlu1 %v4838_v53, %s3380_s6  ;;  %2422 = vrot.lane.b32.xlu0 %v4858_v14, %s3383_s25 }
 0xc86   :  { %2416 = vrot.lane.b32.xlu1 %v4840_v54, %s3383_s25  ;;  %2414 = vrot.lane.b32.xlu0 %v4832_v49, %s3383_s25 }
 0xc8a   :  { %2410 = vrot.lane.b32.xlu0 %v4822_v34, %s3383_s25  ;;  %2420 = vrot.lane.b32.xlu1 %v4868_v9, %s3383_s25 }
 0xc8e   :  { %2408 = vrot.lane.b32.xlu0 %v4818_v11, %s3383_s25  ;;  %2412 = vrot.lane.b32.xlu1 %v4826_v1, %s3383_s25 }
 0xc92   :  { %2406 = vrot.lane.b32.xlu0 %v4838_v53, %s3383_s25  ;;  %2438 = vrot.lane.b32.xlu1 %v4868_v9, %s3380_s6 }
 0xc96   :  { %2474 = vrot.lane.b32.xlu0 %v4868_v9, %s3384_s7  ;;  %2440 = vrot.lane.b32.xlu1 %v4858_v14, %s3380_s6 }
 0xc9a   :  { %2470 = vrot.lane.b32.xlu0 %v4840_v54, %s3384_s7  ;;  %2476 = vrot.lane.b32.xlu1 %v4858_v14, %s3384_s7 }
 0xc9e   :  { %2466 = vrot.lane.b32.xlu0 %v4826_v1, %s3384_s7  ;;  %2472 = vrot.lane.b32.xlu1 %v4846_v61, %s3384_s7 }
 0xca2   :  { %2462 = vrot.lane.b32.xlu0 %v4818_v11, %s3384_s7  ;;  %2468 = vrot.lane.b32.xlu1 %v4832_v49, %s3384_s7 }
 0xca6   :  { %2458 = vrot.lane.b32.xlu0 %v4858_v14, %s5117_s28  ;;  %2464 = vrot.lane.b32.xlu1 %v4822_v34, %s3384_s7 }
 0xcaa   :  { %2454 = vrot.lane.b32.xlu0 %v4846_v61, %s5117_s28  ;;  %2460 = vrot.lane.b32.xlu1 %v4838_v53, %s3384_s7 }
 0xcae   :  { %2519 = vperm.xlu0 %3377, %v2499_v19   ;;  %2456 = vrot.lane.b32.xlu1 %v4868_v9, %s5117_s28 }
 0xcb2   :  { %2509 = vperm.xlu0 %3377, %v2497_v20   ;;  %2452 = vrot.lane.b32.xlu1 %v4840_v54, %s5117_s28 }
 0xcb6   :  { %2529 = vperm.xlu0 %3377, %v2501_v24   ;;  %2514 = vperm.xlu1 %3378, %v2498_v25  }
 0xcba   :  { %2504 = vperm.xlu1 %3378, %v2496_v26  }
 0xcbe   :  { %2524 = vperm.xlu1 %3378, %v2500_v28  }
 0xcd8   :  { %v2445_v13 = vpop.permute.xlu0 %2444 }
 0xcdc   :  { %v2447_v15 = vpop.permute.xlu0 %2446 }
 0xce0   :  { %v2449_v6 = vpop.permute.xlu0 %2448  ;;  %v2431_v30 = vpop.permute.xlu1 %2430 }
 0xce4   :  { %v2451_v7 = vpop.permute.xlu0 %2450  ;;  %v2433_v31 = vpop.permute.xlu1 %2432 }
 0xce5   :  { %3176 = vmatprep.subr.mxu1 %v2451_v7 }
 0xce8   :  { %v2443_v0 = vpop.permute.xlu0 %2442  ;;  %v2435_v59 = vpop.permute.xlu1 %2434 }
 0xcec   :  { %v2427_v32 = vpop.permute.xlu0 %2426  ;;  %v2437_v33 = vpop.permute.xlu1 %2436 }
 0xced   :  { %3177 = vmatpush3.msra.mxu1 %v2437_v33 }
 0xcee   :  { %3178 = vmatprep.subr.mxu1 %v2449_v6 }
 0xcef   :  { %3179 = vmatpush3.msra.mxu1 %v2435_v59 }
 0xcf0   :  { %v2419_v35 = vpop.permute.xlu0 %2418  ;;  %3180 = vmatprep.subr.mxu1 %v2447_v15  ;;  %v2429_v37 = vpop.permute.xlu1 %2428 }
 0xcf1   :  { %3181 = vmatpush3.msra.mxu1 %v2433_v31 }
 0xcf2   :  { %3182 = vmatprep.subr.mxu1 %v2445_v13 }
 0xcf3   :  { %3183 = vmatpush3.msra.mxu1 %v2431_v30 }
 0xcf4   :  { %v2423_v38 = vpop.permute.xlu0 %2422  ;;  %3184 = vmatprep.subr.mxu1 %v2443_v0  ;;  %v2425_v39 = vpop.permute.xlu1 %2424 }
 0xcf5   :  { %3185 = vmatpush3.msra.mxu1 %v2429_v37 }
 0xcf6   :  { %3186 = vmatprep.subr.mxu1 %v4858_v14  ;;  %v2483_v14 = vld [vmem:[%s5086_s18 + $0x28] sm:$0xff] }
 0xcf7   :  { %3187 = vmatpush3.msra.mxu1 %v2427_v32 }
 0xcf8   :  { %v2415_v41 = vpop.permute.xlu0 %2414  ;;  %3188 = vmatprep.subr.mxu1 %v4868_v9  ;;  %v2417_v36 = vpop.permute.xlu1 %2416  ;;  %v2495_v9 = vld [vmem:[%s5086_s18 + $0x88] sm:$0xff] }
 0xcf9   :  { %3189 = vmatpush3.msra.mxu1 %v2425_v39 }
 0xcfa   :  { %3190 = vmatprep.subr.mxu1 %v4846_v61  ;;  %v2490_v61 = vld [vmem:[%s5086_s18 + $0x60] sm:$0xff] }
 0xcfb   :  { %3191 = vmatpush3.msra.mxu1 %v2423_v38 }
 0xcfc   :  { %v2411_v42 = vpop.permute.xlu0 %2410  ;;  %3192 = vmatprep.subr.mxu1 %v4840_v54  ;;  %v2421_v44 = vpop.permute.xlu1 %2420  ;;  %v2488_v54 = vld [vmem:[%s5086_s18 + $0x50] sm:$0xff] }
 0xcfd   :  { %3193 = vmatpush3.msra.mxu1 %v2421_v44 }
 0xcfe   :  { %3194 = vmatprep.subr.mxu1 %v4832_v49 }
 0xcff   :  { %3195 = vmatpush3.msra.mxu1 %v2419_v35 }
 0xd00   :  { %v2409_v45 = vpop.permute.xlu0 %2408  ;;  %3196 = vmatprep.subr.mxu1 %v4826_v1  ;;  %v2413_v46 = vpop.permute.xlu1 %2412  ;;  %v2478_v1 = vld [vmem:[%s5086_s18] sm:$0xff] }
 0xd01   :  { %3197 = vmatpush3.msra.mxu1 %v2417_v36 }
 0xd02   :  { %3198 = vmatprep.subr.mxu1 %v4822_v34  ;;  %v2482_v34 = vld [vmem:[%s5086_s18 + $0x20] sm:$0xff] }
 0xd03   :  { %3199 = vmatpush3.msra.mxu1 %v2415_v41 }
 0xd04   :  { %v2407_v27 = vpop.permute.xlu0 %2406  ;;  %3200 = vmatprep.subr.mxu1 %v4818_v11  ;;  %v2439_v47 = vpop.permute.xlu1 %2438 }
 0xd05   :  { %3201 = vmatpush3.msra.mxu1 %v2413_v46 }
 0xd06   :  { %3202 = vmatprep.subr.mxu1 %v4838_v53  ;;  %v2484_v53 = vld [vmem:[%s5086_s18 + $0x30] sm:$0xff] }
 0xd07   :  { %3203 = vmatpush3.msra.mxu1 %v2411_v42 }
 0xd08   :  { %v2475_v40 = vpop.permute.xlu0 %2474  ;;  %v2441_v48 = vpop.permute.xlu1 %2440 }
 0xd09   :  { %3204 = vmatprep.subr.mxu1 %v2441_v48 }
 0xd0a   :  { %3205 = vmatpush3.msra.mxu1 %v2409_v45 }
 0xd0b   :  { %3206 = vmatprep.subr.mxu1 %v2439_v47 }
 0xd0c   :  { %v2471_v49 = vpop.permute.xlu0 %2470  ;;  %3207 = vmatpush3.msra.mxu1 %v2407_v27  ;;  %v2477_v11 = vpop.permute.xlu1 %2476 }
 0xd0d   :  { %2615 = vmatmul.mubr.f32.vlgmr.msra.gmra.mxu1 %v2478_v1  ;;  %3334 = vmatprep.subr.mxu1 %v2477_v11 }
 0xd0e   :  { %3335 = vmatpush3.msra.mxu1 %v2477_v11  ;;  %2619 = vmatprep.mubr.f32.mxu1 %v2482_v34 }
 0xd0f   :  { %3336 = vmatprep.subr.mxu1 %v2475_v40 }
 0xd10   :  { %v2467_v51 = vpop.permute.xlu0 %2466  ;;  %3337 = vmatpush3.msra.mxu1 %v2475_v40  ;;  %v2473_v52 = vpop.permute.xlu1 %2472 }
 0xd11   :  { %2620 = vmatmul.mubr.f32.gmra.mxu1 %v2481_v43  ;;  %3338 = vmatprep.subr.mxu1 %v2473_v52 }
 0xd12   :  { %3339 = vmatpush3.msra.mxu1 %v2473_v52  ;;  %2624 = vmatprep.mubr.f32.mxu1 %v2485_v50 }
 0xd13   :  { %3340 = vmatprep.subr.mxu1 %v2471_v49 }
 0xd14   :  { %3341 = vmatpush3.msra.mxu1 %v2471_v49  ;;  %v2469_v55 = vpop.permute.xlu1 %2468  ;;  %v2463_v56 = vpop.permute.xlu0 %2462 }
 0xd15   :  { %2625 = vmatmul.mubr.f32.gmra.mxu1 %v2484_v53  ;;  %3342 = vmatprep.subr.mxu1 %v2469_v55 }
 0xd16   :  { %3343 = vmatpush3.msra.mxu1 %v2469_v55  ;;  %2629 = vmatprep.mubr.f32.mxu1 %v2488_v54 }
 0xd17   :  { %3344 = vmatprep.subr.mxu1 %v2467_v51 }
 0xd18   :  { %3345 = vmatpush3.msra.mxu1 %v2467_v51  ;;  %v2465_v60 = vpop.permute.xlu1 %2464  ;;  %v2459_v63 = vpop.permute.xlu0 %2458 }
 0xd19   :  { %2630 = vmatmul.mubr.f32.gmra.mxu1 %v2487_v57  ;;  %3346 = vmatprep.subr.mxu1 %v2465_v60 }
 0xd1a   :  { %3347 = vmatpush3.msra.mxu1 %v2465_v60  ;;  %2634 = vmatprep.mubr.f32.mxu1 %v2491_v58 }
 0xd1b   :  { %3348 = vmatprep.subr.mxu1 %v2463_v56 }
 0xd1c   :  { %3349 = vmatpush3.msra.mxu1 %v2463_v56  ;;  %v2461_v2 = vpop.permute.xlu1 %2460  ;;  %v2455_v4 = vpop.permute.xlu0 %2454 }
 0xd1d   :  { %2635 = vmatmul.mubr.f32.gmra.mxu1 %v2490_v61  ;;  %3350 = vmatprep.subr.mxu1 %v2461_v2 }
 0xd1e   :  { %3351 = vmatpush3.msra.mxu1 %v2461_v2  ;;  %2639 = vmatprep.mubr.f32.mxu1 %v2494_v62  ;;  %v2776_v2 = vld [vmem:[%s5088_s21] sm:$0xff] }
 0xd1f   :  { %3352 = vmatprep.subr.mxu1 %v2459_v63 }
 0xd20   :  { %3353 = vmatpush3.msra.mxu1 %v2459_v63  ;;  %v2457_v8 = vpop.permute.xlu1 %2456  ;;  %v2771_v63 = vld [vmem:[%s5089_s20 + $0x8] sm:$0xff] }
 0xd21   :  { %2640 = vmatmul.mubr.f32.gmra.mxu1 %v2493_v3  ;;  %3354 = vmatprep.subr.mxu1 %v2457_v8  ;;  %v2777_v3 = vld [vmem:[%s5088_s21 + $0x8] sm:$0xff] }
 0xd22   :  { %3355 = vmatpush3.msra.mxu1 %v2457_v8  ;;  %3360 = vmatprep.mubr.msk.f32.mxu1 %vm1096_vm3, %v2480_v5  ;;  %v2778_v5 = vld [vmem:[%s5088_s21 + $0x10] sm:$0xff] }
 0xd23   :  { %3356 = vmatprep.subr.mxu1 %v2455_v4  ;;  %2956 = vmatprep.mubr.msk.f32.mxu0 %vm1359_vm4, %v2771_v63 }
 0xd24   :  { %3357 = vmatpush3.msra.mxu1 %v2455_v4  ;;  %v2453_v12 = vpop.permute.xlu1 %2452 }
 0xd25   :  { %3358 = vmatprep.subr.mxu1 %v2453_v12 }
 0xd26   :  { %3359 = vmatpush3.msra.mxu1 %v2453_v12 }
 0xd27   :  { %3361 = vmatmul.mubr.msk.f32.vlgmr.msra.gmra.mxu1 %vm1096_vm3, %v2483_v14 }
 0xd28   :  { %3363 = vmatprep.mubr.msk.f32.mxu1 %vm1096_vm3, %v2486_v16 }
 0xd29   :  { %v2520_v7 = vpop.permute.xlu0 %2519 }
 0xd2b   :  { %3364 = vmatmul.mubr.msk.f32.gmra.mxu1 %vm1096_vm3, %v2489_v17 }
 0xd2c   :  { %3366 = vmatprep.mubr.msk.f32.mxu1 %vm1096_vm3, %v2492_v18 }
 0xd2d   :  { %v2510_v37 = vpop.permute.xlu0 %2509 }
 0xd2f   :  { %3367 = vmatmul.mubr.msk.f32.gmra.mxu1 %vm1096_vm3, %v2495_v9 }
 0xd31   :  { %v2515_v31 = vpop.permute.xlu1 %2514  ;;  %v2530_v11 = vpop.permute.xlu0 %2529 }
 0xd35   :  { %v2505_v36 = vpop.permute.xlu1 %2504 }
 0xd39   :  { %v2525_v53 = vpop.permute.xlu1 %2524 }
 0xdcd   :  { %v3208_v10 = vpop.f32.mrf.mxu1 }
 0xdcf   :  { %v3209_v19 = vpop.f32.mrf.mxu1 }
 0xdd0   :  { %v3210_v38 = vadd.f32 %v3209_v19, %v3208_v10 }
 0xdd1   :  { %v3211_v20 = vpop.f32.mrf.mxu1 }
 0xdd2   :  { %v2617_v47 = vadd.f32 %v3210_v38, %v2505_v36 }
 0xdd3   :  { %v3212_v24 = vpop.f32.mrf.mxu1 }
 0xdd4   :  { %v3213_v33 = vadd.f32 %v3212_v24, %v3211_v20  ;;  %v2770_v24 = vld [vmem:[%s5089_s20] sm:$0xff] }
 0xdd5   :  { %v3214_v25 = vpop.f32.mrf.mxu1 }
 0xdd6   :  { %v2622_v45 = vadd.f32 %v3213_v33, %v2510_v37 }
 0xdd7   :  { %v3215_v26 = vpop.f32.mrf.mxu1 }
 0xdd8   :  { %v3216_v35 = vadd.f32 %v3215_v26, %v3214_v25  ;;  %v2773_v26 = vld [vmem:[%s5089_s20 + $0x18] sm:$0xff] }
 0xdd9   :  { %v3217_v28 = vpop.f32.mrf.mxu1 }
 0xdda   :  { %v2627_v27 = vadd.f32 %v3216_v35, %v2515_v31 }
 0xddb   :  { %v3218_v13 = vpop.f32.mrf.mxu1 }
 0xddc   :  { %v3219_v59 = vadd.f32 %v3218_v13, %v3217_v28  ;;  %v2772_v28 = vld [vmem:[%s5089_s20 + $0x10] sm:$0xff]  ;;  %v2775_v13 = vld [vmem:[%s5089_s20 + $0x28] sm:$0xff] }
 0xddd   :  { %v3220_v15 = vpop.f32.mrf.mxu1 }
 0xdde   :  { %v2632_v41 = vadd.f32 %v3219_v59, %v2520_v7 }
 0xddf   :  { %v3221_v6 = vpop.f32.mrf.mxu1 }
 0xde0   :  { %v3222_v48 = vadd.f32 %v3221_v6, %v3220_v15 }
 0xde1   :  { %v3223_v30 = vpop.f32.mrf.mxu1 }
 0xde2   :  { %v2637_v57 = vadd.f32 %v3222_v48, %v2525_v53 }
 0xde3   :  { %v3224_v0 = vpop.f32.mrf.mxu1 }
 0xde4   :  { %v3225_v44 = vadd.f32 %v3224_v0, %v3223_v30 }
 0xde6   :  { %v2642_v52 = vadd.f32 %v3225_v44, %v2530_v11 }
 0xde7   :  { %v3362_v32 = vpop.f32.mrf.mxu1 }
 0xde8   :  { %v2717_v1 = vadd.f32 %v3362_v32, %v2622_v45 }
 0xde9   :  { %v2711_v39 = vpop.f32.mrf.mxu1 }
 0xdea   :  { %v2712_v50 = vadd.f32 %v2711_v39, %v2617_v47  ;;  %v2741_v55 = vmax.f32 %v2717_v1, 0.0 }
 0xdeb   :  { %v3365_v42 = vpop.f32.mrf.mxu1 }
 0xdec   :  { %v2727_v46 = vadd.f32 %v3365_v42, %v2632_v41  ;;  %v2740_v58 = vmax.f32 %v2712_v50, 0.0 }
 0xded   :  { %v2721_v40 = vpop.f32.mrf.mxu1 }
 0xdee   :  { %v2743_v34 = vmax.f32 %v2727_v46, 0.0  ;;  %v2722_v49 = vadd.f32 %v2721_v40, %v2627_v27 }
 0xdef   :  { %v3368_v43 = vpop.f32.mrf.mxu1 }
 0xdf0   :  { %v2742_v51 = vmax.f32 %v2722_v49, 0.0  ;;  %2764 = vrot.lane.b32.xlu0 %v2743_v34, %s5117_s28  ;;  %v2737_v56 = vadd.f32 %v3368_v43, %v2642_v52 }
 0xdf1   :  { %v2731_v54 = vpop.f32.mrf.mxu1 }
 0xdf2   :  { %2762 = vrot.lane.b32.xlu1 %v2742_v51, %s5117_s28  ;;  %v2732_v60 = vadd.f32 %v2731_v54, %v2637_v57  ;;  %v2745_v61 = vmax.f32 %v2737_v56, 0.0 }
 0xdf4   :  { %2760 = vrot.lane.b32.xlu0 %v2741_v55, %s5117_s28  ;;  %v2744_v62 = vmax.f32 %v2732_v60, 0.0 }
 0xdf6   :  { %2758 = vrot.lane.b32.xlu1 %v2740_v58, %s5117_s28 }
 0xdf8   :  { %2756 = vrot.lane.b32.xlu0 %v2745_v61, %s3380_s6 }
 0xdfa   :  { %2754 = vrot.lane.b32.xlu1 %v2744_v62, %s3380_s6 }
 0xdfc   :  { %2752 = vrot.lane.b32.xlu0 %v2743_v34, %s3380_s6 }
 0xdfe   :  { %2750 = vrot.lane.b32.xlu1 %v2742_v51, %s3380_s6 }
 0xe00   :  { %2748 = vrot.lane.b32.xlu0 %v2741_v55, %s3380_s6 }
 0xe02   :  { %2746 = vrot.lane.b32.xlu1 %v2740_v58, %s3380_s6 }
 0xe04   :  { %2768 = vrot.lane.b32.xlu0 %v2745_v61, %s5117_s28 }
 0xe06   :  { %2766 = vrot.lane.b32.xlu1 %v2744_v62, %s5117_s28 }
 0xe08   :  { %2781 = vperm.xlu0 %3377, %v2776_v2  }
 0xe0a   :  { %2786 = vperm.xlu1 %3378, %v2777_v3  }
 0xe0c   :  { %2791 = vperm.xlu0 %3377, %v2778_v5  }
 0xe62   :  { %v2765_v8 = vpop.permute.xlu0 %2764 }
 0xe63   :  { %2804 = vmatpush1.msra.mxu0 %v2765_v8 }
 0xe64   :  { %2805 = vmatprep.subr.mxu0 %v3382_v22  ;;  %v2763_v4 = vpop.permute.xlu1 %2762 }
 0xe65   :  { %2806 = vmatpush1.msra.mxu0 %v2763_v4 }
 0xe66   :  { %v2761_v12 = vpop.permute.xlu0 %2760  ;;  %2807 = vmatprep.subr.mxu0 %v3382_v22 }
 0xe67   :  { %2808 = vmatpush1.msra.mxu0 %v2761_v12 }
 0xe68   :  { %2809 = vmatprep.subr.mxu0 %v3382_v22  ;;  %v2759_v14 = vpop.permute.xlu1 %2758 }
 0xe69   :  { %2810 = vmatpush1.msra.mxu0 %v2759_v14 }
 0xe6a   :  { %2811 = vmatprep.subr.mxu0 %v3382_v22  ;;  %v2757_v16 = vpop.permute.xlu0 %2756 }
 0xe6b   :  { %2812 = vmatpush1.msra.mxu0 %v2745_v61 }
 0xe6c   :  { %2813 = vmatprep.subr.mxu0 %v3382_v22  ;;  %v2755_v17 = vpop.permute.xlu1 %2754 }
 0xe6d   :  { %2814 = vmatpush1.msra.mxu0 %v2744_v62 }
 0xe6e   :  { %2815 = vmatprep.subr.mxu0 %v3382_v22  ;;  %v2753_v18 = vpop.permute.xlu0 %2752 }
 0xe6f   :  { %2816 = vmatpush1.msra.mxu0 %v2743_v34 }
 0xe70   :  { %2817 = vmatprep.subr.mxu0 %v3382_v22  ;;  %v2751_v9 = vpop.permute.xlu1 %2750 }
 0xe71   :  { %2818 = vmatpush1.msra.mxu0 %v2742_v51 }
 0xe72   :  { %2819 = vmatprep.subr.mxu0 %v3382_v22  ;;  %v2749_v10 = vpop.permute.xlu0 %2748 }
 0xe73   :  { %2820 = vmatpush1.msra.mxu0 %v2741_v55 }
 0xe74   :  { %2821 = vmatprep.subr.mxu0 %v3382_v22  ;;  %v2747_v19 = vpop.permute.xlu1 %2746 }
 0xe75   :  { %2822 = vmatpush1.msra.mxu0 %v2740_v58 }
 0xe76   :  { %2823 = vmatprep.subr.mxu0 %v3382_v22  ;;  %v2769_v20 = vpop.permute.xlu0 %2768 }
 0xe77   :  { %2824 = vmatpush1.msra.mxu0 %v2757_v16 }
 0xe78   :  { %2825 = vmatprep.subr.mxu0 %v3382_v22  ;;  %v2767_v25 = vpop.permute.xlu1 %2766 }
 0xe79   :  { %2826 = vmatpush1.msra.mxu0 %v2755_v17 }
 0xe7a   :  { %2827 = vmatprep.subr.mxu0 %v3382_v22 }
 0xe7b   :  { %2828 = vmatpush1.msra.mxu0 %v2753_v18 }
 0xe7c   :  { %2829 = vmatprep.subr.mxu0 %v3382_v22 }
 0xe7d   :  { %2830 = vmatpush1.msra.mxu0 %v2751_v9 }
 0xe7e   :  { %2831 = vmatprep.subr.mxu0 %v3382_v22 }
 0xe7f   :  { %2832 = vmatpush1.msra.mxu0 %v2749_v10 }
 0xe80   :  { %2833 = vmatprep.subr.mxu0 %v3382_v22 }
 0xe81   :  { %2834 = vmatpush1.msra.mxu0 %v2747_v19 }
 0xe82   :  { %2863 = vmatprep.subr.mxu0 %v3382_v22 }
 0xe83   :  { %2864 = vmatpush2.msra.mxu0 %v2769_v20  ;;  %v2782_v15 = vpop.permute.xlu0 %2781 }
 0xe84   :  { %2865 = vmatprep.subr.mxu0 %v3382_v22  ;;  %v2774_v22 = vld [vmem:[%s5089_s20 + $0x20] sm:$0xff] }
 0xe85   :  { %2866 = vmatpush2.msra.mxu0 %v2767_v25  ;;  %v2787_v0 = vpop.permute.xlu1 %2786 }
 0xe86   :  { %2868 = vmatmul.mubr.f32.vlgmr.msra.gmra.mxu0 %v2770_v24 }
 0xe87   :  { %2957 = vmatprep.mubr.msk.f32.mxu0 %vm1359_vm4, %v2773_v26  ;;  %v2792_v37 = vpop.permute.xlu0 %2791 }
 0xe8a   :  { %2873 = vmatmul.mubr.f32.gmra.mxu0 %v2772_v28 }
 0xe8b   :  { %2958 = vmatprep.mubr.msk.f32.mxu0 %vm1359_vm4, %v2775_v13 }
 0xe8e   :  { %2878 = vmatmul.mubr.f32.gmra.mxu0 %v2774_v22 }
 0xf46   :  { %v2869_v6 = vpop.f32.mrf.mxu0 }
 0xf47   :  { %v2870_v30 = vadd.f32 %v2869_v6, %v2782_v15 }
 0xf48   :  { %v2871_v7 = vpop.f32.mrf.mxu0 }
 0xf49   :  { %v2883_v31 = vadd.f32 %v2870_v30, %v4272_v23 }
 0xf4a   :  { %v2874_v59 = vpop.f32.mrf.mxu0 }
 0xf4b   :  { %2886 = vst [vmem:[%s5090_s22] sm:$0xff] %v2883_v31  ;;  %v2875_v32 = vadd.f32 %v2874_v59, %v2787_v0 }
 0xf4c   :  { %v2876_v33 = vpop.f32.mrf.mxu0 }
 0xf4d   :  { %v2884_v35 = vadd.f32 %v2875_v32, %v4270_v21 }
 0xf4e   :  { %v2879_v38 = vpop.f32.mrf.mxu0 }
 0xf4f   :  { %2887 = vst [vmem:[%s5090_s22 + $0x8] sm:$0xff] %v2884_v35  ;;  %v2880_v39 = vadd.f32 %v2879_v38, %v2792_v37 }
 0xf50   :  { %v2881_v41 = vpop.f32.mrf.mxu0 }
 0xf51   :  { %v2885_v23 = vadd.f32 %v2880_v39, %v4277_v29 }
 0xf53   :  { %2888 = vst [vmem:[%s5090_s22 + $0x10] sm:$0xff] %v2885_v23 }

</bundles_post_ra>
